<compile_context>
chip_gen: v7x
topology: tpu7x:2x2x1
jax: 0.10.0
libtpu: 0.0.40
codegen_flags: <defaults>
</compile_context>

<pallas_src>
import functools
import math

import jax
import jax.numpy as jnp
from jax.experimental import pallas as pl
from jax.experimental.pallas import tpu as pltpu


def _round_up(n, m):
    return ((n + m - 1) // m) * m


def _gelu(v):
    # exact (erf-based) GELU, matching torch.nn.GELU() default
    return 0.5 * v * (1.0 + jax.lax.erf(v * (1.0 / math.sqrt(2.0))))


def _mlp_kernel(
    xty_ref,      # (TB, x_dim + 1 + y_dim)   fused row input
    const_ref,    # (16, W)                   packed (1,·) constants / biases
    yw1_ref,      # (y_dim, 128)
    yw2_ref,      # (128, 128)
    xw1x_ref,     # (x_dim, H)
    xw1t_ref,     # (128, H)
    xw1y_ref,     # (128, H)
    xw2_ref,      # (H, H)
    ow1_ref,      # (H, H)
    ow2_ref,      # (H, OUT_PAD)
    out_ref,      # (TB, OUT_PAD)
    *, x_dim, y_dim, H, OUT_PAD,
):
    f32 = jnp.float32

    xty = xty_ref[...]
    x = xty[:, :x_dim]                              # (TB, x_dim)
    t = xty[:, x_dim:x_dim + 1]                     # (TB, 1)
    y = xty[:, x_dim + 1:]                          # (TB, y_dim)

    consts = const_ref[...]                         # (16, W)
    harm  = consts[0:1, :128]
    phase = consts[1:2, :128]
    yb1   = consts[2:3, :128]
    yb2   = consts[3:4, :128]
    xb1   = consts[4:5, :H]
    xb2   = consts[5:6, :H]
    ob1   = consts[6:7, :H]
    ln_g  = consts[7:8, :H]
    ln_b  = consts[8:9, :H]
    ob2   = consts[9:10, :OUT_PAD]

    # Fused Fourier time embedding: one lane-dense (TB,128) sin pass.
    #   lanes 0..63 : sin(t*harm), lanes 64..127: sin(t*harm + pi/2) == cos(t*harm)
    t_emb = jnp.sin(t * harm + phase)               # (TB, 128)

    # y_embedding: Linear(y_dim,128) -> GELU -> Linear(128,128)
    if y_dim == 1:
        # K=1 "matmul" as a VPU broadcast multiply-add (keeps the MXU off the
        # critical path at the head of the kernel).
        h = y * yw1_ref[...] + yb1                  # (TB,1)*(1,128) -> (TB,128)
    else:
        h = jnp.dot(y, yw1_ref[...], preferred_element_type=f32) + yb1
    h = _gelu(h)
    y_emb = jnp.dot(h, yw2_ref[...], preferred_element_type=f32) + yb2

    # x_model layer 1 on cat([x, t_emb, y_emb], 1) -- no concat materialization,
    # the weight rows are split so we issue three dots that sum into one (TB,H).
    z = (jnp.dot(x,     xw1x_ref[...], preferred_element_type=f32)
         + jnp.dot(t_emb, xw1t_ref[...], preferred_element_type=f32)
         + jnp.dot(y_emb, xw1y_ref[...], preferred_element_type=f32)
         + xb1)
    z = _gelu(z)
    z = jnp.dot(z, xw2_ref[...], preferred_element_type=f32) + xb2
    z = _gelu(z)                                    # x_emb, (TB, H)

    # out_model: Linear -> LayerNorm -> GELU -> Linear (padded to 128 output lanes)
    u = jnp.dot(z, ow1_ref[...], preferred_element_type=f32) + ob1
    mu = jnp.mean(u, axis=-1, keepdims=True)
    var = jnp.mean((u - mu) * (u - mu), axis=-1, keepdims=True)
    u = (u - mu) * jax.lax.rsqrt(var + 1e-5) * ln_g + ln_b
    u = _gelu(u)
    # lane-dense (TB, OUT_PAD) unmasked store; extra lanes carry zeros
    out_ref[...] = jnp.dot(u, ow2_ref[...], preferred_element_type=f32) + ob2


def conditional_diffusion_forward(x, t, y, params, *, num_tiles=2):
    """Pallas forward of ConditionalDiffusionModel(x, t, y).

    num_tiles: batch-grid steps. Use 2 (default) so both TensorCores are engaged
    on v7x; on single-TC v5e/v6e, 1 avoids the (tiny) extra per-step overhead.
    """
    B, x_dim = x.shape
    y_dim = y.shape[-1]
    H = params["xw2"].shape[-1]
    OUT_PAD = params["ow2_pad"].shape[-1]           # lane-dense output width (>=128)

    num_tiles = max(1, int(num_tiles))
    TB = max(8, _round_up(pl.cdiv(B, num_tiles), 8))
    B_pad = TB * num_tiles

    # Fused row input [x | t | y]  -> one DMA per grid step.
    xty = jnp.concatenate(
        [x.astype(jnp.float32),
         t.reshape(B, 1).astype(jnp.float32),
         y.astype(jnp.float32)], axis=1)
    if B_pad != B:
        xty = jnp.pad(xty, ((0, B_pad - B), (0, 0)))
    xty_width = xty.shape[1]

    weights = (
        params["const"],
        params["yw1"], params["yw2"],
        params["xw1_x"], params["xw1_t"], params["xw1_y"],
        params["xw2"], params["ow1"], params["ow2_pad"],
    )

    in_specs = [pl.BlockSpec((TB, xty_width), lambda i: (i, 0))]
    # weights/constants: full array, pinned (resident across all batch tiles)
    in_specs += [pl.BlockSpec(w.shape, lambda i: (0, 0)) for w in weights]

    # Advisory cost estimate (weights counted ONCE; pinned blocks DMA once).
    flops = 2 * B_pad * (128 * 128 + (x_dim + 128 + 128) * H
                         + H * H + H * H + H * OUT_PAD)
    transcendentals = B_pad * (128 + 2 * 128 + 3 * H + H)   # sin + 4 GELU passes
    weight_bytes = sum(int(w.size) for w in weights) * 4
    bytes_accessed = 4 * B_pad * (xty_width + OUT_PAD) + weight_bytes

    kernel = functools.partial(
        _mlp_kernel, x_dim=x_dim, y_dim=y_dim, H=H, OUT_PAD=OUT_PAD)

    out = pl.pallas_call(
        kernel,
        out_shape=jax.ShapeDtypeStruct((B_pad, OUT_PAD), jnp.float32),
        grid=(num_tiles,),
        in_specs=in_specs,
        out_specs=pl.BlockSpec((TB, OUT_PAD), lambda i: (i, 0)),
        compiler_params=pltpu.CompilerParams(
            dimension_semantics=("parallel",)),
        cost_estimate=pl.CostEstimate(
            flops=int(flops),
            transcendentals=int(transcendentals),
            bytes_accessed=int(bytes_accessed)),
    )(xty, *weights)

    return out[:B, :x_dim]


def init_params(key, x_dim, hidden_dim, y_dim):
    """Deterministic synthetic parameters (same shapes as the PyTorch module)."""
    keys = jax.random.split(key, 8)
    k = iter(keys)

    def lin(kk, fan_in, fan_out):
        # torch.nn.Linear default init: U(-1/sqrt(fan_in), 1/sqrt(fan_in))
        bound = 1.0 / math.sqrt(fan_in)
        kw, kb = jax.random.split(kk)
        W = jax.random.uniform(kw, (fan_in, fan_out), jnp.float32, -bound, bound)
        b = jax.random.uniform(kb, (1, fan_out), jnp.float32, -bound, bound)
        return W, b

    H = hidden_dim
    D = x_dim

    yw1, yb1 = lin(next(k), y_dim, 128)
    yw2, yb2 = lin(next(k), 128, 128)

    # x_model first layer: Linear(x_dim + 128 + 128, H); split its weight rows into
    # the x block, the t_emb block ([sin|cos], rows D..D+127) and the y_emb block
    # (rows D+128..D+255).  Matches the fused t_emb layout in-kernel.
    xw1, xb1 = lin(next(k), D + 256, H)
    xw1_x = xw1[:D]
    xw1_t = xw1[D:D + 128]
    xw1_y = xw1[D + 128:]

    xw2, xb2 = lin(next(k), H, H)

    ow1, ob1 = lin(next(k), H, H)
    ln_g = jnp.ones((1, H), jnp.float32)
    ln_b = jnp.zeros((1, H), jnp.float32)
    ow2, ob2 = lin(next(k), H, D)

    # Lane-dense output: zero-pad the final Linear to a multiple of 128 lanes.
    OUT_PAD = max(128, _round_up(D, 128))
    ow2_pad = jnp.pad(ow2, ((0, 0), (0, OUT_PAD - D)))
    ob2_pad = jnp.pad(ob2, ((0, 0), (0, OUT_PAD - D)))

    # Fused fourier embedding constants:
    #   harm128  = [harm, harm]            (1, 128)
    #   phase128 = [0...0, pi/2...pi/2]    (1, 128)   (sin(a + pi/2) == cos(a))
    harm = jnp.arange(1, 65, dtype=jnp.float32) * 2.0 * math.pi
    harm128 = jnp.tile(harm, 2).reshape(1, 128)
    phase128 = jnp.concatenate(
        [jnp.zeros((64,), jnp.float32),
         jnp.full((64,), 0.5 * math.pi, jnp.float32)]).reshape(1, 128)

    # Pack all (1,·) constants / biases into one pinned slab: fewer input DMAs.
    W = max(128, _round_up(H, 128), OUT_PAD)

    def row(v):
        v = v.reshape(1, -1)
        return jnp.pad(v, ((0, 0), (0, W - v.shape[1])))

    const = jnp.concatenate(
        [row(harm128), row(phase128), row(yb1), row(yb2),
         row(xb1), row(xb2), row(ob1), row(ln_g), row(ln_b), row(ob2_pad)],
        axis=0)
    const = jnp.pad(const, ((0, 16 - const.shape[0]), (0, 0)))   # sublane-align rows

    # NOTE: means_scaling_model and the diffusion schedule buffers exist in the
    # PyTorch module but are unused in forward(); intentionally not materialized.
    return dict(
        const=const,
        yw1=yw1, yw2=yw2,
        xw1_x=xw1_x, xw1_t=xw1_t, xw1_y=xw1_y,
        xw2=xw2, ow1=ow1, ow2_pad=ow2_pad,
        # unpacked copies kept only for the plain-JAX reference check:
        yb1=yb1, yb2=yb2, xb1=xb1, xb2=xb2,
        ob1=ob1, ln_g=ln_g, ln_b=ln_b, ob2_pad=ob2_pad,
    )


def reference_forward(x, t, y, p):
    """Plain-JAX reference mirroring the PyTorch forward (for correctness check)."""
    B, x_dim = x.shape
    harm = jnp.arange(1, 65, dtype=jnp.float32) * 2.0 * math.pi
    t2 = t.reshape(-1, 1)
    arg = t2 * harm
    t_emb = jnp.concatenate([jnp.sin(arg), jnp.cos(arg)], axis=1)
    y_emb = _gelu(y @ p["yw1"] + p["yb1"]) @ p["yw2"] + p["yb2"]
    xw1 = jnp.concatenate([p["xw1_x"], p["xw1_t"], p["xw1_y"]], axis=0)
    inp = jnp.concatenate([x, t_emb, y_emb], axis=1)
    z = _gelu(inp @ xw1 + p["xb1"])
    z = _gelu(z @ p["xw2"] + p["xb2"])
    u = z @ p["ow1"] + p["ob1"]
    mu = jnp.mean(u, axis=-1, keepdims=True)
    var = jnp.mean((u - mu) ** 2, axis=-1, keepdims=True)
    u = (u - mu) * jax.lax.rsqrt(var + 1e-5) * p["ln_g"] + p["ln_b"]
    ow2 = p["ow2_pad"][:, :x_dim]
    ob2 = p["ob2_pad"][:, :x_dim]
    return _gelu(u) @ ow2 + ob2


if __name__ == "__main__":
    # Shapes consistent with the module's forward:
    #   x: (B, x_dim), t: (B,), y: (B, y_dim)
    # B=200 with num_tiles=2 exercises the batch grid (2 tiles) plus batch padding.
    B, x_dim, hidden_dim, y_dim = 200, 16, 32, 1

    key = jax.random.PRNGKey(0)
    kx, kt, ky, kp = jax.random.split(key, 4)

    x = jax.random.normal(kx, (B, x_dim), jnp.float32)
    t = jax.random.uniform(kt, (B,), jnp.float32)           # diffusion time in [0,1)
    y = jax.random.normal(ky, (B, y_dim), jnp.float32)

    params = init_params(kp, x_dim, hidden_dim, y_dim)

    out = conditional_diffusion_forward(x, t, y, params, num_tiles=2)
    out = jax.block_until_ready(out)

    ref = reference_forward(x, t, y, params)
    assert out.shape == (B, x_dim)
    assert jnp.allclose(out, ref, atol=1e-4, rtol=1e-4), "mismatch vs reference"

    print("KERNEL_OK")
</pallas_src>

<mosaic_0001>
module attributes {stable_mosaic.version = 11 : i64} {
  func.func @_mlp_kernel(%arg0: i32, %arg1: memref<104x18xf32, #tpu.memory_space<vmem>>, %arg2: memref<16x128xf32, #tpu.memory_space<vmem>>, %arg3: memref<1x128xf32, #tpu.memory_space<vmem>>, %arg4: memref<128x128xf32, #tpu.memory_space<vmem>>, %arg5: memref<16x32xf32, #tpu.memory_space<vmem>>, %arg6: memref<128x32xf32, #tpu.memory_space<vmem>>, %arg7: memref<128x32xf32, #tpu.memory_space<vmem>>, %arg8: memref<32x32xf32, #tpu.memory_space<vmem>>, %arg9: memref<32x32xf32, #tpu.memory_space<vmem>>, %arg10: memref<32x128xf32, #tpu.memory_space<vmem>>, %arg11: memref<104x128xf32, #tpu.memory_space<vmem>>) attributes {dimension_semantics = [#tpu.dimension_semantics<parallel>], iteration_bounds = array<i64: 2>, scalar_prefetch = 0 : i64, scratch_operands = 0 : i64, tpu.core_type = #tpu.core_type<tc>, window_params = [{transform_indices = @transform_0, window_bounds = array<i64: 104, 18>}, {pipeline_mode = #tpu.pipeline_mode<synchronous>, transform_indices = @transform_1, window_bounds = array<i64: 16, 128>}, {pipeline_mode = #tpu.pipeline_mode<synchronous>, transform_indices = @transform_2, window_bounds = array<i64: 1, 128>}, {pipeline_mode = #tpu.pipeline_mode<synchronous>, transform_indices = @transform_3, window_bounds = array<i64: 128, 128>}, {pipeline_mode = #tpu.pipeline_mode<synchronous>, transform_indices = @transform_4, window_bounds = array<i64: 16, 32>}, {pipeline_mode = #tpu.pipeline_mode<synchronous>, transform_indices = @transform_5, window_bounds = array<i64: 128, 32>}, {pipeline_mode = #tpu.pipeline_mode<synchronous>, transform_indices = @transform_6, window_bounds = array<i64: 128, 32>}, {pipeline_mode = #tpu.pipeline_mode<synchronous>, transform_indices = @transform_7, window_bounds = array<i64: 32, 32>}, {pipeline_mode = #tpu.pipeline_mode<synchronous>, transform_indices = @transform_8, window_bounds = array<i64: 32, 32>}, {pipeline_mode = #tpu.pipeline_mode<synchronous>, transform_indices = @transform_9, window_bounds = array<i64: 32, 128>}, {transform_indices = @transform_10, window_bounds = array<i64: 104, 128>}]} {
    %c0 = arith.constant 0 : index
    %c0_0 = arith.constant 0 : index
    %0 = vector.load %arg1[%c0, %c0_0] : memref<104x18xf32, #tpu.memory_space<vmem>>, vector<104x18xf32>
    %1 = vector.extract_strided_slice %0 {offsets = [0, 0], sizes = [104, 16], strides = [1, 1]} : vector<104x18xf32> to vector<104x16xf32>
    %2 = vector.extract_strided_slice %0 {offsets = [0, 16], sizes = [104, 1], strides = [1, 1]} : vector<104x18xf32> to vector<104x1xf32>
    %3 = vector.extract_strided_slice %0 {offsets = [0, 17], sizes = [104, 1], strides = [1, 1]} : vector<104x18xf32> to vector<104x1xf32>
    %c0_1 = arith.constant 0 : index
    %c0_2 = arith.constant 0 : index
    %4 = vector.load %arg2[%c0_1, %c0_2] : memref<16x128xf32, #tpu.memory_space<vmem>>, vector<16x128xf32>
    %5 = vector.extract_strided_slice %4 {offsets = [0, 0], sizes = [1, 128], strides = [1, 1]} : vector<16x128xf32> to vector<1x128xf32>
    %6 = vector.extract_strided_slice %4 {offsets = [1, 0], sizes = [1, 128], strides = [1, 1]} : vector<16x128xf32> to vector<1x128xf32>
    %7 = vector.extract_strided_slice %4 {offsets = [2, 0], sizes = [1, 128], strides = [1, 1]} : vector<16x128xf32> to vector<1x128xf32>
    %8 = vector.extract_strided_slice %4 {offsets = [3, 0], sizes = [1, 128], strides = [1, 1]} : vector<16x128xf32> to vector<1x128xf32>
    %9 = vector.extract_strided_slice %4 {offsets = [4, 0], sizes = [1, 32], strides = [1, 1]} : vector<16x128xf32> to vector<1x32xf32>
    %10 = vector.extract_strided_slice %4 {offsets = [5, 0], sizes = [1, 32], strides = [1, 1]} : vector<16x128xf32> to vector<1x32xf32>
    %11 = vector.extract_strided_slice %4 {offsets = [6, 0], sizes = [1, 32], strides = [1, 1]} : vector<16x128xf32> to vector<1x32xf32>
    %12 = vector.extract_strided_slice %4 {offsets = [7, 0], sizes = [1, 32], strides = [1, 1]} : vector<16x128xf32> to vector<1x32xf32>
    %13 = vector.extract_strided_slice %4 {offsets = [8, 0], sizes = [1, 32], strides = [1, 1]} : vector<16x128xf32> to vector<1x32xf32>
    %14 = vector.extract_strided_slice %4 {offsets = [9, 0], sizes = [1, 128], strides = [1, 1]} : vector<16x128xf32> to vector<1x128xf32>
    %15 = vector.broadcast %2 : vector<104x1xf32> to vector<104x128xf32>
    %16 = vector.broadcast %5 : vector<1x128xf32> to vector<104x128xf32>
    %17 = arith.mulf %15, %16 : vector<104x128xf32>
    %18 = vector.broadcast %6 : vector<1x128xf32> to vector<104x128xf32>
    %19 = arith.addf %17, %18 : vector<104x128xf32>
    %20 = math.sin %19 : vector<104x128xf32>
    %c0_3 = arith.constant 0 : index
    %c0_4 = arith.constant 0 : index
    %21 = vector.load %arg3[%c0_3, %c0_4] : memref<1x128xf32, #tpu.memory_space<vmem>>, vector<1x128xf32>
    %22 = vector.broadcast %3 : vector<104x1xf32> to vector<104x128xf32>
    %23 = vector.broadcast %21 : vector<1x128xf32> to vector<104x128xf32>
    %24 = arith.mulf %22, %23 : vector<104x128xf32>
    %25 = vector.broadcast %7 : vector<1x128xf32> to vector<104x128xf32>
    %26 = arith.addf %24, %25 : vector<104x128xf32>
    %cst = arith.constant 5.000000e-01 : f32
    %27 = vector.broadcast %cst : f32 to vector<104x128xf32>
    %28 = arith.mulf %27, %26 : vector<104x128xf32>
    %cst_5 = arith.constant 0.707106769 : f32
    %29 = vector.broadcast %cst_5 : f32 to vector<104x128xf32>
    %30 = arith.mulf %26, %29 : vector<104x128xf32>
    %31 = math.erf %30 : vector<104x128xf32>
    %cst_6 = arith.constant 1.000000e+00 : f32
    %32 = vector.broadcast %cst_6 : f32 to vector<104x128xf32>
    %33 = arith.addf %32, %31 : vector<104x128xf32>
    %34 = arith.mulf %28, %33 : vector<104x128xf32>
    %c0_7 = arith.constant 0 : index
    %c0_8 = arith.constant 0 : index
    %35 = vector.load %arg4[%c0_7, %c0_8] : memref<128x128xf32, #tpu.memory_space<vmem>>, vector<128x128xf32>
    %cst_9 = arith.constant dense<0.000000e+00> : vector<104x128xf32>
    %36 = tpu.matmul %34, %35, %cst_9 {dimension_numbers = #tpu.dot_dimension_numbers<[1], [0], [0], [1], [0, 0, 1, 1], [], []>} : vector<104x128xf32>, vector<128x128xf32>, vector<104x128xf32> -> vector<104x128xf32>
    %37 = vector.broadcast %8 : vector<1x128xf32> to vector<104x128xf32>
    %38 = arith.addf %36, %37 : vector<104x128xf32>
    %c0_10 = arith.constant 0 : index
    %c0_11 = arith.constant 0 : index
    %39 = vector.load %arg5[%c0_10, %c0_11] : memref<16x32xf32, #tpu.memory_space<vmem>>, vector<16x32xf32>
    %cst_12 = arith.constant dense<0.000000e+00> : vector<104x32xf32>
    %40 = tpu.matmul %1, %39, %cst_12 {dimension_numbers = #tpu.dot_dimension_numbers<[1], [0], [0], [1], [0, 0, 1, 1], [], []>} : vector<104x16xf32>, vector<16x32xf32>, vector<104x32xf32> -> vector<104x32xf32>
    %c0_13 = arith.constant 0 : index
    %c0_14 = arith.constant 0 : index
    %41 = vector.load %arg6[%c0_13, %c0_14] : memref<128x32xf32, #tpu.memory_space<vmem>>, vector<128x32xf32>
    %cst_15 = arith.constant dense<0.000000e+00> : vector<104x32xf32>
    %42 = tpu.matmul %20, %41, %cst_15 {dimension_numbers = #tpu.dot_dimension_numbers<[1], [0], [0], [1], [0, 0, 1, 1], [], []>} : vector<104x128xf32>, vector<128x32xf32>, vector<104x32xf32> -> vector<104x32xf32>
    %43 = arith.addf %40, %42 : vector<104x32xf32>
    %c0_16 = arith.constant 0 : index
    %c0_17 = arith.constant 0 : index
    %44 = vector.load %arg7[%c0_16, %c0_17] : memref<128x32xf32, #tpu.memory_space<vmem>>, vector<128x32xf32>
    %cst_18 = arith.constant dense<0.000000e+00> : vector<104x32xf32>
    %45 = tpu.matmul %38, %44, %cst_18 {dimension_numbers = #tpu.dot_dimension_numbers<[1], [0], [0], [1], [0, 0, 1, 1], [], []>} : vector<104x128xf32>, vector<128x32xf32>, vector<104x32xf32> -> vector<104x32xf32>
    %46 = arith.addf %43, %45 : vector<104x32xf32>
    %47 = vector.broadcast %9 : vector<1x32xf32> to vector<104x32xf32>
    %48 = arith.addf %46, %47 : vector<104x32xf32>
    %cst_19 = arith.constant 5.000000e-01 : f32
    %49 = vector.broadcast %cst_19 : f32 to vector<104x32xf32>
    %50 = arith.mulf %49, %48 : vector<104x32xf32>
    %cst_20 = arith.constant 0.707106769 : f32
    %51 = vector.broadcast %cst_20 : f32 to vector<104x32xf32>
    %52 = arith.mulf %48, %51 : vector<104x32xf32>
    %53 = math.erf %52 : vector<104x32xf32>
    %cst_21 = arith.constant 1.000000e+00 : f32
    %54 = vector.broadcast %cst_21 : f32 to vector<104x32xf32>
    %55 = arith.addf %54, %53 : vector<104x32xf32>
    %56 = arith.mulf %50, %55 : vector<104x32xf32>
    %c0_22 = arith.constant 0 : index
    %c0_23 = arith.constant 0 : index
    %57 = vector.load %arg8[%c0_22, %c0_23] : memref<32x32xf32, #tpu.memory_space<vmem>>, vector<32x32xf32>
    %cst_24 = arith.constant dense<0.000000e+00> : vector<104x32xf32>
    %58 = tpu.matmul %56, %57, %cst_24 {dimension_numbers = #tpu.dot_dimension_numbers<[1], [0], [0], [1], [0, 0, 1, 1], [], []>} : vector<104x32xf32>, vector<32x32xf32>, vector<104x32xf32> -> vector<104x32xf32>
    %59 = vector.broadcast %10 : vector<1x32xf32> to vector<104x32xf32>
    %60 = arith.addf %58, %59 : vector<104x32xf32>
    %cst_25 = arith.constant 5.000000e-01 : f32
    %61 = vector.broadcast %cst_25 : f32 to vector<104x32xf32>
    %62 = arith.mulf %61, %60 : vector<104x32xf32>
    %cst_26 = arith.constant 0.707106769 : f32
    %63 = vector.broadcast %cst_26 : f32 to vector<104x32xf32>
    %64 = arith.mulf %60, %63 : vector<104x32xf32>
    %65 = math.erf %64 : vector<104x32xf32>
    %cst_27 = arith.constant 1.000000e+00 : f32
    %66 = vector.broadcast %cst_27 : f32 to vector<104x32xf32>
    %67 = arith.addf %66, %65 : vector<104x32xf32>
    %68 = arith.mulf %62, %67 : vector<104x32xf32>
    %c0_28 = arith.constant 0 : index
    %c0_29 = arith.constant 0 : index
    %69 = vector.load %arg9[%c0_28, %c0_29] : memref<32x32xf32, #tpu.memory_space<vmem>>, vector<32x32xf32>
    %cst_30 = arith.constant dense<0.000000e+00> : vector<104x32xf32>
    %70 = tpu.matmul %68, %69, %cst_30 {dimension_numbers = #tpu.dot_dimension_numbers<[1], [0], [0], [1], [0, 0, 1, 1], [], []>} : vector<104x32xf32>, vector<32x32xf32>, vector<104x32xf32> -> vector<104x32xf32>
    %71 = vector.broadcast %11 : vector<1x32xf32> to vector<104x32xf32>
    %72 = arith.addf %70, %71 : vector<104x32xf32>
    %cst_31 = arith.constant dense<0.000000e+00> : vector<104xf32>
    %73 = vector.multi_reduction <add>, %72, %cst_31 [1] : vector<104x32xf32> to vector<104xf32>
    %74 = vector.shape_cast %73 : vector<104xf32> to vector<104x1xf32>
    %cst_32 = arith.constant 3.200000e+01 : f32
    %75 = vector.broadcast %cst_32 : f32 to vector<104x1xf32>
    %76 = arith.divf %74, %75 : vector<104x1xf32>
    %77 = vector.broadcast %76 : vector<104x1xf32> to vector<104x32xf32>
    %78 = arith.subf %72, %77 : vector<104x32xf32>
    %79 = vector.broadcast %76 : vector<104x1xf32> to vector<104x32xf32>
    %80 = arith.subf %72, %79 : vector<104x32xf32>
    %81 = arith.mulf %78, %80 : vector<104x32xf32>
    %cst_33 = arith.constant dense<0.000000e+00> : vector<104xf32>
    %82 = vector.multi_reduction <add>, %81, %cst_33 [1] : vector<104x32xf32> to vector<104xf32>
    %83 = vector.shape_cast %82 : vector<104xf32> to vector<104x1xf32>
    %cst_34 = arith.constant 3.200000e+01 : f32
    %84 = vector.broadcast %cst_34 : f32 to vector<104x1xf32>
    %85 = arith.divf %83, %84 : vector<104x1xf32>
    %86 = vector.broadcast %76 : vector<104x1xf32> to vector<104x32xf32>
    %87 = arith.subf %72, %86 : vector<104x32xf32>
    %cst_35 = arith.constant 9.99999974E-6 : f32
    %88 = vector.broadcast %cst_35 : f32 to vector<104x1xf32>
    %89 = arith.addf %85, %88 : vector<104x1xf32>
    %90 = math.rsqrt %89 : vector<104x1xf32>
    %91 = vector.broadcast %90 : vector<104x1xf32> to vector<104x32xf32>
    %92 = arith.mulf %87, %91 : vector<104x32xf32>
    %93 = vector.broadcast %12 : vector<1x32xf32> to vector<104x32xf32>
    %94 = arith.mulf %92, %93 : vector<104x32xf32>
    %95 = vector.broadcast %13 : vector<1x32xf32> to vector<104x32xf32>
    %96 = arith.addf %94, %95 : vector<104x32xf32>
    %cst_36 = arith.constant 5.000000e-01 : f32
    %97 = vector.broadcast %cst_36 : f32 to vector<104x32xf32>
    %98 = arith.mulf %97, %96 : vector<104x32xf32>
    %cst_37 = arith.constant 0.707106769 : f32
    %99 = vector.broadcast %cst_37 : f32 to vector<104x32xf32>
    %100 = arith.mulf %96, %99 : vector<104x32xf32>
    %101 = math.erf %100 : vector<104x32xf32>
    %cst_38 = arith.constant 1.000000e+00 : f32
    %102 = vector.broadcast %cst_38 : f32 to vector<104x32xf32>
    %103 = arith.addf %102, %101 : vector<104x32xf32>
    %104 = arith.mulf %98, %103 : vector<104x32xf32>
    %c0_39 = arith.constant 0 : index
    %c0_40 = arith.constant 0 : index
    %105 = vector.load %arg10[%c0_39, %c0_40] : memref<32x128xf32, #tpu.memory_space<vmem>>, vector<32x128xf32>
    %cst_41 = arith.constant dense<0.000000e+00> : vector<104x128xf32>
    %106 = tpu.matmul %104, %105, %cst_41 {dimension_numbers = #tpu.dot_dimension_numbers<[1], [0], [0], [1], [0, 0, 1, 1], [], []>} : vector<104x32xf32>, vector<32x128xf32>, vector<104x128xf32> -> vector<104x128xf32>
    %107 = vector.broadcast %14 : vector<1x128xf32> to vector<104x128xf32>
    %108 = arith.addf %106, %107 : vector<104x128xf32>
    %c0_42 = arith.constant 0 : index
    %c0_43 = arith.constant 0 : index
    %109 = vector.load %arg11[%c0_42, %c0_43] : memref<104x128xf32, #tpu.memory_space<vmem>>, vector<104x128xf32>
    tpu.vector_store %arg11[%c0_42, %c0_43], %108 {strides = array<i32>} : memref<104x128xf32, #tpu.memory_space<vmem>>, vector<104x128xf32>,
    return
  }
  func.func @transform_0(%arg0: i32) -> (i32, i32) {
    %c0_i32 = arith.constant 0 : i32
    %c0_i32_0 = arith.constant 0 : i32
    return %arg0, %c0_i32 : i32, i32
  }
  func.func @transform_1(%arg0: i32) -> (i32, i32) {
    %c0_i32 = arith.constant 0 : i32
    %c0_i32_0 = arith.constant 0 : i32
    %c0_i32_1 = arith.constant 0 : i32
    return %c0_i32, %c0_i32_0 : i32, i32
  }
  func.func @transform_2(%arg0: i32) -> (i32, i32) {
    %c0_i32 = arith.constant 0 : i32
    %c0_i32_0 = arith.constant 0 : i32
    %c0_i32_1 = arith.constant 0 : i32
    return %c0_i32, %c0_i32_0 : i32, i32
  }
  func.func @transform_3(%arg0: i32) -> (i32, i32) {
    %c0_i32 = arith.constant 0 : i32
    %c0_i32_0 = arith.constant 0 : i32
    %c0_i32_1 = arith.constant 0 : i32
    return %c0_i32, %c0_i32_0 : i32, i32
  }
  func.func @transform_4(%arg0: i32) -> (i32, i32) {
    %c0_i32 = arith.constant 0 : i32
    %c0_i32_0 = arith.constant 0 : i32
    %c0_i32_1 = arith.constant 0 : i32
    return %c0_i32, %c0_i32_0 : i32, i32
  }
  func.func @transform_5(%arg0: i32) -> (i32, i32) {
    %c0_i32 = arith.constant 0 : i32
    %c0_i32_0 = arith.constant 0 : i32
    %c0_i32_1 = arith.constant 0 : i32
    return %c0_i32, %c0_i32_0 : i32, i32
  }
  func.func @transform_6(%arg0: i32) -> (i32, i32) {
    %c0_i32 = arith.constant 0 : i32
    %c0_i32_0 = arith.constant 0 : i32
    %c0_i32_1 = arith.constant 0 : i32
    return %c0_i32, %c0_i32_0 : i32, i32
  }
  func.func @transform_7(%arg0: i32) -> (i32, i32) {
    %c0_i32 = arith.constant 0 : i32
    %c0_i32_0 = arith.constant 0 : i32
    %c0_i32_1 = arith.constant 0 : i32
    return %c0_i32, %c0_i32_0 : i32, i32
  }
  func.func @transform_8(%arg0: i32) -> (i32, i32) {
    %c0_i32 = arith.constant 0 : i32
    %c0_i32_0 = arith.constant 0 : i32
    %c0_i32_1 = arith.constant 0 : i32
    return %c0_i32, %c0_i32_0 : i32, i32
  }
  func.func @transform_9(%arg0: i32) -> (i32, i32) {
    %c0_i32 = arith.constant 0 : i32
    %c0_i32_0 = arith.constant 0 : i32
    %c0_i32_1 = arith.constant 0 : i32
    return %c0_i32, %c0_i32_0 : i32, i32
  }
  func.func @transform_10(%arg0: i32) -> (i32, i32) {
    %c0_i32 = arith.constant 0 : i32
    %c0_i32_0 = arith.constant 0 : i32
    return %arg0, %c0_i32 : i32, i32
  }
}

</mosaic_0001>

<bundles_post_ra>
// kernel: tpu_custom_call.1
= control target key start
LH: loop header
LB: loop body
LE: loop exit
PB: predicated region body
PF: predicated region fallthrough
CT: control target
= control target key end

     0   :  { %15 = vsyncpa [#allocation3], 0  ;;  %s7639_s0 = inlined_call_operand.vmem [shape: f32[208,18], index: 0, kind: input, shape index: {}]   ;;  %s7640_s1 = inlined_call_operand.vmem [shape: f32[16,128], index: 1, kind: input, shape index: {}]   ;;  %s7641_s2 = inlined_call_operand.vmem [shape: f32[1,128], index: 2, kind: input, shape index: {}]   ;;  %s7642_s3 = inlined_call_operand.vmem [shape: f32[128,128], index: 3, kind: input, shape index: {}]   ;;  %s7643_s4 = inlined_call_operand.vmem [shape: f32[16,32], index: 4, kind: input, shape index: {}]   ;;  %s7644_s5 = inlined_call_operand.vmem [shape: f32[128,32], index: 5, kind: input, shape index: {}]   ;;  %s7645_s6 = inlined_call_operand.vmem [shape: f32[128,32], index: 6, kind: input, shape index: {}]   ;;  %s7646_s7 = inlined_call_operand.vmem [shape: f32[32,32], index: 7, kind: input, shape index: {}]   ;;  %s7647_s8 = inlined_call_operand.vmem [shape: f32[32,32], index: 8, kind: input, shape index: {}]   ;;  %s7648_s9 = inlined_call_operand.vmem [shape: f32[32,128], index: 9, kind: input, shape index: {}]   ;;  %s7649_s10 = inlined_call_operand.hbm [shape: f32[208,128], index: 10, kind: output, shape index: {}]  }
   0x1   :  { %17 = vsyncpa [#allocation3 + $0x1], 0  ;;  %s4833_s13 = smov 0   ;;  %s4835_s14 = smov 0  }
   0x2   :  { %s4837_s15 = smov 0   ;;  %s4839_s16 = smov 0  }
   0x3 LB: > { %s4854_s17 = sadd.s32 4294967295, %s4762_s16   ;;  %s3632_s18 = sadd.s32 4294967294, %s4762_s16   ;;  %s4762_s16 = sphi %s4839_s16, %s7937_s16   ;;  %s4758_s15 = sphi %s4837_s15, %s7936_s15   ;;  %s4754_s14 = sphi %s4835_s14, %s7935_s14   ;;  %s4750_s13 = sphi %s4833_s13, %s7934_s13  }
   0x4   : > { %s4858_s19 = sadd.s32 1, %s4762_s16   ;;  %s245_s20 = sadd.s32 1, %s4758_s15 }
   0x5   : > { %s242_s21 = ssub.s32 %s4762_s16, %s4858_s19  ;;  %p255_p0 = scmp.ne.s32.totalorder %s4758_s15, %s4754_s14 }
   0x6   : > { %p243_p1 = scmp.eq.s32.totalorder %s242_s21, 0  ;;  %p256_p2 = scmp.eq.s32.totalorder %s4854_s17, 1 }
   0x7   : > { %p261_p3 = scmp.ne.s32.totalorder %s4754_s14, %s4750_s13  ;;  %p262_p4 = scmp.eq.s32.totalorder %s3632_s18, 1 }
   0x8   : > { %s4869_s22 = scalar_select %p243_p1, %s4758_s15, %s245_s20  }
   0x9   : > { %p4871_p5 = por %p256_p2, %p255_p0  ;;  %p4875_p6 = por %p262_p4, %p261_p3 }
   0xa   : > { %p3635_p7 = scmp.ge.s32.totalorder %s4762_s16, 1  ;;  %p316_p8 = scmp.lt.s32.totalorder %s4762_s16, 3 }
   0xc   : > { %p317_p9 = pnand %p3635_p7, %p316_p8 }
   0xe   : > { %320 = sbr.rel (%p317_p9) target bundleno = 1843 (0x733), region = 60 }
  0x15   : > { %s354_s25 = smul.u32 13, %s4854_s17  ;;  %v1981_v0 = vld [vmem:[%s7642_s3] sm:$0xff]  ;;  %v1982_v1 = vld [vmem:[%s7642_s3 + $0x8] sm:$0xff]  ;;  %v4764_v2 = vmov 17   ;;  %v1983_v4 = vld [vmem:[%s7642_s3 + $0x10] sm:$0xff]  ;;  %v7652_v6 = vmov 0.0|0.0   ;;  %v441_v49 = vlaneseq }
  0x16   : > { %4499 = vset.pattern.permute.xlu1 %v4764_v2  ;;  %4498 = vset.pattern.permute.xlu0 %v4764_v2  ;;  %v4297_v3 = vpack.c.bf16 %v1982_v1, %v1981_v0  ;;  %v1984_v5 = vld [vmem:[%s7642_s3 + $0x18] sm:$0xff]  ;;  %v1985_v8 = vld [vmem:[%s7642_s3 + $0x20] sm:$0xff]  ;;  %v1986_v9 = vld [vmem:[%s7642_s3 + $0x28] sm:$0xff]  ;;  %vm4766_vm0 = vmmov 0   ;;  %v7655_v39 = vmov 0.0   ;;  %v4768_v40 = vmov 16  }
  0x17   : > { %p355_p10 = scmp.lt.s32.totalorder %s354_s25, 25  ;;  %4296 = vmatprep.subr.bf16.mxu0 %v7652_v6  ;;  %4320 = vmatprep.subr.bf16.mxu1 %v7652_v6  ;;  %v4300_v7 = vpack.c.bf16 %v1984_v5, %v1983_v4  ;;  %v4303_v10 = vpack.c.bf16 %v1986_v9, %v1985_v8  ;;  %v1987_v15 = vld [vmem:[%s7642_s3 + $0x30] sm:$0xff]  ;;  %v1988_v16 = vld [vmem:[%s7642_s3 + $0x38] sm:$0xff]  ;;  %v1989_v20 = vld [vmem:[%s7642_s3 + $0x40] sm:$0xff]  ;;  %v4991_v53 = vshrl.u32 %v441_v49, 7  ;;  %s351_s27 = sand.u32 1, %s4754_s14  }
  0x18   : > { %4298 = vmatpush3.bf16.msra.mxu0 %v4297_v3  ;;  %v4306_v18 = vpack.c.bf16 %v1988_v16, %v1987_v15  ;;  %v1990_v21 = vld [vmem:[%s7642_s3 + $0x48] sm:$0xff]  ;;  %v1991_v25 = vld [vmem:[%s7642_s3 + $0x50] sm:$0xff]  ;;  %v1992_v26 = vld [vmem:[%s7642_s3 + $0x58] sm:$0xff]  ;;  %3931 = vmatprep.mubr.msk.f32.mxu0 %vm4766_vm0, %v7655_v39  ;;  %s3745_s30 = smul.u32 1664, %s4854_s17  ;;  %s7598_s20 = scalar_lea.sflag [#allocation3], %s351_s27 }
  0x19   : > { %s7939_s25 = smov (!%p355_p10, %s354_s25), 25  ;;  %4299 = vmatprep.subr.bf16.mxu0 %v7652_v6  ;;  %v4309_v22 = vpack.c.bf16 %v1990_v21, %v1989_v20  ;;  %v4312_v27 = vpack.c.bf16 %v1992_v26, %v1991_v25  ;;  %v1993_v30 = vld [vmem:[%s7642_s3 + $0x60] sm:$0xff]  ;;  %v1994_v31 = vld [vmem:[%s7642_s3 + $0x68] sm:$0xff]  ;;  %v1995_v35 = vld [vmem:[%s7642_s3 + $0x70] sm:$0xff]  ;;  %4002 = vmatprep.mubr.msk.f32.mxu1 %vm4766_vm0, %v7655_v39  ;;  %7761 = vst [vmem:[#allocation5_spill] sm:$0xff] %v4991_v53  ;;  %v1901_v57 = vsub.s32 2, %v4991_v53 }
  0x1a   : > { %s3636_s28 = sshll.u32 %s7939_s25, 3  ;;  %v4315_v32 = vpack.c.bf16 %v1994_v31, %v1993_v30  ;;  %v1996_v36 = vld [vmem:[%s7642_s3 + $0x78] sm:$0xff]  ;;  %v2133_v41 = vld [vmem:[%s7644_s5] sm:$0xff]  ;;  %v2134_v42 = vld [vmem:[%s7644_s5 + $0x8] sm:$0xff]  ;;  %s7593_s18 = scalar_lea.hbm %s7649_s10, %s3745_s30 }
  0x1b   : > { %s4908_s11 = scalar_lea.vmem %s7639_s0, %s3636_s28  ;;  %v4318_v37 = vpack.c.bf16 %v1996_v36, %v1995_v35  ;;  %v2135_v43 = vld [vmem:[%s7644_s5 + $0x10] sm:$0xff]  ;;  %v4321_v44 = vpack.c.bf16 %v2134_v42, %v2133_v41  ;;  %v2136_v45 = vld [vmem:[%s7644_s5 + $0x18] sm:$0xff]  ;;  %v2137_v47 = vld [vmem:[%s7644_s5 + $0x20] sm:$0xff]  ;;  %v7651_v41 = vsub.s32 0, %v4991_v53  ;;  %v7650_v42 = vsub.s32 1, %v4991_v53  ;;  %s4393_s28 = smul.u32 104, %s351_s27 }
  0x1c   : > { %4301 = vmatpush3.bf16.msra.mxu0 %v4300_v7  ;;  %v363_v11 = vld [vmem:[%s4908_s11 + $0x10] sm:$0xff]  ;;  %v361_v12 = vld [vmem:[%s4908_s11] sm:$0xff]  ;;  %v364_v13 = vld [vmem:[%s4908_s11 + $0x18] sm:$0xff]  ;;  %v4324_v46 = vpack.c.bf16 %v2136_v45, %v2135_v43  ;;  %s4775_s21 = smov [#allocation2]  }
  0x1d   : > { %4302 = vmatprep.subr.bf16.mxu0 %v7652_v6  ;;  %1837 = vperm.xlu1 %4499, %v363_v11   ;;  %v362_v14 = vld [vmem:[%s4908_s11 + $0x8] sm:$0xff]  ;;  %v365_v19 = vld [vmem:[%s4908_s11 + $0x20] sm:$0xff]  ;;  %v368_v23 = vld [vmem:[%s4908_s11 + $0x38] sm:$0xff]  ;;  %s7572_s29 = scalar_lea.vmem [#allocation2], %s4393_s28  ;;  %s4704_s26 = sshll.u32 %s4775_s21, 4  ;;  %s4705_s26 = int_to_ptr.vmem [resolvable:$false] %s4704_s26 }
  0x1e   : > { %1829 = vperm.xlu0 %4498, %v361_v12   ;;  %v366_v17 = vld [vmem:[%s4908_s11 + $0x28] sm:$0xff]  ;;  %v367_v24 = vld [vmem:[%s4908_s11 + $0x30] sm:$0xff]  ;;  %v369_v29 = vld [vmem:[%s4908_s11 + $0x40] sm:$0xff]  ;;  %4322 = vmatpush3.bf16.msra.mxu1 %v4321_v44  ;;  %s4706_s28 = scalar_lea.vmem %s4705_s26, 3328 }
  0x1f   : > { %v370_v28 = vld [vmem:[%s4908_s11 + $0x48] sm:$0xff]  ;;  %v372_v33 = vld [vmem:[%s4908_s11 + $0x58] sm:$0xff]  ;;  %v371_v34 = vld [vmem:[%s4908_s11 + $0x50] sm:$0xff]  ;;  %4323 = vmatprep.subr.bf16.mxu1 %v7652_v6 }
  0x20   : > { %4304 = vmatpush3.bf16.msra.mxu0 %v4303_v10  ;;  %v373_v38 = vld [vmem:[%s4908_s11 + $0x60] sm:$0xff]  ;;  %v2138_v48 = vld [vmem:[%s7644_s5 + $0x28] sm:$0xff]  ;;  %v2139_v51 = vld [vmem:[%s7644_s5 + $0x30] sm:$0xff] }
  0x21   : > { %4305 = vmatprep.subr.bf16.mxu0 %v7652_v6  ;;  %1841 = vperm.xlu1 %4499, %v364_v13   ;;  %v4327_v50 = vpack.c.bf16 %v2138_v48, %v2137_v47  ;;  %v2140_v52 = vld [vmem:[%s7644_s5 + $0x38] sm:$0xff]  ;;  %v2141_v55 = vld [vmem:[%s7644_s5 + $0x40] sm:$0xff]  ;;  %v2142_v56 = vld [vmem:[%s7644_s5 + $0x48] sm:$0xff] }
  0x22   : > { %1833 = vperm.xlu0 %4498, %v362_v14   ;;  %4325 = vmatpush3.bf16.msra.mxu1 %v4324_v46  ;;  %v4330_v54 = vpack.c.bf16 %v2140_v52, %v2139_v51  ;;  %v5004_v58 = vld [vmem:[%s7640_s1] sm:$0xff]  ;;  %v4333_v59 = vpack.c.bf16 %v2142_v56, %v2141_v55  ;;  %v2143_v60 = vld [vmem:[%s7644_s5 + $0x50] sm:$0xff]  ;;  %v2144_v61 = vld [vmem:[%s7644_s5 + $0x58] sm:$0xff] }
  0x23   : > { %4326 = vmatprep.subr.bf16.mxu1 %v7652_v6  ;;  %v5016_v62 = vld [vmem:[%s7641_s2] ss:$0 sm:$0xff]  ;;  %v5019_v63 = vrot.slane %v5004_v58, %v1901_v57  ;;  %v2146_v7 = vld [vmem:[%s7644_s5 + $0x68] sm:$0xff]  ;;  %v2148_v15 = vld [vmem:[%s7644_s5 + $0x78] sm:$0xff]  ;;  %v5079_v57 = vrot.slane %v5004_v58, %v7651_v41 }
  0x24   : > { %4307 = vmatpush3.bf16.msra.mxu0 %v4306_v18  ;;  %v2145_v5 = vld [vmem:[%s7644_s5 + $0x60] sm:$0xff] }
  0x25   : > { %4308 = vmatprep.subr.bf16.mxu0 %v7652_v6  ;;  %1849 = vperm.xlu1 %4499, %v366_v17  }
  0x26   : > { %1845 = vperm.xlu0 %4498, %v365_v19   ;;  %4328 = vmatpush3.bf16.msra.mxu1 %v4327_v50 }
  0x27   : > { %4329 = vmatprep.subr.bf16.mxu1 %v7652_v6 }
  0x28   : > { %4310 = vmatpush3.bf16.msra.mxu0 %v4309_v22 }
  0x29   : > { %4311 = vmatprep.subr.bf16.mxu0 %v7652_v6  ;;  %1857 = vperm.xlu1 %4499, %v368_v23  }
  0x2a   : > { %1853 = vperm.xlu0 %4498, %v367_v24   ;;  %4331 = vmatpush3.bf16.msra.mxu1 %v4330_v54 }
  0x2b   : > { %4332 = vmatprep.subr.bf16.mxu1 %v7652_v6 }
  0x2c   : > { %4313 = vmatpush3.bf16.msra.mxu0 %v4312_v27 }
  0x2d   : > { %4314 = vmatprep.subr.bf16.mxu0 %v7652_v6  ;;  %1865 = vperm.xlu1 %4499, %v370_v28  }
  0x2e   : > { %1861 = vperm.xlu0 %4498, %v369_v29   ;;  %4334 = vmatpush3.bf16.msra.mxu1 %v4333_v59  ;;  %v5084_v59 = vrot.slane %v5004_v58, %v7650_v42 }
  0x2f   : > { %4335 = vmatprep.subr.bf16.mxu1 %v7652_v6 }
  0x30   : > { %4316 = vmatpush3.bf16.msra.mxu0 %v4315_v32 }
  0x31   : > { %4317 = vmatprep.subr.bf16.mxu0 %v7652_v6  ;;  %1873 = vperm.xlu1 %4499, %v372_v33  }
  0x32   : > { %1869 = vperm.xlu0 %4498, %v371_v34  }
  0x34   : > { %4319 = vmatpush3.bf16.msra.mxu0 %v4318_v37  ;;  %v2131_v37 = vld [vmem:[%s7643_s4] sm:$0xff] }
  0x35   : > { %4344 = vmatprep.subr.bf16.mxu0 %v7652_v6  ;;  %4500 = vset.pattern.permute.xlu1 %v4768_v40 }
  0x36   : > { %1877 = vperm.xlu0 %4498, %v373_v38   ;;  %378 = vperm.xlu1 %4500, %v361_v12   ;;  %v4339_v12 = vpack.c.bf16 %v2146_v7, %v2145_v5 }
  0x3a   : > { %4501 = vset.pattern.permute.xlu0 %v4768_v40  ;;  %388 = vperm.xlu1 %4500, %v363_v11  }
  0x3b   : > { %383 = vperm.xlu0 %4501, %v362_v14   ;;  %v2147_v14 = vld [vmem:[%s7644_s5 + $0x70] sm:$0xff] }
  0x3c   : > { %v4342_v22 = vpack.c.bf16 %v2148_v15, %v2147_v14 }
  0x3e   : > { %393 = vperm.xlu1 %4500, %v364_v13  }
  0x3f   : > { %398 = vperm.xlu0 %4501, %v365_v19  }
  0x42   : > { %403 = vperm.xlu1 %4500, %v366_v17  }
  0x43   : > { %408 = vperm.xlu0 %4501, %v367_v24  }
  0x46   : > { %413 = vperm.xlu1 %4500, %v368_v23  }
  0x47   : > { %418 = vperm.xlu0 %4501, %v369_v29  }
  0x4a   : > { %423 = vperm.xlu1 %4500, %v370_v28  }
  0x4b   : > { %428 = vperm.xlu0 %4501, %v371_v34  }
  0x4e   : > { %433 = vperm.xlu1 %4500, %v372_v33  }
  0x4f   : > { %438 = vperm.xlu0 %4501, %v373_v38   ;;  %v2132_v38 = vld [vmem:[%s7643_s4 + $0x8] sm:$0xff] }
  0x50   : > { %v4345_v48 = vpack.c.bf16 %v2132_v38, %v2131_v37 }
  0x53   : > { %4502 = vset.pattern.permute.xlu0 %v4764_v2  ;;  %v4336_v2 = vpack.c.bf16 %v2144_v61, %v2143_v60 }
  0x55   : > { %4337 = vmatpush3.bf16.msra.mxu1 %v4336_v2 }
  0x56   : > { %4338 = vmatprep.subr.bf16.mxu1 %v7652_v6 }
  0x59   : > { %4340 = vmatpush3.bf16.msra.mxu1 %v4339_v12 }
  0x5a   : > { %4341 = vmatprep.subr.bf16.mxu1 %v7652_v6 }
  0x5d   : > { %4343 = vmatpush3.bf16.msra.mxu1 %v4342_v22 }
  0x5e   : > { %4347 = vmatprep.subr.bf16.mxu1 %v7652_v6 }
  0x9c   : > { %v1838_v0 = vpop.permute.xlu1 %1837 }
  0x9d   : > { %v1830_v1 = vpop.permute.xlu0 %1829  ;;  %v1888_v3 = vmul.f32 %v5016_v62, %v1838_v0 }
  0x9e   : > { %v1886_v4 = vmul.f32 %v5016_v62, %v1830_v1 }
  0x9f   : > { %v5032_v9 = vadd.f32 %v5019_v63, %v1888_v3 }
  0xa0   : > { %v1903_v8 = vadd.f32 %v5019_v63, %v1886_v4  ;;  %v1842_v10 = vpop.permute.xlu1 %1841 }
  0xa1   : > { %v1834_v11 = vpop.permute.xlu0 %1833  ;;  %v1889_v16 = vmul.f32 %v5016_v62, %v1842_v10  ;;  %v1931_v18 = vmul.f32 0.70710677, %v5032_v9  ;;  %v1918_v14 = vmul.f32 0.5, %v5032_v9 }
  0xa2   : > { %v1929_v13 = vmul.f32 0.70710677, %v1903_v8  ;;  %v1887_v17 = vmul.f32 %v5016_v62, %v1834_v11  ;;  %v1916_v43 = vmul.f32 0.5, %v1903_v8 }
  0xa3   : > { %v5048_v24 = vadd.f32 %v5019_v63, %v1889_v16 }
  0xa4   : > { %4503 = verf.f32 %v1929_v13  ;;  %v1904_v19 = vadd.f32 %v5019_v63, %v1887_v17  ;;  %v1850_v20 = vpop.permute.xlu1 %1849 }
  0xa5   : > { %v1846_v21 = vpop.permute.xlu0 %1845  ;;  %4505 = verf.f32 %v1931_v18  ;;  %v1891_v28 = vmul.f32 %v5016_v62, %v1850_v20  ;;  %v1932_v30 = vmul.f32 0.70710677, %v5048_v24 }
  0xa6   : > { %v1890_v23 = vmul.f32 %v5016_v62, %v1846_v21  ;;  %v1930_v25 = vmul.f32 0.70710677, %v1904_v19  ;;  %v1917_v56 = vmul.f32 0.5, %v1904_v19 }
  0xa7   : > { %v5057_v33 = vadd.f32 %v5019_v63, %v1891_v28 }
  0xa8   : > { %v1858_v26 = vpop.permute.xlu1 %1857  ;;  %4507 = verf.f32 %v1930_v25  ;;  %v5052_v29 = vadd.f32 %v5019_v63, %v1890_v23 }
  0xa9   : > { %v1854_v27 = vpop.permute.xlu0 %1853  ;;  %4509 = verf.f32 %v1932_v30  ;;  %v1934_v46 = vmul.f32 0.70710677, %v5057_v33  ;;  %v1893_v47 = vmul.f32 %v5016_v62, %v1858_v26  ;;  %v1919_v26 = vmul.f32 0.5, %v5048_v24 }
  0xaa   : > { %v1933_v34 = vmul.f32 0.70710677, %v5052_v29  ;;  %v1892_v36 = vmul.f32 %v5016_v62, %v1854_v27  ;;  %v1920_v38 = vmul.f32 0.5, %v5052_v29 }
  0xab   : > { %v5094_v3 = vadd.f32 %v5019_v63, %v1893_v47 }
  0xac   : > { %v1866_v31 = vpop.permute.xlu1 %1865  ;;  %4511 = verf.f32 %v1933_v34  ;;  %v5072_v50 = vadd.f32 %v5019_v63, %v1892_v36 }
  0xad   : > { %v1862_v32 = vpop.permute.xlu0 %1861  ;;  %v1895_v60 = vmul.f32 %v5016_v62, %v1866_v31  ;;  %4513 = verf.f32 %v1934_v46  ;;  %v1936_v15 = vmul.f32 0.70710677, %v5094_v3 }
  0xae   : > { %v4504_v35 = vpop.eup %4503  ;;  %v1894_v4 = vmul.f32 %v5016_v62, %v1862_v32  ;;  %v1935_v7 = vmul.f32 0.70710677, %v5072_v50 }
  0xaf   : > { %v1955_v40 = vadd.f32 1.0, %v4504_v35  ;;  %v4506_v49 = vpop.eup %4505 }
  0xb0   : > { %v1874_v44 = vpop.permute.xlu1 %1873  ;;  %v1957_v8 = vadd.f32 1.0, %v4506_v49  ;;  %v5112_v16 = vadd.f32 %v5019_v63, %v1894_v4  ;;  %4515 = verf.f32 %v1935_v7 }
  0xb1   : > { %v1870_v45 = vpop.permute.xlu0 %1869  ;;  %v1897_v51 = vmul.f32 %v5016_v62, %v1874_v44  ;;  %v1968_v54 = vmul.f32 %v1955_v40, %v1916_v43  ;;  %4517 = verf.f32 %v1936_v15 }
  0xb2   : > { %v1896_v52 = vmul.f32 %v5016_v62, %v1870_v45  ;;  %v4508_v55 = vpop.eup %4507  ;;  %v1970_v20 = vmul.f32 %v1957_v8, %v1918_v14  ;;  %v1937_v27 = vmul.f32 0.70710677, %v5112_v16  ;;  %v1922_v14 = vmul.f32 0.5, %v5072_v50 }
  0xb3   : > { %v5088_v61 = vadd.f32 %v5019_v63, %v1897_v51  ;;  %3932 = vmatmul.mubr.f32.vlgmr.msra.gmra.mrb[0].mxu0 %v1968_v54  ;;  %v1956_v2 = vadd.f32 1.0, %v4508_v55  ;;  %v4510_v13 = vpop.eup %4509 }
  0xb4   : > { %v5091_v0 = vadd.f32 %v5019_v63, %v1896_v52  ;;  %3934 = vmatprep.mubr.msk.f32.mxu0 %vm4766_vm0, %v7655_v39  ;;  %4346 = vmatpush3.bf16.msra.mxu0 %v4345_v48 }
  0xb5   : > { %v1878_v1 = vpop.permute.xlu0 %1877  ;;  %v379_v5 = vpop.permute.xlu1 %378  ;;  %4371 = vmatprep.subr.bf16.mxu0 %v7652_v6  ;;  %v1969_v12 = vmul.f32 %v1956_v2, %v1917_v56  ;;  %v1940_v43 = vmul.f32 0.70710677, %v5088_v61 }
  0xb6   : > { %v1898_v58 = vmul.f32 %v5016_v62, %v1878_v1  ;;  %v445_v11 = vmul.f32 %v5079_v57, %v379_v5  ;;  %v5108_v62 = vadd.f32 %v5019_v63, %v1895_v60  ;;  %v4512_v9 = vpop.eup %4511  ;;  %v1921_v60 = vmul.f32 0.5, %v5057_v33 }
  0xb7   : > { %3935 = vmatmul.mubr.f32.gmra.mrb[2].mxu0 %v1969_v12  ;;  %v1959_v34 = vadd.f32 1.0, %v4512_v9  ;;  %v4514_v35 = vpop.eup %4513 }
  0xb8   : > { %v5103_v10 = vadd.f32 %v5019_v63, %v1898_v58  ;;  %v5115_v17 = vadd.f32 %v5084_v59, %v445_v11  ;;  %3937 = vmatprep.mubr.msk.f32.mxu0 %vm4766_vm0, %v7655_v39  ;;  %v1958_v63 = vadd.f32 1.0, %v4510_v13  ;;  %v1938_v25 = vmul.f32 0.70710677, %v5108_v62 }
  0xb9   : > { %v389_v18 = vpop.permute.xlu1 %388  ;;  %v1972_v48 = vmul.f32 %v1959_v34, %v1920_v38  ;;  %v1960_v49 = vadd.f32 1.0, %v4514_v35  ;;  %v1925_v50 = vmul.f32 0.5, %v5108_v62  ;;  %v5179_v38 = vmul.f32 0.5, %v5091_v0 }
  0xba   : > { %7762 = vst [vmem:[#allocation6_spill] sm:$0xff] %v5115_v17  ;;  %v384_v19 = vpop.permute.xlu0 %383  ;;  %v478_v21 = vand.u32 2139095040, %v5115_v17  ;;  %v447_v22 = vmul.f32 %v5079_v57, %v389_v18  ;;  %v1971_v24 = vmul.f32 %v1958_v63, %v1919_v26  ;;  %4519 = verf.f32 %v1938_v25  ;;  %v4516_v55 = vpop.eup %4515 }
  0xbb   : > { %v446_v23 = vmul.f32 %v5079_v57, %v384_v19  ;;  %3938 = vmatmul.mubr.f32.gmra.mrb[4].mxu0 %v1970_v20  ;;  %4521 = verf.f32 %v1937_v27  ;;  %v4518_v5 = vpop.eup %4517  ;;  %v1973_v11 = vmul.f32 %v1960_v49, %v1921_v60  ;;  %v1961_v12 = vadd.f32 1.0, %v4516_v55 }
  0xbc   : > { %v479_v31 = vshrl.u32 %v478_v21, 23  ;;  %3940 = vmatprep.mubr.msk.f32.mxu0 %vm4766_vm0, %v7655_v39  ;;  %v5129_v36 = vadd.f32 %v5084_v59, %v447_v22  ;;  %4523 = verf.f32 %v1940_v43  ;;  %v1962_v18 = vadd.f32 1.0, %v4518_v5 }
  0xbd   : > { %v394_v28 = vpop.permute.xlu1 %393  ;;  %v5132_v37 = vadd.f32 %v5084_v59, %v446_v23  ;;  %v7654_v19 = vand.u32 2147483647, %v5115_v17  ;;  %v1974_v23 = vmul.f32 %v1961_v12, %v1922_v14  ;;  %v1923_v63 = vmul.f32 0.5, %v5094_v3 }
  0xbe   : > { %v399_v30 = vpop.permute.xlu0 %398  ;;  %7763 = vst [vmem:[#allocation7_spill] sm:$0xff] %v5129_v36  ;;  %v3637_v46 = vadd.s32 4294967169, %v479_v31  ;;  %v686_v29 = vand.u32 2139095040, %v5129_v36  ;;  %v448_v56 = vmul.f32 %v5079_v57, %v394_v28  ;;  %v1924_v26 = vmul.f32 0.5, %v5112_v16 }
  0xbf   : > { %v449_v32 = vmul.f32 %v5079_v57, %v399_v30  ;;  %3941 = vmatmul.mubr.f32.gmra.mrb[6].mxu0 %v1971_v24  ;;  %v582_v51 = vand.u32 2139095040, %v5132_v37  ;;  %v1939_v27 = vmul.f32 0.70710677, %v5091_v0  ;;  %v1941_v30 = vmul.f32 0.70710677, %v5103_v10 }
  0xc0   : > { %3943 = vmatprep.mubr.msk.f32.mxu0 %vm4766_vm0, %v7655_v39  ;;  %v485_v4 = vadd.s32 1, %v3637_v46  ;;  %v687_v7 = vshrl.u32 %v686_v29, 23  ;;  %v5157_v33 = vadd.f32 %v5084_v59, %v448_v56  ;;  %v5173_v3 = vand.u32 8388607, %v7654_v19 }
  0xc1   : > { %v5136_v40 = vadd.f32 %v5084_v59, %v449_v32  ;;  %v404_v44 = vpop.permute.xlu1 %403  ;;  %v583_v8 = vshrl.u32 %v582_v51, 23  ;;  %v1975_v62 = vmul.f32 %v1962_v18, %v1923_v63  ;;  %v5176_v24 = vmul.f32 0.5, %v5088_v61 }
  0xc2   : > { %v409_v45 = vpop.permute.xlu0 %408  ;;  %v450_v52 = vmul.f32 %v5079_v57, %v404_v44  ;;  %7767 = vst [vmem:[#allocation11_spill] sm:$0xff] %v5157_v33  ;;  %vm486_vm1 = vcmp.gt.s32.totalorder %v485_v4, 0  ;;  %v3645_v9 = vadd.s32 4294967169, %v687_v7  ;;  %v790_v25 = vand.u32 2139095040, %v5157_v33 }
  0xc3   : > { %7764 = vst [vmem:[#allocation8_spill] sm:$0xff] %v5136_v40  ;;  %v894_v47 = vand.u32 2139095040, %v5136_v40  ;;  %v451_v54 = vmul.f32 %v5079_v57, %v409_v45  ;;  %3944 = vmatmul.mubr.f32.gmra.mrb[8].mxu0 %v1972_v48  ;;  %v3641_v21 = vadd.s32 4294967169, %v583_v8  ;;  %v487_v28 = vsel %vm486_vm1, %v485_v4, 0 }
  0xc4   : > { %v5149_v2 = vadd.f32 %v5084_v59, %v450_v52  ;;  %3946 = vmatprep.mubr.msk.f32.mxu0 %vm4766_vm0, %v7655_v39  ;;  %v4520_v15 = vpop.eup %4519  ;;  %v693_v34 = vadd.s32 1, %v3645_v9  ;;  %v5181_v43 = vand.u32 31, %v487_v28  ;;  %v791_v44 = vshrl.u32 %v790_v25, 23 }
  0xc5   : > { %v895_v1 = vshrl.u32 %v894_v47, 23  ;;  %v5152_v58 = vadd.f32 %v5084_v59, %v451_v54  ;;  %v4522_v20 = vpop.eup %4521  ;;  %v1964_v32 = vadd.f32 1.0, %v4520_v15  ;;  %v589_v35 = vadd.s32 1, %v3641_v21  ;;  %v414_v48 = vpop.permute.xlu1 %413 }
  0xc6   : > { %7765 = vst [vmem:[#allocation9_spill] sm:$0xff] %v5149_v2  ;;  %v1963_v31 = vadd.f32 1.0, %v4522_v20  ;;  %v4524_v16 = vpop.eup %4523  ;;  %4525 = verf.f32 %v1939_v27  ;;  %v5184_v45 = vmul.f32 0.5, %v5103_v10  ;;  %v998_v47 = vand.u32 2139095040, %v5149_v2  ;;  %v419_v49 = vpop.permute.xlu0 %418 }
  0xc7   : > { %7766 = vst [vmem:[#allocation10_spill] sm:$0xff] %v5152_v58  ;;  %v3653_v13 = vadd.s32 4294967169, %v895_v1  ;;  %3947 = vmatmul.mubr.f32.gmra.mrb[10].mxu0 %v1973_v11  ;;  %4527 = verf.f32 %v1941_v30  ;;  %v1977_v0 = vmul.f32 %v1964_v32, %v1925_v50  ;;  %vm694_vm3 = vcmp.gt.s32.totalorder %v693_v34, 0 }
  0xc8   : > { %3949 = vmatprep.mubr.msk.f32.mxu0 %vm4766_vm0, %v7655_v39  ;;  %v1976_v61 = vmul.f32 %v1963_v31, %v1924_v26  ;;  %vm590_vm4 = vcmp.gt.s32.totalorder %v589_v35, 0  ;;  %v5195_v51 = vadd.f32 1.0, %v4524_v16  ;;  %v5198_v52 = vsub.s32 32, %v5181_v43 }
  0xc9   : > { %v901_v22 = vadd.s32 1, %v3653_v13  ;;  %v3649_v54 = vadd.s32 4294967169, %v791_v44  ;;  %v999_v55 = vshrl.u32 %v998_v47, 23  ;;  %v1102_v56 = vand.u32 2139095040, %v5152_v58 }
  0xca   : > { %v5201_v60 = vshrl.u32 %v487_v28, 5  ;;  %v7661_v1 = vmov 2102212464   ;;  %v7657_v7 = vmov 920167782   ;;  %v695_v12 = vsel %vm694_vm3, %v693_v34, 0 }
  0xcb   : > { %3950 = vmatmul.mubr.f32.gmra.mrb[12].mxu0 %v1974_v23  ;;  %vm902_vm2 = vcmp.gt.s32.totalorder %v901_v22, 0  ;;  %v501_v4 = vshll.u32 %v7661_v1, %v5181_v43  ;;  %v5214_v11 = vshll.u32 %v7657_v7, %v5181_v43  ;;  %v3657_v13 = vadd.s32 4294967169, %v999_v55  ;;  %v429_v23 = vpop.permute.xlu0 %428 }
  0xcc   : > { %3952 = vmatprep.mubr.msk.f32.mxu0 %vm4766_vm0, %v7655_v39  ;;  %v5186_v46 = vsel %vm902_vm2, %v901_v22, 0  ;;  %v1103_v14 = vshrl.u32 %v1102_v56, 23  ;;  %v591_v15 = vsel %vm590_vm4, %v589_v35, 0  ;;  %v7659_v18 = vmov 1326507024   ;;  %v424_v22 = vpop.permute.xlu1 %423 }
  0xcd   : > { %v5193_v10 = vand.u32 31, %v5186_v46  ;;  %v452_v9 = vmul.f32 %v5079_v57, %v414_v48  ;;  %v453_v21 = vmul.f32 %v5079_v57, %v419_v49  ;;  %v502_v63 = vshrl.u32 %v7657_v7, %v5198_v52 }
  0xce   : > { %v797_v25 = vadd.s32 1, %v3649_v54  ;;  %v1005_v50 = vadd.s32 1, %v3657_v13  ;;  %v3661_v26 = vadd.s32 4294967169, %v1103_v14  ;;  %v505_v27 = vshrl.u32 %v7659_v18, %v5198_v52 }
  0xcf   : > { %3953 = vmatmul.mubr.f32.gmra.mrb[14].mxu0 %v1975_v62  ;;  %7768 = vst [vmem:[#allocation12_spill] sm:$0xff] %v5193_v10  ;;  %v5206_v5 = vsub.s32 32, %v5193_v10  ;;  %v5210_v8 = vshll.u32 %v7657_v7, %v5193_v10  ;;  %v5233_v30 = vadd.f32 %v5084_v59, %v452_v9  ;;  %v5236_v31 = vadd.f32 %v5084_v59, %v453_v21 }
  0xd0   : > { %3955 = vmatprep.mubr.msk.f32.mxu0 %vm4766_vm0, %v7655_v39  ;;  %vm510_vm5 = vcmp.lt.s32.totalorder %v5201_v60, 4  ;;  %vm1006_vm6 = vcmp.gt.s32.totalorder %v1005_v50, 0  ;;  %v1109_v32 = vadd.s32 1, %v3661_v26  ;;  %v454_v34 = vmul.f32 %v5079_v57, %v424_v22  ;;  %v5243_v62 = vpop.eup %4525 }
  0xd1   : > { %7769 = vst [vmem:[#allocation13_spill] sm:$0xff] %v5206_v5  ;;  %v5222_v20 = vshrl.u32 %v7659_v18, %v5206_v5  ;;  %7770 = vst [vmem:[#allocation14_spill] sm:$0xff] %v5233_v30  ;;  %v455_v35 = vmul.f32 %v5079_v57, %v429_v23  ;;  %v5245_v16 = vshrl.u32 %v695_v12, 5  ;;  %v5247_v44 = vand.u32 31, %v695_v12  ;;  %v5252_v49 = vpop.eup %4527 }
  0xd2   : > { %7771 = vst [vmem:[#allocation15_spill] sm:$0xff] %v5236_v31  ;;  %v5249_v47 = vsel %vm1006_vm6, %v1005_v50, 0  ;;  %v1206_v48 = vand.u32 2139095040, %v5233_v30  ;;  %vm1110_vm7 = vcmp.gt.s32.totalorder %v1109_v32, 0  ;;  %v1310_v54 = vand.u32 2139095040, %v5236_v31 }
  0xd3   : > { %3956 = vmatmul.mubr.f32.gmra.mrb[16].mxu0 %v1976_v61  ;;  %7772 = vst [vmem:[#allocation16_spill] sm:$0xff] %v5247_v44  ;;  %v5254_v61 = vshrl.u32 %v591_v15, 5  ;;  %v5260_v55 = vsel %vm1110_vm7, %v1109_v32, 0  ;;  %v5263_v12 = vadd.f32 %v5084_v59, %v454_v34  ;;  %v5266_v13 = vadd.f32 %v5084_v59, %v455_v35 }
  0xd4   : > { %3958 = vmatprep.mubr.msk.f32.mxu0 %vm4766_vm0, %v7655_v39  ;;  %v1207_v56 = vshrl.u32 %v1206_v48, 23  ;;  %v5268_v14 = vand.u32 31, %v591_v15  ;;  %vm798_vm8 = vcmp.gt.s32.totalorder %v797_v25, 0  ;;  %v5277_v22 = vor.u32 %v502_v63, %v501_v4 }
  0xd5   : > { %7774 = vst [vmem:[#allocation18_spill] sm:$0xff] %v5263_v12  ;;  %7775 = vst [vmem:[#allocation19_spill] sm:$0xff] %v5266_v13  ;;  %v5280_v23 = vand.u32 31, %v5260_v55  ;;  %v1311_v26 = vshrl.u32 %v1310_v54, 23  ;;  %v506_v32 = vor.u32 %v505_v27, %v5214_v11  ;;  %v1414_v34 = vand.u32 2139095040, %v5263_v12 }
  0xd6   : > { %v3665_v50 = vadd.s32 4294967169, %v1207_v56  ;;  %v1518_v35 = vand.u32 2139095040, %v5266_v13  ;;  %v5290_v48 = vsub.s32 32, %v5247_v44  ;;  %v709_v4 = vshll.u32 %v7661_v1, %v5247_v44 }
  0xd7   : > { %3959 = vmatmul.mubr.f32.gmra.mrb[18].mxu0 %v1977_v0  ;;  %v5257_v0 = vand.u32 31, %v5249_v47  ;;  %v5295_v63 = vsub.s32 32, %v5280_v23  ;;  %v5299_v11 = vshll.u32 %v7657_v7, %v5280_v23  ;;  %v5303_v27 = vshll.u32 %v7657_v7, %v5247_v44 }
  0xd8   : > { %3961 = vmatprep.mubr.msk.f32.mxu0 %vm4766_vm0, %v7655_v39  ;;  %7777 = vst [vmem:[#allocation21_spill] sm:$0xff] %v5290_v48  ;;  %v1213_v56 = vadd.s32 1, %v3665_v50  ;;  %v3669_v42 = vadd.s32 4294967169, %v1311_v26  ;;  %v5308_v41 = vsub.s32 32, %v5268_v14  ;;  %v1415_v19 = vshrl.u32 %v1414_v34, 23 }
  0xd9   : > { %7773 = vst [vmem:[#allocation17_spill] sm:$0xff] %v5257_v0  ;;  %v5271_v9 = vsub.s32 32, %v5257_v0  ;;  %v5275_v21 = vshll.u32 %v7657_v7, %v5257_v0  ;;  %7778 = vst [vmem:[#allocation22_spill] sm:$0xff] %v5299_v11  ;;  %v5312_v6 = vshrl.u32 %v7659_v18, %v5295_v63  ;;  %v1519_v29 = vshrl.u32 %v1518_v35, 23 }
  0xda   : > { %v605_v28 = vshll.u32 %v7661_v1, %v5268_v14  ;;  %v799_v39 = vsel %vm798_vm8, %v797_v25, 0  ;;  %vm1214_vm9 = vcmp.gt.s32.totalorder %v1213_v56, 0  ;;  %v1317_v7 = vadd.s32 1, %v3669_v42 }
  0xdb   : > { %7776 = vst [vmem:[#allocation20_spill] sm:$0xff] %v5271_v9  ;;  %v5285_v15 = vshrl.u32 %v7659_v18, %v5271_v9  ;;  %7779 = vst [vmem:[#allocation23_spill] sm:$0xff] %v5312_v6  ;;  %v5320_v50 = vsel %vm510_vm5, %v5277_v22, 920167782  ;;  %v5324_v54 = vsel %vm1214_vm9, %v1213_v56, 0  ;;  %v3673_v18 = vadd.s32 4294967169, %v1415_v19  ;;  %v434_v19 = vpop.permute.xlu1 %433 }
  0xdc   : > { %v5328_v34 = vsel %vm510_vm5, %v506_v32, 1326507024  ;;  %vm718_vm10 = vcmp.lt.s32.totalorder %v5245_v16, 4  ;;  %v5332_v25 = vand.u32 31, %v5324_v54  ;;  %vm1318_vm11 = vcmp.gt.s32.totalorder %v1317_v7, 0 }
  0xdd   : > { %v3677_v42 = vadd.s32 4294967169, %v1519_v29  ;;  %v7781_v35 = vmov 920167782   ;;  %v5336_v53 = vand.u32 31, %v799_v39  ;;  %v5338_v26 = vsel %vm1318_vm11, %v1317_v7, 0 }
  0xde   : > { %7780 = vst [vmem:[#allocation24_spill] sm:$0xff] %v5332_v25  ;;  %v710_v1 = vshrl.u32 %v7781_v35, %v5290_v48  ;;  %v1421_v56 = vadd.s32 1, %v3673_v18  ;;  %v7783_v13 = vmov 1326507024   ;;  %v606_v12 = vshrl.u32 %v7781_v35, %v5308_v41 }
  0xdf   : > { %7782 = vst [vmem:[#allocation25_spill] sm:$0xff] %v5336_v53  ;;  %v713_v32 = vshrl.u32 %v7783_v13, %v5290_v48  ;;  %v5345_v31 = vsub.s32 32, %v5332_v25  ;;  %v5349_v29 = vshll.u32 %v7781_v35, %v5332_v25  ;;  %v608_v30 = vshll.u32 %v7781_v35, %v5268_v14 }
  0xe0   : > { %v5354_v7 = vand.u32 31, %v5338_v26  ;;  %vm1422_vm12 = vcmp.gt.s32.totalorder %v1421_v56, 0  ;;  %v1525_v18 = vadd.s32 1, %v3677_v42  ;;  %v609_v58 = vshrl.u32 %v7783_v13, %v5308_v41 }
  0xe1   : > { %7784 = vst [vmem:[#allocation26_spill] sm:$0xff] %v5345_v31  ;;  %7785 = vst [vmem:[#allocation27_spill] sm:$0xff] %v5349_v29  ;;  %v5360_v2 = vshrl.u32 %v7783_v13, %v5345_v31  ;;  %v5362_v40 = vsel %vm1422_vm12, %v1421_v56, 0  ;;  %v456_v33 = vmul.f32 %v5079_v57, %v434_v19  ;;  %vm614_vm13 = vcmp.lt.s32.totalorder %v5254_v61, 4 }
  0xe2   : > { %7786 = vst [vmem:[#allocation28_spill] sm:$0xff] %v5354_v7  ;;  %7788 = vst [vmem:[#allocation30_spill] sm:$0xff] %v5362_v40  ;;  %v5367_v17 = vsub.s32 32, %v5336_v53  ;;  %v5370_v48 = vsub.s32 32, %v5354_v7  ;;  %v5374_v42 = vshll.u32 %v7781_v35, %v5354_v7  ;;  %v5376_v44 = vor.u32 %v710_v1, %v709_v4 }
  0xe3   : > { %7787 = vst [vmem:[#allocation29_spill] sm:$0xff] %v5360_v2  ;;  %v714_v11 = vor.u32 %v713_v32, %v5303_v27  ;;  %v5382_v19 = vand.u32 31, %v5362_v40  ;;  %v5384_v6 = vor.u32 %v606_v12, %v605_v28  ;;  %vm1526_vm14 = vcmp.gt.s32.totalorder %v1525_v18, 0 }
  0xe4   : > { %7789 = vst [vmem:[#allocation31_spill] sm:$0xff] %v5367_v17  ;;  %7790 = vst [vmem:[#allocation32_spill] sm:$0xff] %v5370_v48  ;;  %v5388_v36 = vshrl.u32 %v7783_v13, %v5370_v48  ;;  %v5391_v7 = vadd.f32 %v5084_v59, %v456_v33  ;;  %v610_v1 = vor.u32 %v609_v58, %v608_v30  ;;  %v7796_v4 = vmov 2102212464   ;;  %v439_v30 = vpop.permute.xlu0 %438 }
  0xe5   : > { %7791 = vst [vmem:[#allocation33_spill] sm:$0xff] %v5374_v42  ;;  %7792 = vst [vmem:[#allocation34_spill] sm:$0xff] %v5376_v44  ;;  %v813_v27 = vshll.u32 %v7796_v4, %v5336_v53  ;;  %v816_v32 = vshll.u32 %v7781_v35, %v5336_v53  ;;  %v5398_v56 = vsub.s32 32, %v5382_v19  ;;  %v814_v28 = vshrl.u32 %v7781_v35, %v5367_v17 }
  0xe6   : > { %7793 = vst [vmem:[#allocation35_spill] sm:$0xff] %v5382_v19  ;;  %7794 = vst [vmem:[#allocation36_spill] sm:$0xff] %v5388_v36  ;;  %v817_v12 = vshrl.u32 %v7783_v13, %v5367_v17  ;;  %v5408_v58 = vshll.u32 %v7781_v35, %v5382_v19  ;;  %v5410_v29 = vshrl.u32 %v799_v39, 5  ;;  %v5416_v2 = vsel %vm1526_vm14, %v1525_v18, 0 }
  0xe7   : > { %7795 = vst [vmem:[#allocation37_spill] sm:$0xff] %v5391_v7  ;;  %7797 = vst [vmem:[#allocation38_spill] sm:$0xff] %v5398_v56  ;;  %v5414_v53 = vshrl.u32 %v7783_v13, %v5398_v56  ;;  %v1622_v40 = vand.u32 2139095040, %v5391_v7  ;;  %v5422_v17 = vsel %vm718_vm10, %v5376_v44, 920167782  ;;  %v917_v33 = vshll.u32 %v7796_v4, %v5193_v10 }
  0xe8   : > { %7798 = vst [vmem:[#allocation39_spill] sm:$0xff] %v5408_v58  ;;  %7800 = vst [vmem:[#allocation41_spill] sm:$0xff] %v5422_v17  ;;  %v918_v39 = vshrl.u32 %v7781_v35, %v5206_v5  ;;  %v5429_v42 = vand.u32 31, %v5416_v2  ;;  %v5432_v36 = vshrl.u32 %v5186_v46, 5  ;;  %v457_v56 = vmul.f32 %v5079_v57, %v439_v30 }
  0xe9   : > { %7799 = vst [vmem:[#allocation40_spill] sm:$0xff] %v5414_v53  ;;  %v1623_v7 = vshrl.u32 %v1622_v40, 23  ;;  %v5437_v44 = vor.u32 %v814_v28, %v813_v27  ;;  %v818_v17 = vor.u32 %v817_v12, %v816_v32  ;;  %v5448_v46 = vsel %vm718_vm10, %v714_v11, 1326507024 }
  0xea   : > { %v5440_v10 = vsub.s32 32, %v5429_v42  ;;  %v5444_v5 = vshll.u32 %v7781_v35, %v5429_v42  ;;  %vm822_vm15 = vcmp.lt.s32.totalorder %v5410_v29, 4  ;;  %v5452_v40 = vadd.f32 %v5084_v59, %v457_v56 }
  0xeb   : > { %v3681_v18 = vadd.s32 4294967169, %v1623_v7  ;;  %v5457_v57 = vsel %vm614_vm13, %v5384_v6, 920167782  ;;  %v5459_v27 = vor.u32 %v918_v39, %v917_v33  ;;  %v1965_v11 = vadd.f32 1.0, %v5243_v62 }
  0xec   : > { %7801 = vst [vmem:[#allocation42_spill] sm:$0xff] %v5440_v10  ;;  %7802 = vst [vmem:[#allocation43_spill] sm:$0xff] %v5444_v5  ;;  %v5463_v32 = vshrl.u32 %v7783_v13, %v5440_v10  ;;  %v5468_v28 = vsel %vm614_vm13, %v610_v1, 1326507024  ;;  %vm926_vm1 = vcmp.lt.s32.totalorder %v5432_v36, 4  ;;  %v1726_v7 = vand.u32 2139095040, %v5452_v40 }
  0xed   : > { %7803 = vst [vmem:[#allocation44_spill] sm:$0xff] %v5452_v40  ;;  %v1629_v59 = vadd.s32 1, %v3681_v18  ;;  %v5475_v56 = vsel %vm822_vm15, %v5437_v44, 920167782  ;;  %v5479_v12 = vsel %vm822_vm15, %v818_v17, 1326507024  ;;  %v1978_v1 = vmul.f32 %v1965_v11, %v5179_v38 }
  0xee   : > { %7804 = vst [vmem:[#allocation45_spill] sm:$0xff] %v5463_v32  ;;  %v1727_v33 = vshrl.u32 %v1726_v7, 23  ;;  %v7714_v30 = vmov 683565275   ;;  %v7718_v18 = vmov 2475754826   ;;  %v1021_v11 = vshll.u32 %v7796_v4, %v5257_v0 }
  0xef   : > { %vm1630_vm2 = vcmp.gt.s32.totalorder %v1629_v59, 0  ;;  %v492_v39 = vshll.u32 %v7714_v30, %v5181_v43  ;;  %v493_v40 = vshrl.u32 %v7718_v18, %v5198_v52  ;;  %v5491_v17 = vsel %vm926_vm1, %v5459_v27, 920167782  ;;  %3962 = vmatmul.mubr.f32.gmra.mrb[20].mxu0 %v1978_v1 }
  0xf0   : > { %v5494_v58 = vshrl.u32 %v5249_v47, 5  ;;  %v5496_v62 = vsel %vm1630_vm2, %v1629_v59, 0  ;;  %v495_v38 = vshll.u32 %v7718_v18, %v5181_v43  ;;  %v3685_v30 = vadd.s32 4294967169, %v1727_v33 }
  0xf1   : > { %7805 = vst [vmem:[#allocation46_spill] sm:$0xff] %v5496_v62  ;;  %v5503_v7 = vand.u32 31, %v5496_v62  ;;  %v7806_v5 = vmov 0.0   ;;  %v1979_v47 = vmul.f32 %v5195_v51, %v5176_v24  ;;  %v1967_v59 = vadd.f32 1.0, %v5252_v49 }
  0xf2   : > { %3964 = vmatprep.mubr.msk.f32.mxu0 %vm4766_vm0, %v7806_v5  ;;  %v7726_v32 = vmov 2131351028   ;;  %v499_v53 = vshrl.u32 %v7796_v4, %v5198_v52  ;;  %v1022_v33 = vshrl.u32 %v7781_v35, %v5271_v9  ;;  %v494_v51 = vor.u32 %v493_v40, %v492_v39 }
  0xf3   : > { %v496_v1 = vshrl.u32 %v7726_v32, %v5198_v52  ;;  %v498_v18 = vshll.u32 %v7726_v32, %v5181_v43  ;;  %v5519_v62 = vsub.s32 32, %v5503_v7  ;;  %v5523_v24 = vshll.u32 %v7781_v35, %v5503_v7  ;;  %3965 = vmatmul.mubr.f32.gmra.mrb[22].mxu0 %v1979_v47 }
  0xf4   : > { %v1733_v49 = vadd.s32 1, %v3685_v30  ;;  %vm507_vm3 = vcmp.lt.s32.totalorder %v5201_v60, 1  ;;  %v7809_v43 = vor.u32 %v5222_v20, %v5210_v8  ;;  %3967 = vmatprep.mubr.msk.f32.mxu0 %vm4766_vm0, %v7806_v5  ;;  %v7811_v40 = vmov 683565275  }
  0xf5   : > { %7807 = vst [vmem:[#allocation47_spill] sm:$0xff] %v5519_v62  ;;  %7808 = vst [vmem:[#allocation48_spill] sm:$0xff] %v5523_v24  ;;  %v497_v10 = vor.u32 %v496_v1, %v495_v38  ;;  %v500_v0 = vor.u32 %v499_v53, %v498_v18  ;;  %v5535_v9 = vshrl.u32 %v7783_v13, %v5519_v62  ;;  %vm509_vm4 = vcmp.lt.s32.totalorder %v5201_v60, 3  ;;  %v4689_v24 = vld [vmem:[%s4908_s11 + $0x20] sm:$0xff] }
  0xf6   : > { %v5531_v32 = vsel %vm926_vm1, %v7809_v43, 1326507024  ;;  %v491_v30 = vshrl.u32 %v7811_v40, %v5198_v52  ;;  %vm1734_vm6 = vcmp.gt.s32.totalorder %v1733_v49, 0  ;;  %v1980_v53 = vmul.f32 %v1967_v59, %v5184_v45 }
  0xf7   : > { %7810 = vst [vmem:[#allocation49_spill] sm:$0xff] %v5535_v9  ;;  %vm508_vm7 = vcmp.lt.s32.totalorder %v5201_v60, 2  ;;  %v512_v8 = vsel %vm510_vm5, %v500_v0, 2102212464  ;;  %v5548_v39 = vsel %vm1734_vm6, %v1733_v49, 0  ;;  %v515_v18 = vsel %vm507_vm3, %v494_v51, %v497_v10  ;;  %v7836_v9 = vld [vmem:[#allocation6_spill] sm:$0xff] }
  0xf8   : > { %7812 = vst [vmem:[#allocation50_spill] sm:$0xff] %v5548_v39  ;;  %v517_v52 = vsel %vm509_vm4, %v500_v0, %v5320_v50  ;;  %v5555_v38 = vor.u32 %v1022_v33, %v1021_v11  ;;  %vm1030_vm8 = vcmp.lt.s32.totalorder %v5494_v58, 4  ;;  %v1125_v45 = vshll.u32 %v7796_v4, %v5280_v23  ;;  %3968 = vmatmul.mubr.f32.gmra.mrb[24].mxu0 %v1980_v53 }
  0xf9   : > { %v5561_v47 = vand.u32 31, %v5548_v39  ;;  %4045 = vmatprep.mubr.msk.f32.mxu0 %vm4766_vm0, %v7806_v5  ;;  %v511_v59 = vsel %vm507_vm3, %v491_v30, %v494_v51  ;;  %v513_v50 = vsel %vm509_vm4, %v497_v10, %v512_v8  ;;  %v519_v11 = vsel %vm507_vm3, %v497_v10, %v500_v0 }
  0xfa   : > { %v521_v1 = vsel %vm509_vm4, %v5277_v22, %v5328_v34  ;;  %v1126_v33 = vshrl.u32 %v7781_v35, %v5295_v63  ;;  %v518_v43 = vsel %vm508_vm7, %v515_v18, %v517_v52  ;;  %v5587_v10 = vshrl.u32 %v5260_v55, 5  ;;  %v4685_v18 = vld [vmem:[%s4908_s11] sm:$0xff] }
  0xfb   : > { %7813 = vst [vmem:[#allocation51_spill] sm:$0xff] %v5561_v47  ;;  %v5578_v49 = vsub.s32 32, %v5561_v47  ;;  %v5582_v51 = vshll.u32 %v7781_v35, %v5561_v47  ;;  %v522_v0 = vsel %vm508_vm7, %v519_v11, %v521_v1  ;;  %v7816_v22 = vor.u32 8388608, %v5173_v3 }
  0xfc   : > { %vm2279_vm5 = vcmask 130048   ;;  %v5594_v30 = vshrl.u32 %v5324_v54, 5  ;;  %v514_v8 = vsel %vm508_vm7, %v511_v59, %v513_v50  ;;  %v7730_v55 = vand.u32 2147483647, %v5132_v37  ;;  %v4686_v50 = vld [vmem:[%s4908_s11 + $0x8] sm:$0xff] }
  0xfd   : > { %7814 = vst [vmem:[#allocation52_spill] sm:$0xff] %v5578_v49  ;;  %7815 = vst [vmem:[#allocation53_spill] sm:$0xff] %v5582_v51  ;;  %v523_v34 = vshll.u32 %v7816_v22, 8  ;;  %v5598_v53 = vshrl.u32 %v7783_v13, %v5578_v49  ;;  %4046 = vmatmul.mubr.msk.f32.vlgmr.msra.gmra.mrb[26].mxu0 %vm2279_vm5, %v4685_v18  ;;  %v5617_v60 = vsel %vm1030_vm8, %v5555_v38, 920167782  ;;  %v7819_v13 = vor.u32 %v5285_v15, %v5275_v21 }
  0xfe   : > { %7817 = vst [vmem:[#allocation54_spill] sm:$0xff] %v5594_v30  ;;  %4048 = vmatprep.mubr.msk.f32.mxu0 %vm4766_vm0, %v7806_v5  ;;  %v5626_v59 = vor.u32 %v1126_v33, %v1125_v45  ;;  %vm1134_vm9 = vcmp.lt.s32.totalorder %v5587_v10, 4  ;;  %v596_v21 = vshll.u32 %v7811_v40, %v5268_v14  ;;  %v7821_v15 = vmov 2475754826  }
  0xff   : > { %7818 = vst [vmem:[#allocation55_spill] sm:$0xff] %v5598_v53  ;;  %v5605_v52 = vmul.u32.u64.low %v523_v34, %v522_v0  ;;  %v5606_v11 = vmul.u32.u64.high %v523_v34, %v522_v0, %v5605_v52  ;;  %v5608_v3 = vmul.u32.u64.low %v523_v34, %v518_v43  ;;  %v5609_v1 = vmul.u32.u64.high %v523_v34, %v518_v43, %v5608_v3 }
 0x100   : > { %v5624_v54 = vsel %vm1030_vm8, %v7819_v13, 1326507024  ;;  %7820 = vst [vmem:[#allocation56_spill] sm:$0xff] %v5626_v59  ;;  %v1229_v43 = vshll.u32 %v7796_v4, %v5332_v25  ;;  %v586_v0 = vand.u32 8388607, %v7730_v55  ;;  %v597_v22 = vshrl.u32 %v7821_v15, %v5308_v41 }
 0x101   : > { %vm1238_vm11 = vcmp.lt.s32.totalorder %v5594_v30, 4  ;;  %v5641_v45 = vshrl.u32 %v5338_v26, 5  ;;  %v530_v33 = vmul.u32 %v523_v34, %v514_v8  ;;  %v599_v18 = vshll.u32 %v7821_v15, %v5268_v14  ;;  %4049 = vmatmul.mubr.msk.f32.gmra.mrb[28].mxu0 %vm2279_vm5, %v4686_v50  ;;  %v4692_v30 = vld [vmem:[%s4908_s11 + $0x38] sm:$0xff] }
 0x102   : > { %v7823_v52 = vmov 2131351028   ;;  %vm532_vm12 = vc.u32 %v5606_v11, %v5608_v3  ;;  %v533_v20 = vadd.s32 1, %v5609_v1  ;;  %v587_v55 = vor.u32 8388608, %v586_v0  ;;  %4051 = vmatprep.mubr.msk.f32.mxu0 %vm4766_vm0, %v7806_v5 }
 0x103   : > { %7822 = vst [vmem:[#allocation57_spill] sm:$0xff] %v5641_v45  ;;  %v600_v13 = vshrl.u32 %v7823_v52, %v5308_v41  ;;  %v595_v26 = vshrl.u32 %v7811_v40, %v5308_v41  ;;  %v598_v34 = vor.u32 %v597_v22, %v596_v21  ;;  %v602_v51 = vshll.u32 %v7823_v52, %v5268_v14  ;;  %v4687_v14 = vld [vmem:[%s4908_s11 + $0x10] sm:$0xff] }
 0x104   : > { %v603_v50 = vshrl.u32 %v7796_v4, %v5308_v41  ;;  %v1230_v53 = vshrl.u32 %v7781_v35, %v5345_v31  ;;  %v534_v39 = vsel %vm532_vm12, %v533_v20, %v5609_v1  ;;  %vm611_vm14 = vcmp.lt.s32.totalorder %v5254_v61, 1  ;;  %v7824_v41 = vld [vmem:[#allocation28_spill] sm:$0xff] }
 0x105   : > { %v601_v8 = vor.u32 %v600_v13, %v599_v18  ;;  %vm613_vm2 = vcmp.lt.s32.totalorder %v5254_v61, 3  ;;  %v535_v0 = vadd.s32 %v534_v39, %v530_v33  ;;  %vm612_vm3 = vcmp.lt.s32.totalorder %v5254_v61, 2  ;;  %4052 = vmatmul.mubr.msk.f32.gmra.mrb[30].mxu0 %vm2279_vm5, %v4687_v14 }
 0x106   : > { %v604_v49 = vor.u32 %v603_v50, %v602_v51  ;;  %v1333_v22 = vshll.u32 %v7796_v4, %v7824_v41  ;;  %v615_v20 = vsel %vm611_vm14, %v595_v26, %v598_v34  ;;  %v625_v39 = vsel %vm613_vm2, %v5384_v6, %v5468_v28  ;;  %4054 = vmatprep.mubr.msk.f32.mxu0 %vm4766_vm0, %v7806_v5 }
 0x107   : > { %v619_v21 = vsel %vm611_vm14, %v598_v34, %v601_v8  ;;  %v627_v51 = vshll.u32 %v587_v55, 8  ;;  %v536_v1 = vadd.s32 536870912, %v535_v0  ;;  %v5687_v26 = vor.u32 %v1230_v53, %v1229_v43 }
 0x108   : > { %v616_v33 = vsel %vm614_vm13, %v604_v49, 2102212464  ;;  %v621_v18 = vsel %vm613_vm2, %v604_v49, %v5457_v57  ;;  %v623_v13 = vsel %vm611_vm14, %v601_v8, %v604_v49  ;;  %v1334_v34 = vshrl.u32 %v7781_v35, %v5370_v48  ;;  %v4688_v49 = vld [vmem:[%s4908_s11 + $0x18] sm:$0xff] }
 0x109   : > { %7825 = vst [vmem:[#allocation58_spill] sm:$0xff] %v5687_v26  ;;  %v617_v6 = vsel %vm613_vm2, %v601_v8, %v616_v33  ;;  %v622_v28 = vsel %vm612_vm3, %v619_v21, %v621_v18  ;;  %v626_v55 = vsel %vm612_vm3, %v623_v13, %v625_v39  ;;  %v5697_v50 = vshrl.u32 %v536_v1, 30  ;;  %4055 = vmatmul.mubr.msk.f32.gmra.mrb[32].mxu0 %vm2279_vm5, %v4688_v49  ;;  %v7826_v21 = vld [vmem:[#allocation7_spill] sm:$0xff]  ;;  %v7828_v18 = vld [vmem:[#allocation22_spill] sm:$0xff] }
 0x10a   : > { %v5699_v57 = vmul.u32.u64.low %v627_v51, %v626_v55  ;;  %v5700_v14 = vmul.u32.u64.high %v627_v51, %v626_v55, %v5699_v57  ;;  %v618_v53 = vsel %vm612_vm3, %v615_v20, %v617_v6  ;;  %4057 = vmatprep.mubr.msk.f32.mxu0 %vm4766_vm0, %v7806_v5  ;;  %v5716_v1 = vsel %vm1134_vm9, %v5626_v59, 920167782  ;;  %v7827_v33 = vld [vmem:[#allocation23_spill] sm:$0xff] }
 0x10b   : > { %v5706_v43 = vmul.u32.u64.low %v627_v51, %v622_v28  ;;  %v5707_v8 = vmul.u32.u64.high %v627_v51, %v622_v28, %v5706_v43  ;;  %v7829_v13 = vor.u32 %v7827_v33, %v7828_v18  ;;  %vm1342_vm13 = vcmp.lt.s32.totalorder %v5641_v45, 4  ;;  %v7832_v28 = vld [vmem:[#allocation30_spill] sm:$0xff]  ;;  %v7833_v57 = vld [vmem:[#allocation16_spill] sm:$0xff]  ;;  %v7834_v33 = vld [vmem:[#allocation21_spill] sm:$0xff] }
 0x10c   : > { %v538_v20 = vshll.u32 %v5697_v50, 30  ;;  %v5730_v6 = vsel %vm1238_vm11, %v5687_v26, 920167782  ;;  %v5733_v55 = vshrl.u32 %v7832_v28, 5  ;;  %v703_v49 = vshll.u32 %v7821_v15, %v7833_v57  ;;  %v7842_v26 = vld [vmem:[#allocation38_spill] sm:$0xff] }
 0x10d   : > { %v5723_v61 = vsel %vm1134_vm9, %v7829_v13, 1326507024  ;;  %7831 = vst [vmem:[#allocation23_spill] sm:$0xff] %v5730_v6  ;;  %v704_v18 = vshrl.u32 %v7823_v52, %v7834_v33  ;;  %v5739_v13 = vor.u32 %v1334_v34, %v1333_v22  ;;  %v634_v47 = vmul.u32 %v627_v51, %v618_v53  ;;  %4058 = vmatmul.mubr.msk.f32.gmra.mrb[34].mxu0 %vm2279_vm5, %v4689_v24  ;;  %v7838_v51 = vld [vmem:[#allocation29_spill] sm:$0xff]  ;;  %v7839_v34 = vld [vmem:[#allocation27_spill] sm:$0xff] }
 0x10e   : > { %7830 = vst [vmem:[#allocation7_spill] sm:$0xff] %v5723_v61  ;;  %v5741_v39 = vsub.s32 %v535_v0, %v538_v20  ;;  %vm636_vm4 = vc.u32 %v5700_v14, %v5706_v43  ;;  %vm477_vm6 = vcmp.lt.s32.totalorder %v7836_v9, 0  ;;  %v637_v28 = vadd.s32 1, %v5707_v8  ;;  %4060 = vmatprep.mubr.msk.f32.mxu0 %vm4766_vm0, %v7806_v5 }
 0x10f   : > { %7835 = vst [vmem:[#allocation22_spill] sm:$0xff] %v5739_v13  ;;  %v7837_v41 = vand.u32 2147483647, %v7826_v21  ;;  %v700_v22 = vshll.u32 %v7811_v40, %v7833_v57  ;;  %v701_v0 = vshrl.u32 %v7821_v15, %v7834_v33  ;;  %v7840_v24 = vor.u32 %v7838_v51, %v7839_v34 }
 0x110   : > { %v541_v20 = vsub.s32 0, %v5741_v39  ;;  %v706_v6 = vshll.u32 %v7823_v52, %v7833_v57  ;;  %v5773_v31 = vshrl.u32 %v7781_v35, %v7842_v26  ;;  %v638_v25 = vsel %vm636_vm4, %v637_v28, %v5707_v8  ;;  %v7847_v28 = vld [vmem:[#allocation36_spill] sm:$0xff] }
 0x111   : > { %v690_v48 = vand.u32 8388607, %v7837_v41  ;;  %v5762_v53 = vsel %vm1238_vm11, %v7840_v24, 1326507024  ;;  %v5766_v41 = vshll.u32 %v7796_v4, %v5382_v19  ;;  %v705_v51 = vor.u32 %v704_v18, %v703_v49  ;;  %v4690_v19 = vld [vmem:[%s4908_s11 + $0x28] sm:$0xff] }
 0x112   : > { %7841 = vst [vmem:[#allocation30_spill] sm:$0xff] %v5762_v53  ;;  %v707_v34 = vshrl.u32 %v7796_v4, %v7834_v33  ;;  %v3638_v24 = vmin.u32 %v541_v20, %v5741_v39  ;;  %v639_v53 = vadd.s32 %v638_v25, %v634_v47  ;;  %vm715_vm7 = vcmp.lt.s32.totalorder %v5245_v16, 1  ;;  %4061 = vmatmul.mubr.msk.f32.gmra.mrb[36].mxu0 %vm2279_vm5, %v4690_v19  ;;  %v7848_v19 = vld [vmem:[#allocation33_spill] sm:$0xff] }
 0x113   : > { %vm717_vm12 = vcmp.lt.s32.totalorder %v5245_v16, 3  ;;  %v5786_v57 = vsel %vm1342_vm13, %v5739_v13, 920167782  ;;  %v7844_v8 = vand.u32 2147483647, %v7836_v9  ;;  %v691_v18 = vor.u32 8388608, %v690_v48  ;;  %4063 = vmatprep.mubr.msk.f32.mxu0 %vm4766_vm0, %v7806_v5 }
 0x114   : > { %7843 = vst [vmem:[#allocation16_spill] sm:$0xff] %v5786_v57  ;;  %v702_v25 = vor.u32 %v701_v0, %v700_v22  ;;  %v708_v47 = vor.u32 %v707_v34, %v706_v6  ;;  %v7849_v20 = vor.u32 %v7847_v28, %v7848_v19  ;;  %v543_v13 = vclz %v3638_v24  ;;  %v7851_v22 = vld [vmem:[#allocation34_spill] sm:$0xff]  ;;  %v4691_v28 = vld [vmem:[%s4908_s11 + $0x30] sm:$0xff] }
 0x115   : > { %vm5790_vm14 = vcmp.le.f32.partialorder %v7844_v8, 0.7853982  ;;  %v561_v8 = vsub.s32 4, %v5697_v50  ;;  %v699_v57 = vshrl.u32 %v7811_v40, %v7834_v33  ;;  %v640_v48 = vadd.s32 536870912, %v639_v53 }
 0x116   : > { %v5801_v26 = vsel %vm1342_vm13, %v7849_v20, 1326507024  ;;  %vm716_vm2 = vcmp.lt.s32.totalorder %v5245_v16, 2  ;;  %v727_v6 = vsel %vm715_vm7, %v705_v51, %v708_v47  ;;  %v729_v0 = vsel %vm717_vm12, %v7851_v22, %v5448_v46  ;;  %4064 = vmatmul.mubr.msk.f32.gmra.mrb[38].mxu0 %vm2279_vm5, %v4691_v28 }
 0x117   : > { %7850 = vst [vmem:[#allocation21_spill] sm:$0xff] %v5801_v26  ;;  %v5814_v34 = vshrl.u32 %v5416_v2, 5  ;;  %v3639_v24 = vadd.s32 4294967294, %v543_v13  ;;  %vm581_vm3 = vcmp.lt.s32.totalorder %v5132_v37, 0  ;;  %v720_v33 = vsel %vm718_vm10, %v708_v47, 2102212464  ;;  %4066 = vmatprep.mubr.msk.f32.mxu0 %vm4766_vm0, %v7806_v5 }
 0x118   : > { %v641_v19 = vshrl.u32 %v640_v48, 30  ;;  %v723_v20 = vsel %vm715_vm7, %v702_v25, %v705_v51  ;;  %v7853_v26 = vld [vmem:[#allocation41_spill] sm:$0xff]  ;;  %v5826_v2 = vshll.u32 %v691_v18, 8  ;;  %v531_v13 = vadd.s32 %v5608_v3, %v5606_v11 }
 0x119   : > { %7852 = vst [vmem:[#allocation6_spill] sm:$0xff] %v5814_v34  ;;  %v725_v46 = vsel %vm717_vm12, %v708_v47, %v7853_v26  ;;  %vm3640_vm10 = vcmp.lt.s32.totalorder %v3639_v24, 0  ;;  %v562_v48 = vsel %vm477_vm6, %v561_v8, %v5697_v50  ;;  %v730_v22 = vsel %vm716_vm2, %v727_v6, %v729_v0  ;;  %v7854_v0 = vld [vmem:[#allocation11_spill] sm:$0xff] }
 0x11a   : > { %v546_v28 = vsel %vm3640_vm10, 0, %v3639_v24  ;;  %v642_v34 = vshll.u32 %v641_v19, 30  ;;  %v719_v26 = vsel %vm715_vm7, %v699_v57, %v702_v25  ;;  %v721_v18 = vsel %vm717_vm12, %v705_v51, %v720_v33  ;;  %4067 = vmatmul.mubr.msk.f32.gmra.mrb[40].mxu0 %vm2279_vm5, %v4692_v30 }
 0x11b   : > { %v547_v47 = vsub.s32 32, %v546_v28  ;;  %v548_v45 = vshll.u32 %v5741_v39, %v546_v28  ;;  %v551_v11 = vsub.s32 4294967266, %v546_v28  ;;  %v726_v3 = vsel %vm716_vm2, %v723_v20, %v725_v46  ;;  %4069 = vmatprep.mubr.msk.f32.mxu0 %vm4766_vm0, %v7806_v5  ;;  %v4693_v28 = vld [vmem:[%s4908_s11 + $0x40] sm:$0xff] }
 0x11c   : > { %v5846_v50 = vsub.s32 %v639_v53, %v642_v34  ;;  %v665_v8 = vsub.s32 4, %v641_v19  ;;  %v5849_v6 = vmul.u32.u64.low %v5826_v2, %v730_v22  ;;  %v5850_v57 = vmul.u32.u64.high %v5826_v2, %v730_v22, %v5849_v6 }
 0x11d   : > { %v549_v51 = vshrl.u32 %v531_v13, %v547_v47  ;;  %v552_v39 = vadd.s32 127, %v551_v11  ;;  %v564_v25 = vsel %vm5790_vm14, 0, %v562_v48  ;;  %v7755_v24 = vand.u32 2147483647, %v7854_v0 }
 0x11e   : > { %v7855_v30 = vand.u32 2147483647, %v5132_v37  ;;  %v645_v34 = vsub.s32 0, %v5846_v50  ;;  %v5865_v33 = vmul.u32.u64.low %v5826_v2, %v726_v3  ;;  %v5866_v20 = vmul.u32.u64.high %v5826_v2, %v726_v3, %v5865_v33  ;;  %4070 = vmatmul.mubr.msk.f32.gmra.mrb[42].mxu0 %vm2279_vm5, %v4693_v28 }
 0x11f   : > { %v550_v46 = vor.u32 %v549_v51, %v548_v45  ;;  %v553_v13 = vshll.u32 %v552_v39, 23  ;;  %v635_v48 = vadd.s32 %v5706_v43, %v5700_v14  ;;  %v722_v22 = vsel %vm716_vm2, %v719_v26, %v721_v18  ;;  %v7858_v45 = vld [vmem:[#allocation31_spill] sm:$0xff]  ;;  %4072 = vmatprep.mubr.msk.f32.mxu0 %vm4766_vm0, %v7806_v5  ;;  %v7859_v26 = vld [vmem:[#allocation25_spill] sm:$0xff] }
 0x120   : > { %vm5859_vm4 = vcmp.le.f32.partialorder %v7855_v30, 0.7853982  ;;  %v5875_v47 = vadd.s32 3, %v564_v25  ;;  %v3642_v11 = vmin.u32 %v645_v34, %v5846_v50  ;;  %v5880_v3 = vsel %vm581_vm3, %v665_v8, %v641_v19 }
 0x121   : > { %v803_v6 = vshrl.u32 %v7811_v40, %v7858_v45  ;;  %v554_v16 = vor.u32 4788187, %v553_v13  ;;  %v557_v14 = vcvt.s32.f32 %v550_v46  ;;  %v794_v43 = vand.u32 8388607, %v7755_v24  ;;  %v4694_v46 = vld [vmem:[%s4908_s11 + $0x48] sm:$0xff] }
 0x122   : > { %v807_v18 = vshll.u32 %v7821_v15, %v7859_v26  ;;  %v647_v51 = vclz %v3642_v11  ;;  %v738_v39 = vmul.u32 %v5826_v2, %v722_v22  ;;  %vm740_vm7 = vc.u32 %v5850_v57, %v5865_v33  ;;  %4073 = vmatmul.mubr.msk.f32.gmra.mrb[44].mxu0 %vm2279_vm5, %v4694_v46 }
 0x123   : > { %v804_v19 = vshll.u32 %v7811_v40, %v7859_v26  ;;  %v555_v8 = vand.u32 2147483647, %v554_v16  ;;  %v741_v25 = vadd.s32 1, %v5866_v20  ;;  %v805_v30 = vshrl.u32 %v7821_v15, %v7858_v45  ;;  %4075 = vmatprep.mubr.msk.f32.mxu0 %vm4766_vm0, %v7806_v5 }
 0x124   : > { %v808_v34 = vshrl.u32 %v7823_v52, %v7858_v45  ;;  %v3643_v13 = vadd.s32 4294967294, %v647_v51  ;;  %v668_v2 = vsel %vm5859_vm4, 0, %v5880_v3  ;;  %v810_v22 = vshll.u32 %v7823_v52, %v7859_v26  ;;  %v4695_v26 = vld [vmem:[%s4908_s11 + $0x50] sm:$0xff] }
 0x125   : > { %v811_v28 = vshrl.u32 %v7796_v4, %v7858_v45  ;;  %v558_v11 = vmul.f32 %v557_v14, %v555_v8  ;;  %v742_v16 = vsel %vm740_vm7, %v741_v25, %v5866_v20  ;;  %v795_v24 = vor.u32 8388608, %v794_v43 }
 0x126   : > { %v809_v46 = vor.u32 %v808_v34, %v807_v18  ;;  %vm3644_vm12 = vcmp.lt.s32.totalorder %v3643_v13, 0  ;;  %v743_v51 = vadd.s32 %v742_v16, %v738_v39  ;;  %vm819_vm2 = vcmp.lt.s32.totalorder %v5410_v29, 1  ;;  %4076 = vmatmul.mubr.msk.f32.gmra.mrb[46].mxu0 %vm2279_vm5, %v4695_v26 }
 0x127   : > { %v812_v62 = vor.u32 %v811_v28, %v810_v22  ;;  %v559_v3 = vxor.u32 2147483648, %v558_v11  ;;  %v650_v59 = vsel %vm3644_vm12, 0, %v3643_v13  ;;  %v806_v61 = vor.u32 %v805_v30, %v804_v19  ;;  %4078 = vmatprep.mubr.msk.f32.mxu0 %vm4766_vm0, %v7806_v5  ;;  %v4696_v22 = vld [vmem:[%s4908_s11 + $0x58] sm:$0xff] }
 0x128   : > { %vm821_vm10 = vcmp.lt.s32.totalorder %v5410_v29, 3  ;;  %v651_v45 = vsub.s32 32, %v650_v59  ;;  %v652_v14 = vshll.u32 %v5846_v50, %v650_v59  ;;  %v655_v20 = vsub.s32 4294967266, %v650_v59 }
 0x129   : > { %v744_v43 = vadd.s32 536870912, %v743_v51  ;;  %v560_v18 = vsel %vm477_vm6, %v559_v3, %v558_v11  ;;  %vm820_vm7 = vcmp.lt.s32.totalorder %v5410_v29, 2  ;;  %v824_v39 = vsel %vm822_vm15, %v812_v62, 2102212464 }
 0x12a   : > { %v831_v19 = vsel %vm819_vm2, %v809_v46, %v812_v62  ;;  %v563_v50 = vsel %vm5790_vm14, %v7836_v9, %v560_v18  ;;  %v653_v59 = vshrl.u32 %v635_v48, %v651_v45  ;;  %v656_v8 = vadd.s32 127, %v655_v20  ;;  %4079 = vmatmul.mubr.msk.f32.gmra.mrb[48].mxu0 %vm2279_vm5, %v4696_v22  ;;  %v7860_v22 = vld [vmem:[#allocation8_spill] sm:$0xff] }
 0x12b   : > { %v745_v25 = vshrl.u32 %v744_v43, 30  ;;  %4529 = vcosq.f32 %v563_v50  ;;  %v827_v30 = vsel %vm819_vm2, %v806_v61, %v809_v46  ;;  %v829_v34 = vsel %vm821_vm10, %v812_v62, %v5475_v56  ;;  %4081 = vmatprep.mubr.msk.f32.mxu0 %vm4766_vm0, %v7806_v5 }
 0x12c   : > { %v833_v13 = vsel %vm821_vm10, %v5437_v44, %v5479_v12  ;;  %4531 = vsinq.f32 %v563_v50  ;;  %v654_v49 = vor.u32 %v653_v59, %v652_v14  ;;  %v657_v48 = vshll.u32 %v656_v8, 23 }
 0x12d   : > { %v746_v28 = vshll.u32 %v745_v25, 30  ;;  %v823_v11 = vsel %vm819_vm2, %v803_v6, %v806_v61  ;;  %v825_v56 = vsel %vm821_vm10, %v809_v46, %v824_v39  ;;  %v834_v44 = vsel %vm820_vm7, %v831_v19, %v833_v13  ;;  %v4697_v61 = vld [vmem:[%s4908_s11 + $0x60] sm:$0xff]  ;;  %s3570_s11 = sshll.u32 %s7572_s29, 4  ;;  %s7588_s11 = int_to_ptr.vmem [resolvable:$true] %s3570_s11 }
 0x12e   : > { %v835_v12 = vshll.u32 %v795_v24, 8  ;;  %v658_v62 = vor.u32 4788187, %v657_v48  ;;  %v661_v16 = vcvt.s32.f32 %v654_v49  ;;  %v830_v26 = vsel %vm820_vm7, %v827_v30, %v829_v34  ;;  %4082 = vmatmul.mubr.msk.f32.gmra.mrb[50].mxu0 %vm2279_vm5, %v4697_v61  ;;  %s4700_s17 = scalar_lea.vmem %s7588_s11, 1664  ;;  %p4707_p0 = scmp.lt.s32.totalorder %s7588_s11, %s4705_s26 }
 0x12f   : > { %v5948_v3 = vsub.s32 %v743_v51, %v746_v28  ;;  %v569_v45 = vand.u32 3, %v5875_v47  ;;  %v672_v14 = vadd.s32 3, %v668_v2  ;;  %v5960_v6 = vor.u32 %v5773_v31, %v5766_v41  ;;  %4163 = vmatprep.mubr.msk.f32.mxu0 %vm4766_vm0, %v7806_v5  ;;  %p4701_p11 = scmp.ne.s32.totalorder %s7588_s11, %s4700_s17  ;;  %p4708_p1 = scmp.lt.s32.totalorder %s4706_s28, %s4700_s17 }
 0x130   : > { %v5953_v20 = vmul.u32.u64.low %v835_v12, %v834_v44  ;;  %v5954_v43 = vmul.u32.u64.high %v835_v12, %v834_v44, %v5953_v20  ;;  %v5964_v24 = vshll.u32 %v7796_v4, %v5429_v42  ;;  %v659_v46 = vand.u32 2147483647, %v658_v62 }
 0x131   : > { %v749_v51 = vsub.s32 0, %v5948_v3  ;;  %v769_v47 = vsub.s32 4, %v745_v25  ;;  %v826_v2 = vsel %vm820_vm7, %v823_v11, %v825_v56  ;;  %vm567_vm15 = vweird.f32 %v7836_v9  ;;  %p4702_p12 = pnand %p4701_p11, %p4871_p5  ;;  %p4709_p2 = por %p4708_p1, %p4707_p0 }
 0x132   : > { %v5971_v18 = vmul.u32.u64.low %v835_v12, %v830_v26  ;;  %v5972_v39 = vmul.u32.u64.high %v835_v12, %v830_v26, %v5971_v18  ;;  %v662_v31 = vmul.f32 %v661_v16, %v659_v46  ;;  %vm685_vm5 = vcmp.lt.s32.totalorder %v7826_v21, 0  ;;  %v7865_v26 = vld [vmem:[#allocation13_spill] sm:$0xff] }
 0x133   : > { %v3646_v41 = vmin.u32 %v749_v51, %v5948_v3  ;;  %vm570_vm6 = vcmp.lt.s32.totalorder %v569_v45, 2  ;;  %vm571_vm14 = vcmp.eq.s32.totalorder %v569_v45, 0  ;;  %vm574_vm12 = vcmp.eq.s32.totalorder %v569_v45, 2  ;;  %p4703_p13 = pneg %p4702_p12 }
 0x134   : > { %v5978_v19 = vand.u32 3, %v672_v14  ;;  %v663_v50 = vxor.u32 2147483648, %v662_v31  ;;  %v842_v29 = vmul.u32 %v835_v12, %v826_v2  ;;  %vm844_vm2 = vc.u32 %v5954_v43, %v5971_v18 }
 0x135   : > { %v751_v59 = vclz %v3646_v41  ;;  %v4530_v8 = vpop.eup %4529  ;;  %v739_v30 = vadd.s32 %v5865_v33, %v5850_v57  ;;  %v5986_v34 = vsel %vm685_vm5, %v769_v47, %v745_v25  ;;  %v845_v13 = vadd.s32 1, %v5972_v39  ;;  %v7864_v33 = vld [vmem:[#allocation12_spill] sm:$0xff]  ;;  %p4710_p3 = pnand %p4709_p2, %p4703_p13 }
 0x136   : > { %v891_v49 = vand.u32 2147483647, %v7860_v22  ;;  %v4532_v48 = vpop.eup %4531  ;;  %v575_v28 = vxor.u32 2147483648, %v4530_v8  ;;  %v664_v11 = vsel %vm581_vm3, %v663_v50, %v662_v31  ;;  %v7861_v56 = vand.u32 2147483647, %v7826_v21 }
 0x137   : > { %v3647_v57 = vadd.s32 4294967294, %v751_v59  ;;  %v908_v25 = vshll.u32 %v7811_v40, %v7864_v33  ;;  %v572_v12 = vxor.u32 2147483648, %v4532_v48  ;;  %v667_v62 = vsel %vm5859_vm4, %v5132_v37, %v664_v11 }
 0x138   : > { %vm5994_vm10 = vcmp.le.f32.partialorder %v7861_v56, 0.7853982  ;;  %v846_v16 = vsel %vm844_vm2, %v845_v13, %v5972_v39  ;;  %v909_v14 = vshrl.u32 %v7821_v15, %v7865_v26  ;;  %v576_v20 = vsel %vm574_vm12, %v575_v28, %v4532_v48 }
 0x139   : > { %4533 = vcosq.f32 %v667_v62  ;;  %vm3648_vm3 = vcmp.lt.s32.totalorder %v3647_v57, 0  ;;  %v847_v61 = vadd.s32 %v846_v16, %v842_v29  ;;  %v573_v46 = vsel %vm571_vm14, %v4530_v8, %v572_v12 }
 0x13a   : > { %4535 = vsinq.f32 %v667_v62  ;;  %v754_v51 = vsel %vm3648_vm3, 0, %v3647_v57  ;;  %v911_v47 = vshll.u32 %v7821_v15, %v7864_v33  ;;  %v577_v53 = vsel %vm570_vm6, %v573_v46, %v576_v20 }
 0x13b   : > { %v755_v2 = vsub.s32 32, %v754_v51  ;;  %v756_v39 = vshll.u32 %v5948_v3, %v754_v51  ;;  %v759_v31 = vsub.s32 4294967266, %v754_v51  ;;  %v578_v41 = vsel %vm567_vm15, nan, %v577_v53 }
 0x13c   : > { %v848_v50 = vadd.s32 536870912, %v847_v61  ;;  %v912_v59 = vshrl.u32 %v7823_v52, %v7865_v26  ;;  %v914_v29 = vshll.u32 %v7823_v52, %v7864_v33  ;;  %4003 = vmatmul.mubr.f32.vlgmr.msra.gmra.mrb[0].mxu1 %v578_v41  ;;  %vm674_vm4 = vcmp.lt.s32.totalorder %v5978_v19, 2 }
 0x13d   : > { %v757_v8 = vshrl.u32 %v739_v30, %v755_v2  ;;  %v760_v45 = vadd.s32 127, %v759_v31  ;;  %v898_v13 = vand.u32 8388607, %v891_v49  ;;  %v915_v3 = vshrl.u32 %v7796_v4, %v7865_v26  ;;  %4005 = vmatprep.mubr.msk.f32.mxu1 %vm4766_vm0, %v7806_v5 }
 0x13e   : > { %v6025_v9 = vshrl.u32 %v848_v50, 30  ;;  %v910_v48 = vor.u32 %v909_v14, %v908_v25  ;;  %v913_v28 = vor.u32 %v912_v59, %v911_v47  ;;  %vm925_vm7 = vcmp.lt.s32.totalorder %v5432_v36, 3 }
 0x13f   : > { %v758_v11 = vor.u32 %v757_v8, %v756_v39  ;;  %v761_v56 = vshll.u32 %v760_v45, 23  ;;  %v916_v57 = vor.u32 %v915_v3, %v914_v29  ;;  %vm923_vm15 = vcmp.lt.s32.totalorder %v5432_v36, 1 }
 0x140   : > { %vm671_vm6 = vweird.f32 %v5132_v37  ;;  %v772_v30 = vsel %vm5994_vm10, 0, %v5986_v34  ;;  %v850_v33 = vshll.u32 %v6025_v9, 30  ;;  %v907_v12 = vshrl.u32 %v7811_v40, %v7865_v26 }
 0x141   : > { %v937_v25 = vsel %vm925_vm7, %v5459_v27, %v5531_v32  ;;  %v762_v62 = vor.u32 4788187, %v761_v56  ;;  %v765_v16 = vcvt.s32.f32 %v758_v11  ;;  %v899_v14 = vor.u32 8388608, %v898_v13 }
 0x142   : > { %vm924_vm14 = vcmp.lt.s32.totalorder %v5432_v36, 2  ;;  %vm675_vm12 = vcmp.eq.s32.totalorder %v5978_v19, 0  ;;  %vm678_vm2 = vcmp.eq.s32.totalorder %v5978_v19, 2  ;;  %v6043_v34 = vsub.s32 %v847_v61, %v850_v33 }
 0x143   : > { %v931_v20 = vsel %vm923_vm15, %v910_v48, %v913_v28  ;;  %v4534_v26 = vpop.eup %4533  ;;  %v763_v46 = vand.u32 2147483647, %v762_v62  ;;  %v928_v51 = vsel %vm926_vm1, %v916_v57, 2102212464  ;;  %v933_v27 = vsel %vm925_vm7, %v916_v57, %v5491_v17 }
 0x144   : > { %v935_v32 = vsel %vm923_vm15, %v913_v28, %v916_v57  ;;  %v4536_v47 = vpop.eup %4535  ;;  %v679_v53 = vxor.u32 2147483648, %v4534_v26  ;;  %v776_v2 = vadd.s32 3, %v772_v30  ;;  %v853_v61 = vsub.s32 0, %v6043_v34 }
 0x145   : > { %v938_v39 = vsel %vm924_vm14, %v935_v32, %v937_v25  ;;  %v676_v31 = vxor.u32 2147483648, %v4536_v47  ;;  %v766_v41 = vmul.f32 %v765_v16, %v763_v46  ;;  %v927_v50 = vsel %vm923_vm15, %v907_v12, %v910_v48  ;;  %v7866_v25 = vld [vmem:[#allocation9_spill] sm:$0xff] }
 0x146   : > { %v939_v59 = vshll.u32 %v899_v14, 8  ;;  %v680_v17 = vsel %vm678_vm2, %v679_v53, %v4536_v47  ;;  %v3650_v29 = vmin.u32 %v853_v61, %v6043_v34  ;;  %v929_v8 = vsel %vm925_vm7, %v913_v28, %v928_v51  ;;  %v7870_v47 = vld [vmem:[#allocation17_spill] sm:$0xff] }
 0x147   : > { %v934_v45 = vsel %vm924_vm14, %v931_v20, %v933_v27  ;;  %v677_v13 = vsel %vm675_vm12, %v4534_v26, %v676_v31  ;;  %v767_v3 = vxor.u32 2147483648, %v766_v41  ;;  %v6073_v57 = vand.u32 3, %v776_v2 }
 0x148   : > { %v6068_v11 = vmul.u32.u64.low %v939_v59, %v938_v39  ;;  %v6069_v56 = vmul.u32.u64.high %v939_v59, %v938_v39, %v6068_v11  ;;  %v681_v48 = vsel %vm674_vm4, %v677_v13, %v680_v17  ;;  %vm789_vm1 = vcmp.lt.s32.totalorder %v7854_v0, 0  ;;  %v7871_v39 = vld [vmem:[#allocation20_spill] sm:$0xff] }
 0x149   : > { %v855_v30 = vclz %v3650_v29  ;;  %v682_v28 = vsel %vm671_vm6, nan, %v681_v48  ;;  %v768_v33 = vsel %vm685_vm5, %v767_v3, %v766_v41  ;;  %v930_v12 = vsel %vm924_vm14, %v927_v50, %v929_v8 }
 0x14a   : > { %v995_v62 = vand.u32 2147483647, %v7866_v25  ;;  %4006 = vmatmul.mubr.f32.gmra.mrb[2].mxu1 %v682_v28  ;;  %v771_v19 = vsel %vm5994_vm10, %v7826_v21, %v768_v33  ;;  %v6086_v14 = vmul.u32.u64.low %v939_v59, %v934_v45  ;;  %v6087_v20 = vmul.u32.u64.high %v939_v59, %v934_v45, %v6086_v14 }
 0x14b   : > { %v3651_v16 = vadd.s32 4294967294, %v855_v30  ;;  %4008 = vmatprep.mubr.msk.f32.mxu1 %vm4766_vm0, %v7806_v5  ;;  %4537 = vcosq.f32 %v771_v19  ;;  %v7867_v37 = vand.u32 2147483647, %v7854_v0  ;;  %v843_v26 = vadd.s32 %v5971_v18, %v5954_v43 }
 0x14c   : > { %v873_v44 = vsub.s32 4, %v6025_v9  ;;  %4539 = vsinq.f32 %v771_v19  ;;  %v6101_v46 = vadd.s32 %v6086_v14, %v6069_v56  ;;  %vm948_vm3 = vc.u32 %v6069_v56, %v6086_v14 }
 0x14d   : > { %vm6093_vm5 = vcmp.le.f32.partialorder %v7867_v37, 0.7853982  ;;  %vm3652_vm10 = vcmp.lt.s32.totalorder %v3651_v16, 0  ;;  %v946_v27 = vmul.u32 %v939_v59, %v930_v12  ;;  %v1002_v32 = vand.u32 8388607, %v995_v62 }
 0x14e   : > { %v858_v51 = vsel %vm3652_vm10, 0, %v3651_v16  ;;  %v1012_v53 = vshll.u32 %v7811_v40, %v7870_v47  ;;  %vm779_vm4 = vcmp.eq.s32.totalorder %v6073_v57, 0  ;;  %v949_v61 = vadd.s32 1, %v6087_v20 }
 0x14f   : > { %v859_v43 = vsub.s32 32, %v858_v51  ;;  %v860_v18 = vshll.u32 %v6043_v34, %v858_v51  ;;  %v863_v2 = vsub.s32 4294967266, %v858_v51  ;;  %vm778_vm7 = vcmp.lt.s32.totalorder %v6073_v57, 2 }
 0x150   : > { %v1013_v31 = vshrl.u32 %v7821_v15, %v7871_v39  ;;  %v1015_v41 = vshll.u32 %v7821_v15, %v7870_v47  ;;  %v1016_v50 = vshrl.u32 %v7823_v52, %v7871_v39  ;;  %v1018_v59 = vshll.u32 %v7823_v52, %v7870_v47 }
 0x151   : > { %v861_v17 = vshrl.u32 %v843_v26, %v859_v43  ;;  %v864_v29 = vadd.s32 127, %v863_v2  ;;  %v950_v34 = vsel %vm948_vm3, %v949_v61, %v6087_v20  ;;  %v1019_v8 = vshrl.u32 %v7796_v4, %v7871_v39 }
 0x152   : > { %vm782_vm15 = vcmp.eq.s32.totalorder %v6073_v57, 2  ;;  %v874_v45 = vsel %vm789_vm1, %v873_v44, %v6025_v9  ;;  %v951_v13 = vadd.s32 %v950_v34, %v946_v27  ;;  %v1011_v3 = vshrl.u32 %v7811_v40, %v7871_v39  ;;  %v7873_v57 = vld [vmem:[#allocation10_spill] sm:$0xff] }
 0x153   : > { %v862_v11 = vor.u32 %v861_v17, %v860_v18  ;;  %v865_v48 = vshll.u32 %v864_v29, 23  ;;  %v1017_v30 = vor.u32 %v1016_v50, %v1015_v41  ;;  %v1020_v28 = vor.u32 %v1019_v8, %v1018_v59  ;;  %v7872_v50 = vld [vmem:[#allocation42_spill] sm:$0xff] }
 0x154   : > { %v952_v33 = vadd.s32 536870912, %v951_v13  ;;  %v1014_v56 = vor.u32 %v1013_v31, %v1012_v53  ;;  %vm1027_vm6 = vcmp.lt.s32.totalorder %v5494_v58, 1  ;;  %vm1029_vm14 = vcmp.lt.s32.totalorder %v5494_v58, 3 }
 0x155   : > { %v866_v12 = vor.u32 4788187, %v865_v48  ;;  %v869_v19 = vcvt.s32.f32 %v862_v11  ;;  %v876_v16 = vsel %vm6093_vm5, 0, %v874_v45  ;;  %v1003_v9 = vor.u32 8388608, %v1002_v32  ;;  %v4538_v14 = vpop.eup %4537 }
 0x156   : > { %v6135_v20 = vshrl.u32 %v952_v33, 30  ;;  %vm1028_vm12 = vcmp.lt.s32.totalorder %v5494_v58, 2  ;;  %v1031_v37 = vsel %vm1027_vm6, %v1011_v3, %v1014_v56  ;;  %v1032_v26 = vsel %vm1030_vm8, %v1020_v28, 2102212464  ;;  %v4540_v44 = vpop.eup %4539 }
 0x157   : > { %v783_v51 = vxor.u32 2147483648, %v4538_v14  ;;  %v867_v27 = vand.u32 2147483647, %v866_v12  ;;  %v1039_v47 = vsel %vm1027_vm6, %v1017_v30, %v1020_v28  ;;  %v1041_v32 = vsel %vm1029_vm14, %v5555_v38, %v5624_v54 }
 0x158   : > { %v780_v53 = vxor.u32 2147483648, %v4540_v44  ;;  %v954_v43 = vshll.u32 %v6135_v20, 30  ;;  %v1035_v18 = vsel %vm1027_vm6, %v1014_v56, %v1017_v30  ;;  %v1037_v2 = vsel %vm1029_vm14, %v1020_v28, %v5617_v60 }
 0x159   : > { %v784_v61 = vsel %vm782_vm15, %v783_v51, %v4540_v44  ;;  %v870_v39 = vmul.f32 %v869_v19, %v867_v27  ;;  %v1033_v31 = vsel %vm1029_vm14, %v1017_v30, %v1032_v26  ;;  %v1043_v41 = vshll.u32 %v1003_v9, 8 }
 0x15a   : > { %v6160_v38 = vshrl.u32 %v7781_v35, %v7872_v50  ;;  %v781_v54 = vsel %vm779_vm4, %v4538_v14, %v780_v53  ;;  %v6164_v59 = vsub.s32 %v951_v13, %v954_v43  ;;  %v1042_v60 = vsel %vm1028_vm12, %v1039_v47, %v1041_v32 }
 0x15b   : > { %vm775_vm8 = vweird.f32 %v7826_v21  ;;  %v785_v17 = vsel %vm778_vm7, %v781_v54, %v784_v61  ;;  %v871_v29 = vxor.u32 2147483648, %v870_v39  ;;  %v880_v34 = vadd.s32 3, %v876_v16 }
 0x15c   : > { %v786_v8 = vsel %vm775_vm8, nan, %v785_v17  ;;  %v957_v45 = vsub.s32 0, %v6164_v59  ;;  %v1034_v3 = vsel %vm1028_vm12, %v1031_v37, %v1033_v31  ;;  %v1038_v13 = vsel %vm1028_vm12, %v1035_v18, %v1037_v2 }
 0x15d   : > { %4009 = vmatmul.mubr.f32.gmra.mrb[4].mxu1 %v786_v8  ;;  %v872_v11 = vsel %vm789_vm1, %v871_v29, %v870_v39  ;;  %v6178_v48 = vmul.u32.u64.low %v1043_v41, %v1042_v60  ;;  %v6179_v21 = vmul.u32.u64.high %v1043_v41, %v1042_v60, %v6178_v48  ;;  %v1099_v30 = vand.u32 2147483647, %v7873_v57 }
 0x15e   : > { %v6184_v28 = vshll.u32 %v7796_v4, %v5503_v7  ;;  %4011 = vmatprep.mubr.msk.f32.mxu1 %vm4766_vm0, %v7806_v5  ;;  %v875_v58 = vsel %vm6093_vm5, %v7854_v0, %v872_v11  ;;  %vm893_vm2 = vcmp.lt.s32.totalorder %v7860_v22, 0  ;;  %v3654_v33 = vmin.u32 %v957_v45, %v6164_v59 }
 0x15f   : > { %4541 = vcosq.f32 %v875_v58  ;;  %v6193_v56 = vand.u32 3, %v880_v34  ;;  %v6195_v12 = vmul.u32.u64.low %v1043_v41, %v1038_v13  ;;  %v6196_v19 = vmul.u32.u64.high %v1043_v41, %v1038_v13, %v6195_v12 }
 0x160   : > { %4543 = vsinq.f32 %v875_v58  ;;  %v959_v16 = vclz %v3654_v33  ;;  %v977_v9 = vsub.s32 4, %v6135_v20  ;;  %v1050_v14 = vmul.u32 %v1043_v41, %v1034_v3  ;;  %v7877_v58 = vld [vmem:[#allocation56_spill] sm:$0xff] }
 0x161   : > { %v6200_v37 = vadd.s32 %v6195_v12, %v6179_v21  ;;  %vm1052_vm1 = vc.u32 %v6179_v21, %v6195_v12  ;;  %v1106_v36 = vand.u32 8388607, %v1099_v30  ;;  %v1115_v26 = vshrl.u32 %v7811_v40, %v5295_v63  ;;  %v7876_v21 = vld [vmem:[#allocation7_spill] sm:$0xff] }
 0x162   : > { %v3655_v44 = vadd.s32 4294967294, %v959_v16  ;;  %v1116_v51 = vshll.u32 %v7811_v40, %v5280_v23  ;;  %v1117_v27 = vshrl.u32 %v7821_v15, %v5295_v63  ;;  %v1119_v47 = vshll.u32 %v7821_v15, %v5280_v23 }
 0x163   : > { %vm886_vm5 = vcmp.eq.s32.totalorder %v6193_v56, 2  ;;  %v1053_v32 = vadd.s32 1, %v6196_v19  ;;  %v1120_v53 = vshrl.u32 %v7823_v52, %v5295_v63  ;;  %v1122_v43 = vshll.u32 %v7823_v52, %v5280_v23 }
 0x164   : > { %v1123_v18 = vshrl.u32 %v7796_v4, %v5295_v63  ;;  %vm883_vm10 = vcmp.eq.s32.totalorder %v6193_v56, 0  ;;  %vm3656_vm3 = vcmp.lt.s32.totalorder %v3655_v44, 0  ;;  %v978_v2 = vsel %vm893_vm2, %v977_v9, %v6135_v20 }
 0x165   : > { %v1118_v61 = vor.u32 %v1117_v27, %v1116_v51  ;;  %vm1131_vm4 = vcmp.lt.s32.totalorder %v5587_v10, 1  ;;  %vm882_vm7 = vcmp.lt.s32.totalorder %v6193_v56, 2  ;;  %vm6229_vm15 = vcmp.le.f32.partialorder %v891_v49, 0.7853982 }
 0x166   : > { %v962_v23 = vsel %vm3656_vm3, 0, %v3655_v44  ;;  %v1054_v63 = vsel %vm1052_vm1, %v1053_v32, %v6196_v19  ;;  %v1121_v31 = vor.u32 %v1120_v53, %v1119_v47  ;;  %v1124_v41 = vor.u32 %v1123_v18, %v1122_v43 }
 0x167   : > { %vm879_vm6 = vweird.f32 %v7854_v0  ;;  %v963_v20 = vsub.s32 32, %v962_v23  ;;  %v964_v54 = vshll.u32 %v6164_v59, %v962_v23  ;;  %v967_v60 = vsub.s32 4294967266, %v962_v23 }
 0x168   : > { %v1055_v17 = vadd.s32 %v1054_v63, %v1050_v14  ;;  %vm1446_vm14 = vcmp.lt.s32.totalorder %v5733_v55, 4  ;;  %v1107_v49 = vor.u32 8388608, %v1106_v36  ;;  %vm1132_vm12 = vcmp.lt.s32.totalorder %v5587_v10, 2 }
 0x169   : > { %vm1133_vm8 = vcmp.lt.s32.totalorder %v5587_v10, 3  ;;  %v1135_v29 = vsel %vm1131_vm4, %v1115_v26, %v1118_v61  ;;  %v965_v34 = vshrl.u32 %v6101_v46, %v963_v20  ;;  %v968_v8 = vadd.s32 127, %v967_v60  ;;  %v4542_v59 = vpop.eup %4541  ;;  %v7878_v20 = vld [vmem:[#allocation47_spill] sm:$0xff] }
 0x16a   : > { %v1056_v45 = vadd.s32 536870912, %v1055_v17  ;;  %v1139_v3 = vsel %vm1131_vm4, %v1118_v61, %v1121_v31  ;;  %v1136_v13 = vsel %vm1134_vm9, %v1124_v41, 2102212464  ;;  %v1141_v11 = vsel %vm1133_vm8, %v1124_v41, %v5716_v1  ;;  %v4544_v33 = vpop.eup %4543 }
 0x16b   : > { %v1143_v48 = vsel %vm1131_vm4, %v1121_v31, %v1124_v41  ;;  %v1145_v46 = vsel %vm1133_vm8, %v7877_v58, %v7876_v21  ;;  %v887_v12 = vxor.u32 2147483648, %v4542_v59  ;;  %v966_v19 = vor.u32 %v965_v34, %v964_v54 }
 0x16c   : > { %v969_v16 = vshll.u32 %v968_v8, 23  ;;  %v1057_v9 = vshrl.u32 %v1056_v45, 30  ;;  %v884_v14 = vxor.u32 2147483648, %v4544_v33  ;;  %v1142_v36 = vsel %vm1132_vm12, %v1139_v3, %v1141_v11 }
 0x16d   : > { %v1146_v1 = vsel %vm1132_vm12, %v1143_v48, %v1145_v46  ;;  %v1147_v26 = vshll.u32 %v1107_v49, 8  ;;  %v888_v44 = vsel %vm886_vm5, %v887_v12, %v4544_v33  ;;  %v973_v27 = vcvt.s32.f32 %v966_v19  ;;  %v7882_v12 = vld [vmem:[#allocation14_spill] sm:$0xff] }
 0x16e   : > { %v970_v51 = vor.u32 4788187, %v969_v16  ;;  %v1058_v47 = vshll.u32 %v1057_v9, 30  ;;  %v885_v32 = vsel %vm883_vm10, %v4542_v59, %v884_v14  ;;  %v1137_v53 = vsel %vm1133_vm8, %v1121_v31, %v1136_v13  ;;  %v7879_v59 = vld [vmem:[#allocation46_spill] sm:$0xff]  ;;  %v7883_v16 = vld [vmem:[#allocation24_spill] sm:$0xff] }
 0x16f   : > { %v6267_v43 = vmul.u32.u64.low %v1147_v26, %v1146_v1  ;;  %v6268_v18 = vmul.u32.u64.high %v1147_v26, %v1146_v1, %v6267_v43  ;;  %v889_v61 = vsel %vm882_vm7, %v885_v32, %v888_v44  ;;  %v980_v63 = vsel %vm6229_vm15, 0, %v978_v2  ;;  %v7884_v1 = vld [vmem:[#allocation26_spill] sm:$0xff] }
 0x170   : > { %v971_v23 = vand.u32 2147483647, %v970_v51  ;;  %v6274_v41 = vsub.s32 %v1055_v17, %v1058_v47  ;;  %v1646_v54 = vshrl.u32 %v7781_v35, %v7878_v20  ;;  %v890_v60 = vsel %vm879_vm6, nan, %v889_v61 }
 0x171   : > { %v6280_v49 = vmul.u32.u64.low %v1147_v26, %v1142_v36  ;;  %v6281_v31 = vmul.u32.u64.high %v1147_v26, %v1142_v36, %v6280_v49  ;;  %4012 = vmatmul.mubr.f32.gmra.mrb[6].mxu1 %v890_v60  ;;  %v1081_v8 = vsub.s32 4, %v1057_v9  ;;  %v1138_v45 = vsel %vm1132_vm12, %v1135_v29, %v1137_v53 }
 0x172   : > { %v974_v34 = vmul.f32 %v973_v27, %v971_v23  ;;  %v1061_v56 = vsub.s32 0, %v6274_v41  ;;  %4014 = vmatprep.mubr.msk.f32.mxu1 %vm4766_vm0, %v7806_v5  ;;  %v984_v2 = vadd.s32 3, %v980_v63  ;;  %vm997_vm9 = vcmp.lt.s32.totalorder %v7866_v25, 0 }
 0x173   : > { %v6290_v0 = vadd.s32 %v6280_v49, %v6268_v18  ;;  %vm1156_vm1 = vc.u32 %v6268_v18, %v6280_v49  ;;  %v6296_v17 = vsel %vm1446_vm14, %v5960_v6, 920167782  ;;  %v6300_v10 = vor.u32 %v6160_v38, %v5964_v24 }
 0x174   : > { %v975_v29 = vxor.u32 2147483648, %v974_v34  ;;  %v3658_v3 = vmin.u32 %v1061_v56, %v6274_v41  ;;  %v6304_v13 = vshrl.u32 %v7879_v59, 5  ;;  %v6307_v11 = vor.u32 %v1646_v54, %v6184_v28 }
 0x175   : > { %v1154_v48 = vmul.u32 %v1147_v26, %v1138_v45  ;;  %v1157_v21 = vadd.s32 1, %v6281_v31  ;;  %vm6314_vm5 = vcmp.le.f32.partialorder %v995_v62, 0.7853982  ;;  %v1082_v46 = vsel %vm997_vm9, %v1081_v8, %v1057_v9  ;;  %v7886_v45 = vld [vmem:[#allocation30_spill] sm:$0xff] }
 0x176   : > { %v976_v58 = vsel %vm893_vm2, %v975_v29, %v974_v34  ;;  %v1063_v38 = vclz %v3658_v3  ;;  %v6323_v33 = vand.u32 3, %v984_v2  ;;  %v1203_v19 = vand.u32 2147483647, %v7882_v12  ;;  %v7885_v34 = vld [vmem:[#allocation54_spill] sm:$0xff] }
 0x177   : > { %v979_v28 = vsel %vm6229_vm15, %v7860_v22, %v976_v58  ;;  %v1220_v14 = vshll.u32 %v7811_v40, %v7883_v16  ;;  %v1158_v36 = vsel %vm1156_vm1, %v1157_v21, %v6281_v31  ;;  %v1221_v9 = vshrl.u32 %v7821_v15, %v7884_v1  ;;  %v7887_v2 = vld [vmem:[#allocation58_spill] sm:$0xff] }
 0x178   : > { %4545 = vcosq.f32 %v979_v28  ;;  %v3659_v62 = vadd.s32 4294967294, %v1063_v38  ;;  %v1084_v39 = vsel %vm6314_vm5, 0, %v1082_v46  ;;  %v1159_v26 = vadd.s32 %v1158_v36, %v1154_v48  ;;  %v7888_v46 = vld [vmem:[#allocation23_spill] sm:$0xff] }
 0x179   : > { %4547 = vsinq.f32 %v979_v28  ;;  %v1223_v44 = vshll.u32 %v7821_v15, %v7883_v16  ;;  %v1224_v51 = vshrl.u32 %v7823_v52, %v7884_v1  ;;  %v1226_v27 = vshll.u32 %v7823_v52, %v7883_v16 }
 0x17a   : > { %vm3660_vm2 = vcmp.lt.s32.totalorder %v3659_v62, 0  ;;  %v1227_v47 = vshrl.u32 %v7796_v4, %v7884_v1  ;;  %vm987_vm10 = vcmp.eq.s32.totalorder %v6323_v33, 0  ;;  %v1160_v53 = vadd.s32 536870912, %v1159_v26 }
 0x17b   : > { %v1066_v32 = vsel %vm3660_vm2, 0, %v3659_v62  ;;  %v1210_v43 = vand.u32 8388607, %v1203_v19  ;;  %v1219_v18 = vshrl.u32 %v7811_v40, %v7884_v1  ;;  %vm986_vm3 = vcmp.lt.s32.totalorder %v6323_v33, 2 }
 0x17c   : > { %v1067_v61 = vsub.s32 32, %v1066_v32  ;;  %v1068_v23 = vshll.u32 %v6274_v41, %v1066_v32  ;;  %v1071_v63 = vsub.s32 4294967266, %v1066_v32  ;;  %v1222_v54 = vor.u32 %v1221_v9, %v1220_v14 }
 0x17d   : > { %v1161_v60 = vshrl.u32 %v1160_v53, 30  ;;  %v1225_v49 = vor.u32 %v1224_v51, %v1223_v44  ;;  %v1228_v31 = vor.u32 %v1227_v47, %v1226_v27  ;;  %vm1237_vm4 = vcmp.lt.s32.totalorder %v7885_v34, 3 }
 0x17e   : > { %v1069_v56 = vshrl.u32 %v6200_v37, %v1067_v61  ;;  %v1072_v8 = vadd.s32 127, %v1071_v63  ;;  %vm1235_vm7 = vcmp.lt.s32.totalorder %v7885_v34, 1  ;;  %v1249_v29 = vsel %vm1237_vm4, %v7887_v2, %v7886_v45  ;;  %v7889_v63 = vld [vmem:[#allocation15_spill] sm:$0xff] }
 0x17f   : > { %vm990_vm15 = vcmp.eq.s32.totalorder %v6323_v33, 2  ;;  %v1162_v41 = vshll.u32 %v1161_v60, 30  ;;  %v1211_v3 = vor.u32 8388608, %v1210_v43  ;;  %v1240_v59 = vsel %vm1238_vm11, %v1228_v31, 2102212464 }
 0x180   : > { %v1070_v48 = vor.u32 %v1069_v56, %v1068_v23  ;;  %v1073_v21 = vshll.u32 %v1072_v8, 23  ;;  %v1088_v58 = vadd.s32 3, %v1084_v39  ;;  %vm1236_vm6 = vcmp.lt.s32.totalorder %v7885_v34, 2 }
 0x181   : > { %v6361_v37 = vsub.s32 %v1159_v26, %v1162_v41  ;;  %v1243_v38 = vsel %vm1235_vm7, %v1222_v54, %v1225_v49  ;;  %v1245_v28 = vsel %vm1237_vm4, %v1228_v31, %v7888_v46  ;;  %v1247_v16 = vsel %vm1235_vm7, %v1225_v49, %v1228_v31 }
 0x182   : > { %v4546_v14 = vpop.eup %4545  ;;  %v1074_v62 = vor.u32 4788187, %v1073_v21  ;;  %v1077_v36 = vcvt.s32.f32 %v1070_v48  ;;  %v1239_v1 = vsel %vm1235_vm7, %v1219_v18, %v1222_v54  ;;  %v1241_v9 = vsel %vm1237_vm4, %v1225_v49, %v1240_v59 }
 0x183   : > { %v4548_v39 = vpop.eup %4547  ;;  %v991_v26 = vxor.u32 2147483648, %v4546_v14  ;;  %v1165_v44 = vsub.s32 0, %v6361_v37  ;;  %v1250_v51 = vsel %vm1236_vm6, %v1247_v16, %v1249_v29  ;;  %v1251_v27 = vshll.u32 %v1211_v3, 8 }
 0x184   : > { %v988_v47 = vxor.u32 2147483648, %v4548_v39  ;;  %v1075_v32 = vand.u32 2147483647, %v1074_v62  ;;  %v1185_v53 = vsub.s32 4, %v1161_v60  ;;  %v1246_v43 = vsel %vm1236_vm6, %v1243_v38, %v1245_v28  ;;  %v7890_v38 = vld [vmem:[#allocation32_spill] sm:$0xff] }
 0x185   : > { %v992_v18 = vsel %vm990_vm15, %v991_v26, %v4548_v39  ;;  %v3662_v61 = vmin.u32 %v1165_v44, %v6361_v37  ;;  %v1242_v23 = vsel %vm1236_vm6, %v1239_v1, %v1241_v9  ;;  %v1307_v54 = vand.u32 2147483647, %v7889_v63 }
 0x186   : > { %v989_v49 = vsel %vm987_vm10, %v4546_v14, %v988_v47  ;;  %v1078_v31 = vmul.f32 %v1077_v36, %v1075_v32  ;;  %v6387_v56 = vmul.u32.u64.low %v1251_v27, %v1250_v51  ;;  %v6388_v8 = vmul.u32.u64.high %v1251_v27, %v1250_v51, %v6387_v56 }
 0x187   : > { %vm983_vm11 = vweird.f32 %v7860_v22  ;;  %v993_v45 = vsel %vm986_vm3, %v989_v49, %v992_v18  ;;  %vm1101_vm12 = vcmp.lt.s32.totalorder %v7873_v57, 0  ;;  %v1167_v2 = vclz %v3662_v61  ;;  %v7894_v61 = vld [vmem:[#allocation57_spill] sm:$0xff] }
 0x188   : > { %v994_v29 = vsel %vm983_vm11, nan, %v993_v45  ;;  %v1079_v34 = vxor.u32 2147483648, %v1078_v31  ;;  %v6394_v41 = vand.u32 3, %v1088_v58  ;;  %v6398_v3 = vsel %vm1101_vm12, %v1185_v53, %v1161_v60  ;;  %v7891_v60 = vld [vmem:[#allocation28_spill] sm:$0xff] }
 0x189   : > { %4015 = vmatmul.mubr.f32.gmra.mrb[8].mxu1 %v994_v29  ;;  %v3663_v59 = vadd.s32 4294967294, %v1167_v2  ;;  %v6400_v48 = vmul.u32.u64.low %v1251_v27, %v1246_v43  ;;  %v6401_v21 = vmul.u32.u64.high %v1251_v27, %v1246_v43, %v6400_v48  ;;  %v1258_v22 = vmul.u32 %v1251_v27, %v1242_v23 }
 0x18a   : > { %4017 = vmatprep.mubr.msk.f32.mxu1 %vm4766_vm0, %v7806_v5  ;;  %v1080_v33 = vsel %vm997_vm9, %v1079_v34, %v1078_v31  ;;  %v1314_v58 = vand.u32 8388607, %v1307_v54  ;;  %v1323_v46 = vshrl.u32 %v7811_v40, %v7890_v38  ;;  %v1324_v28 = vshll.u32 %v7811_v40, %v7891_v60 }
 0x18b   : > { %v1083_v16 = vsel %vm6314_vm5, %v7866_v25, %v1080_v33  ;;  %vm3664_vm8 = vcmp.lt.s32.totalorder %v3663_v59, 0  ;;  %v6417_v14 = vadd.s32 %v6400_v48, %v6388_v8  ;;  %vm1260_vm1 = vc.u32 %v6388_v8, %v6400_v48  ;;  %v7895_v48 = vld [vmem:[#allocation6_spill] sm:$0xff] }
 0x18c   : > { %4549 = vcosq.f32 %v1083_v16  ;;  %v1170_v62 = vsel %vm3664_vm8, 0, %v3663_v59  ;;  %v1315_v36 = vor.u32 8388608, %v1314_v58  ;;  %v1325_v1 = vshrl.u32 %v7821_v15, %v7890_v38 }
 0x18d   : > { %4551 = vsinq.f32 %v1083_v16  ;;  %vm6424_vm9 = vcmp.le.f32.partialorder %v1099_v30, 0.7853982  ;;  %v1171_v24 = vsub.s32 32, %v1170_v62  ;;  %v1172_v39 = vshll.u32 %v6361_v37, %v1170_v62 }
 0x18e   : > { %v1175_v26 = vsub.s32 4294967266, %v1170_v62  ;;  %v1261_v44 = vadd.s32 1, %v6401_v21  ;;  %v1326_v51 = vor.u32 %v1325_v1, %v1324_v28  ;;  %v1327_v27 = vshll.u32 %v7821_v15, %v7891_v60 }
 0x18f   : > { %v1328_v47 = vshrl.u32 %v7823_v52, %v7890_v38  ;;  %v1173_v32 = vshrl.u32 %v6290_v0, %v1171_v24  ;;  %v1330_v30 = vshll.u32 %v7823_v52, %v7891_v60  ;;  %v1331_v43 = vshrl.u32 %v7796_v4, %v7890_v38  ;;  %v7897_v38 = vld [vmem:[#allocation21_spill] sm:$0xff] }
 0x190   : > { %v1176_v53 = vadd.s32 127, %v1175_v26  ;;  %v1262_v37 = vsel %vm1260_vm1, %v1261_v44, %v6401_v21  ;;  %vm1339_vm5 = vcmp.lt.s32.totalorder %v7894_v61, 1  ;;  %vm1340_vm2 = vcmp.lt.s32.totalorder %v7894_v61, 2 }
 0x191   : > { %v1329_v18 = vor.u32 %v1328_v47, %v1327_v27  ;;  %v1174_v23 = vor.u32 %v1173_v32, %v1172_v39  ;;  %v1263_v31 = vadd.s32 %v1262_v37, %v1258_v22  ;;  %v1332_v0 = vor.u32 %v1331_v43, %v1330_v30  ;;  %v7896_v22 = vld [vmem:[#allocation16_spill] sm:$0xff] }
 0x192   : > { %v1177_v49 = vshll.u32 %v1176_v53, 23  ;;  %vm1341_vm10 = vcmp.lt.s32.totalorder %v7894_v61, 3  ;;  %v1343_v56 = vsel %vm1339_vm5, %v1323_v46, %v1326_v51  ;;  %v1355_v2 = vshll.u32 %v1315_v36, 8  ;;  %v7898_v46 = vld [vmem:[#allocation22_spill] sm:$0xff] }
 0x193   : > { %v1347_v45 = vsel %vm1339_vm5, %v1326_v51, %v1329_v18  ;;  %vm1087_vm3 = vweird.f32 %v7866_v25  ;;  %v1181_v29 = vcvt.s32.f32 %v1174_v23  ;;  %v1264_v34 = vadd.s32 536870912, %v1263_v31 }
 0x194   : > { %v1178_v8 = vor.u32 4788187, %v1177_v49  ;;  %v1344_v59 = vsel %vm1342_vm13, %v1332_v0, 2102212464  ;;  %vm1550_vm4 = vcmp.lt.s32.totalorder %v7895_v48, 4  ;;  %v1349_v33 = vsel %vm1341_vm10, %v1332_v0, %v7896_v22 }
 0x195   : > { %v1345_v21 = vsel %vm1341_vm10, %v1329_v18, %v1344_v59  ;;  %v1351_v58 = vsel %vm1339_vm5, %v1329_v18, %v1332_v0  ;;  %v1353_v60 = vsel %vm1341_vm10, %v7898_v46, %v7897_v38  ;;  %vm1654_vm7 = vcmp.lt.s32.totalorder %v6304_v13, 4 }
 0x196   : > { %vm1090_vm15 = vcmp.lt.s32.totalorder %v6394_v41, 2  ;;  %v1179_v28 = vand.u32 2147483647, %v1178_v8  ;;  %v1265_v16 = vshrl.u32 %v1264_v34, 30  ;;  %v1350_v62 = vsel %vm1340_vm2, %v1347_v45, %v1349_v33  ;;  %v4550_v36 = vpop.eup %4549  ;;  %v7900_v33 = vld [vmem:[#allocation40_spill] sm:$0xff] }
 0x197   : > { %v1188_v1 = vsel %vm6424_vm9, 0, %v6398_v3  ;;  %v1354_v24 = vsel %vm1340_vm2, %v1351_v58, %v1353_v60  ;;  %v6467_v39 = vmul.u32.u64.low %v1355_v2, %v1350_v62  ;;  %v6468_v26 = vmul.u32.u64.high %v1355_v2, %v1350_v62, %v6467_v39  ;;  %v4552_v44 = vpop.eup %4551  ;;  %v7901_v58 = vld [vmem:[#allocation39_spill] sm:$0xff] }
 0x198   : > { %v1095_v51 = vxor.u32 2147483648, %v4550_v36  ;;  %v1182_v27 = vmul.f32 %v1181_v29, %v1179_v28  ;;  %v1266_v47 = vshll.u32 %v1265_v16, 30  ;;  %v1346_v32 = vsel %vm1340_vm2, %v1343_v56, %v1345_v21  ;;  %v7899_v21 = vld [vmem:[#allocation18_spill] sm:$0xff]  ;;  %v7903_v28 = vld [vmem:[#allocation45_spill] sm:$0xff]  ;;  %v7904_v62 = vld [vmem:[#allocation43_spill] sm:$0xff] }
 0x199   : > { %v1092_v53 = vxor.u32 2147483648, %v4552_v44  ;;  %vm1094_vm13 = vcmp.eq.s32.totalorder %v6394_v41, 2  ;;  %v6473_v30 = vmul.u32.u64.low %v1355_v2, %v1354_v24  ;;  %v6474_v43 = vmul.u32.u64.high %v1355_v2, %v1354_v24, %v6473_v30 }
 0x19a   : > { %vm1091_vm6 = vcmp.eq.s32.totalorder %v6394_v41, 0  ;;  %v1096_v3 = vsel %vm1094_vm13, %v1095_v51, %v4552_v44  ;;  %v1183_v37 = vxor.u32 2147483648, %v1182_v27  ;;  %v6477_v18 = vsub.s32 %v1263_v31, %v1266_v47 }
 0x19b   : > { %v1093_v23 = vsel %vm1091_vm6, %v4550_v36, %v1092_v53  ;;  %v1192_v49 = vadd.s32 3, %v1188_v1  ;;  %v1362_v0 = vmul.u32 %v1355_v2, %v1346_v32  ;;  %v1365_v45 = vadd.s32 1, %v6468_v26  ;;  %v7908_v32 = vld [vmem:[#allocation35_spill] sm:$0xff] }
 0x19c   : > { %v1097_v61 = vsel %vm1090_vm15, %v1093_v23, %v1096_v3  ;;  %v1184_v56 = vsel %vm1101_vm12, %v1183_v37, %v1182_v27  ;;  %v1269_v8 = vsub.s32 0, %v6477_v18  ;;  %v1289_v29 = vsub.s32 4, %v1265_v16 }
 0x19d   : > { %v1098_v34 = vsel %vm1087_vm3, nan, %v1097_v61  ;;  %v1187_v31 = vsel %vm6424_vm9, %v7873_v57, %v1184_v56  ;;  %v6491_v2 = vadd.s32 %v6467_v39, %v6474_v43  ;;  %vm1364_vm11 = vc.u32 %v6474_v43, %v6467_v39 }
 0x19e   : > { %4018 = vmatmul.mubr.f32.gmra.mrb[10].mxu1 %v1098_v34  ;;  %4553 = vcosq.f32 %v1187_v31  ;;  %v3666_v41 = vmin.u32 %v1269_v8, %v6477_v18  ;;  %v1366_v59 = vsel %vm1364_vm11, %v1365_v45, %v6468_v26  ;;  %v1411_v22 = vand.u32 2147483647, %v7899_v21 }
 0x19f   : > { %4020 = vmatprep.mubr.msk.f32.mxu1 %vm4766_vm0, %v7806_v5  ;;  %4555 = vsinq.f32 %v1187_v31  ;;  %v6499_v25 = vand.u32 3, %v1192_v49  ;;  %vm1205_vm12 = vcmp.lt.s32.totalorder %v7882_v12, 0  ;;  %v1367_v9 = vadd.s32 %v1366_v59, %v1362_v0 }
 0x1a0   : > { %v7902_v38 = vor.u32 %v7900_v33, %v7901_v58  ;;  %v6512_v60 = vsel %vm1550_vm4, %v6300_v10, 920167782  ;;  %v7905_v36 = vor.u32 %v7903_v28, %v7904_v62  ;;  %v1271_v24 = vclz %v3666_v41 }
 0x1a1   : > { %v6524_v39 = vsel %vm1654_vm7, %v6307_v11, 920167782  ;;  %vm6528_vm8 = vcmp.le.f32.partialorder %v1203_v19, 0.7853982  ;;  %v1368_v44 = vadd.s32 536870912, %v1367_v9  ;;  %v1290_v27 = vsel %vm1205_vm12, %v1289_v29, %v1265_v16  ;;  %v7909_v19 = vld [vmem:[#allocation38_spill] sm:$0xff] }
 0x1a2   : > { %v6507_v46 = vsel %vm1446_vm14, %v7902_v38, 1326507024  ;;  %v6519_v1 = vsel %vm1550_vm4, %v7905_v36, 1326507024  ;;  %v3667_v51 = vadd.s32 4294967294, %v1271_v24  ;;  %v1428_v53 = vshll.u32 %v7811_v40, %v7908_v32 }
 0x1a3   : > { %v6536_v47 = vand.u32 8388607, %v1411_v22  ;;  %vm1195_vm1 = vcmp.eq.s32.totalorder %v6499_v25, 0  ;;  %v6541_v30 = vshrl.u32 %v1368_v44, 30  ;;  %v1429_v43 = vshrl.u32 %v7821_v15, %v7909_v19 }
 0x1a4   : > { %v1431_v3 = vshll.u32 %v7821_v15, %v7908_v32  ;;  %v1432_v16 = vshrl.u32 %v7823_v52, %v7909_v19  ;;  %vm1194_vm9 = vcmp.lt.s32.totalorder %v6499_v25, 2  ;;  %vm1198_vm5 = vcmp.eq.s32.totalorder %v6499_v25, 2 }
 0x1a5   : > { %vm3668_vm2 = vcmp.lt.s32.totalorder %v3667_v51, 0  ;;  %v1434_v37 = vshll.u32 %v7823_v52, %v7908_v32  ;;  %v1435_v23 = vshrl.u32 %v7796_v4, %v7909_v19  ;;  %vm1191_vm10 = vweird.f32 %v7873_v57 }
 0x1a6   : > { %v1274_v49 = vsel %vm3668_vm2, 0, %v3667_v51  ;;  %v1292_v0 = vsel %vm6528_vm8, 0, %v1290_v27  ;;  %vm1309_vm3 = vcmp.lt.s32.totalorder %v7889_v63, 0  ;;  %v1370_v45 = vshll.u32 %v6541_v30, 30 }
 0x1a7   : > { %v1275_v61 = vsub.s32 32, %v1274_v49  ;;  %v1276_v56 = vshll.u32 %v6477_v18, %v1274_v49  ;;  %v1279_v8 = vsub.s32 4294967266, %v1274_v49  ;;  %v1427_v29 = vshrl.u32 %v7811_v40, %v7909_v19 }
 0x1a8   : > { %v6563_v34 = vsub.s32 %v1367_v9, %v1370_v45  ;;  %v1419_v31 = vor.u32 8388608, %v6536_v47  ;;  %v1430_v41 = vor.u32 %v1429_v43, %v1428_v53  ;;  %v1433_v59 = vor.u32 %v1432_v16, %v1431_v3  ;;  %v4554_v33 = vpop.eup %4553  ;;  %v6579_v47 = vpop.f32.mrb[0].mxu0 }
 0x1a9   : > { %v1277_v58 = vshrl.u32 %v6417_v14, %v1275_v61  ;;  %v1280_v38 = vadd.s32 127, %v1279_v8  ;;  %v1436_v28 = vor.u32 %v1435_v23, %v1434_v37  ;;  %vm1443_vm15 = vcmp.lt.s32.totalorder %v5733_v55, 1  ;;  %v4556_v62 = vpop.eup %4555  ;;  %v3933_v19 = vpop.f32.mrb[1].mxu0 }
 0x1aa   : > { %v1199_v36 = vxor.u32 2147483648, %v4554_v33  ;;  %vm6570_vm13 = vcmp.le.f32.partialorder %v1307_v54, 0.7853982  ;;  %v1373_v9 = vsub.s32 0, %v6563_v34  ;;  %v1393_v24 = vsub.s32 4, %v6541_v30 }
 0x1ab   : > { %vm1445_vm6 = vcmp.lt.s32.totalorder %v5733_v55, 3  ;;  %v1196_v44 = vxor.u32 2147483648, %v4556_v62  ;;  %v1278_v14 = vor.u32 %v1277_v58, %v1276_v56  ;;  %v1281_v51 = vshll.u32 %v1280_v38, 23  ;;  %v6598_v56 = vpop.f32.mrb[2].mxu0 }
 0x1ac   : > { %v1448_v27 = vsel %vm1446_vm14, %v1436_v28, 2102212464  ;;  %v1200_v54 = vsel %vm1198_vm5, %v1199_v36, %v4556_v62  ;;  %v3670_v32 = vmin.u32 %v1373_v9, %v6563_v34  ;;  %vm1444_vm11 = vcmp.lt.s32.totalorder %v5733_v55, 2  ;;  %v3936_v38 = vpop.f32.mrb[3].mxu0 }
 0x1ad   : > { %v1451_v53 = vsel %vm1443_vm15, %v1430_v41, %v1433_v59  ;;  %v1197_v43 = vsel %vm1195_vm1, %v4554_v33, %v1196_v44  ;;  %v1282_v3 = vor.u32 4788187, %v1281_v51  ;;  %v1285_v16 = vcvt.s32.f32 %v1278_v14 }
 0x1ae   : > { %v1453_v37 = vsel %vm1445_vm6, %v1436_v28, %v6296_v17  ;;  %v1201_v23 = vsel %vm1194_vm9, %v1197_v43, %v1200_v54  ;;  %v1375_v49 = vclz %v3670_v32  ;;  %v1447_v45 = vsel %vm1443_vm15, %v1427_v29, %v1430_v41  ;;  %v7914_v54 = vld [vmem:[#allocation48_spill] sm:$0xff] }
 0x1af   : > { %v1449_v61 = vsel %vm1445_vm6, %v1433_v59, %v1448_v27  ;;  %v1202_v8 = vsel %vm1191_vm10, nan, %v1201_v23  ;;  %v1283_v33 = vand.u32 2147483647, %v1282_v3  ;;  %v1296_v58 = vadd.s32 3, %v1292_v0 }
 0x1b0   : > { %v1454_v17 = vsel %vm1444_vm11, %v1451_v53, %v1453_v37  ;;  %4021 = vmatmul.mubr.f32.gmra.mrb[12].mxu1 %v1202_v8  ;;  %v3671_v25 = vadd.s32 4294967294, %v1375_v49  ;;  %v1455_v62 = vsel %vm1443_vm15, %v1433_v59, %v1436_v28  ;;  %v1457_v29 = vsel %vm1445_vm6, %v5960_v6, %v6507_v46  ;;  %v7912_v6 = vld [vmem:[#allocation19_spill] sm:$0xff] }
 0x1b1   : > { %v1459_v41 = vshll.u32 %v1419_v31, 8  ;;  %4023 = vmatprep.mubr.msk.f32.mxu1 %vm4766_vm0, %v7806_v5  ;;  %v1286_v57 = vmul.f32 %v1285_v16, %v1283_v33  ;;  %v1394_v0 = vsel %vm1309_vm3, %v1393_v24, %v6541_v30  ;;  %v1450_v36 = vsel %vm1444_vm11, %v1447_v45, %v1449_v61  ;;  %v6623_v31 = vpop.f32.mrb[4].mxu0  ;;  %v7913_v24 = vld [vmem:[#allocation49_spill] sm:$0xff] }
 0x1b2   : > { %v1458_v59 = vsel %vm1444_vm11, %v1455_v62, %v1457_v29  ;;  %vm3672_vm14 = vcmp.lt.s32.totalorder %v3671_v25, 0  ;;  %v1515_v46 = vand.u32 2147483647, %v7912_v6  ;;  %v3939_v30 = vpop.f32.mrb[5].mxu0  ;;  %v7915_v32 = vor.u32 %v7913_v24, %v7914_v54 }
 0x1b3   : > { %v6619_v28 = vmul.u32.u64.low %v1459_v41, %v1458_v59  ;;  %v6620_v9 = vmul.u32.u64.high %v1459_v41, %v1458_v59, %v6619_v28  ;;  %v1287_v44 = vxor.u32 2147483648, %v1286_v57  ;;  %v1378_v14 = vsel %vm3672_vm14, 0, %v3671_v25 }
 0x1b4   : > { %v6625_v51 = vmul.u32.u64.low %v1459_v41, %v1454_v17  ;;  %v6626_v27 = vmul.u32.u64.high %v1459_v41, %v1454_v17, %v6625_v51  ;;  %v6633_v55 = vsel %vm1654_vm7, %v7915_v32, 1326507024  ;;  %v1379_v53 = vsub.s32 32, %v1378_v14 }
 0x1b5   : > { %v1380_v19 = vshll.u32 %v6563_v34, %v1378_v14  ;;  %v1383_v43 = vsub.s32 4294967266, %v1378_v14  ;;  %v1288_v3 = vsel %vm1205_vm12, %v1287_v44, %v1286_v57  ;;  %v6638_v16 = vand.u32 3, %v1296_v58  ;;  %v6649_v34 = vpop.f32.mrb[6].mxu0 }
 0x1b6   : > { %v1396_v37 = vsel %vm6570_vm13, 0, %v1394_v0  ;;  %v1466_v23 = vmul.u32 %v1459_v41, %v1450_v36  ;;  %v1291_v49 = vsel %vm6528_vm8, %v7882_v12, %v1288_v3  ;;  %v1381_v45 = vshrl.u32 %v6491_v2, %v1379_v53  ;;  %v3942_v17 = vpop.f32.mrb[7].mxu0 }
 0x1b7   : > { %v1384_v61 = vadd.s32 127, %v1383_v43  ;;  %v6647_v8 = vadd.s32 %v6625_v51, %v6620_v9  ;;  %4557 = vcosq.f32 %v1291_v49  ;;  %vm1468_vm12 = vc.u32 %v6620_v9, %v6625_v51  ;;  %v6666_v28 = vpop.f32.mrb[8].mxu0 }
 0x1b8   : > { %v1469_v33 = vadd.s32 1, %v6626_v27  ;;  %v1522_v58 = vand.u32 8388607, %v1515_v46  ;;  %4559 = vsinq.f32 %v1291_v49  ;;  %v1382_v26 = vor.u32 %v1381_v45, %v1380_v19  ;;  %v7916_v19 = vld [vmem:[#allocation51_spill] sm:$0xff] }
 0x1b9   : > { %v1385_v38 = vshll.u32 %v1384_v61, 23  ;;  %v1532_v2 = vshll.u32 %v7811_v40, %v5429_v42  ;;  %v1533_v62 = vshrl.u32 %v7821_v15, %v7872_v50  ;;  %v1535_v29 = vshll.u32 %v7821_v15, %v5429_v42 }
 0x1ba   : > { %v1470_v25 = vsel %vm1468_vm12, %v1469_v33, %v6626_v27  ;;  %v1536_v41 = vshrl.u32 %v7823_v52, %v7872_v50  ;;  %v1389_v0 = vcvt.s32.f32 %v1382_v26  ;;  %v1538_v59 = vshll.u32 %v7823_v52, %v5429_v42  ;;  %v3945_v27 = vpop.f32.mrb[9].mxu0 }
 0x1bb   : > { %v1386_v57 = vor.u32 4788187, %v1385_v38  ;;  %v1471_v36 = vadd.s32 %v1470_v25, %v1466_v23  ;;  %v1400_v9 = vadd.s32 3, %v1396_v37  ;;  %v1531_v44 = vshrl.u32 %v7811_v40, %v7872_v50  ;;  %v6685_v37 = vpop.f32.mrb[10].mxu0 }
 0x1bc   : > { %v1537_v14 = vor.u32 %v1536_v41, %v1535_v29  ;;  %v1539_v51 = vshrl.u32 %v7796_v4, %v7872_v50  ;;  %vm1547_vm8 = vcmp.lt.s32.totalorder %v7895_v48, 1  ;;  %vm1549_vm1 = vcmp.lt.s32.totalorder %v7895_v48, 3 }
 0x1bd   : > { %v1387_v30 = vand.u32 2147483647, %v1386_v57  ;;  %v1472_v24 = vadd.s32 536870912, %v1471_v36  ;;  %v1523_v54 = vor.u32 8388608, %v1522_v58  ;;  %v1534_v32 = vor.u32 %v1533_v62, %v1532_v2 }
 0x1be   : > { %v1540_v42 = vor.u32 %v1539_v51, %v1538_v59  ;;  %v1561_v53 = vsel %vm1549_vm1, %v6300_v10, %v6519_v1  ;;  %v6680_v43 = vshll.u32 %v7796_v4, %v7916_v19  ;;  %vm1298_vm9 = vcmp.lt.s32.totalorder %v6638_v16, 2  ;;  %v3948_v1 = vpop.f32.mrb[11].mxu0 }
 0x1bf   : > { %v1390_v50 = vmul.f32 %v1389_v0, %v1387_v30  ;;  %v6683_v3 = vshrl.u32 %v1472_v24, 30  ;;  %vm1299_vm5 = vcmp.eq.s32.totalorder %v6638_v16, 0  ;;  %vm1302_vm2 = vcmp.eq.s32.totalorder %v6638_v16, 2  ;;  %v6712_v57 = vpop.f32.mrb[12].mxu0 }
 0x1c0   : > { %vm1548_vm10 = vcmp.lt.s32.totalorder %v7895_v48, 2  ;;  %v1559_v10 = vsel %vm1547_vm8, %v1537_v14, %v1540_v42  ;;  %v6692_v49 = vand.u32 3, %v1400_v9  ;;  %v1552_v61 = vsel %vm1550_vm4, %v1540_v42, 2102212464  ;;  %v7917_v9 = vld [vmem:[#allocation37_spill] sm:$0xff]  ;;  %v3951_v51 = vpop.f32.mrb[13].mxu0 }
 0x1c1   : > { %v1391_v23 = vxor.u32 2147483648, %v1390_v50  ;;  %v1474_v45 = vshll.u32 %v6683_v3, 30  ;;  %v4558_v33 = vpop.eup %4557  ;;  %v1551_v58 = vsel %vm1547_vm8, %v1531_v44, %v1534_v32  ;;  %v1555_v17 = vsel %vm1547_vm8, %v1534_v32, %v1537_v14 }
 0x1c2   : > { %v1557_v26 = vsel %vm1549_vm1, %v1540_v42, %v6512_v60  ;;  %v6704_v38 = vshll.u32 %v1523_v54, 8  ;;  %v4560_v2 = vpop.eup %4559  ;;  %v1303_v25 = vxor.u32 2147483648, %v4558_v33  ;;  %v1562_v41 = vsel %vm1548_vm10, %v1559_v10, %v1561_v53  ;;  %v6737_v53 = vpop.f32.mrb[14].mxu0 }
 0x1c3   : > { %v1392_v62 = vsel %vm1309_vm3, %v1391_v23, %v1390_v50  ;;  %v6708_v29 = vsub.s32 %v1471_v36, %v1474_v45  ;;  %v1300_v0 = vxor.u32 2147483648, %v4560_v2  ;;  %v1553_v60 = vsel %vm1549_vm1, %v1537_v14, %v1552_v61  ;;  %v7918_v50 = vld [vmem:[#allocation52_spill] sm:$0xff] }
 0x1c4   : > { %v1395_v59 = vsel %vm6570_vm13, %v7889_v63, %v1392_v62  ;;  %v1619_v44 = vand.u32 2147483647, %v7917_v9  ;;  %v1304_v36 = vsel %vm1302_vm2, %v1303_v25, %v4560_v2  ;;  %v1558_v30 = vsel %vm1548_vm10, %v1555_v17, %v1557_v26 }
 0x1c5   : > { %4561 = vcosq.f32 %v1395_v59  ;;  %v1477_v27 = vsub.s32 0, %v6708_v29  ;;  %v1301_v24 = vsel %vm1299_vm5, %v4558_v33, %v1300_v0  ;;  %vm1295_vm4 = vweird.f32 %v7882_v12  ;;  %v3954_v12 = vpop.f32.mrb[15].mxu0 }
 0x1c6   : > { %4563 = vsinq.f32 %v1395_v59  ;;  %v6728_v18 = vmul.u32.u64.low %v6704_v38, %v1562_v41  ;;  %v6729_v54 = vmul.u32.u64.high %v6704_v38, %v1562_v41, %v6728_v18  ;;  %v1305_v14 = vsel %vm1298_vm9, %v1301_v24, %v1304_v36  ;;  %v6774_v25 = vpop.f32.mrb[16].mxu0 }
 0x1c7   : > { %v3674_v32 = vmin.u32 %v1477_v27, %v6708_v29  ;;  %v1554_v42 = vsel %vm1548_vm10, %v1551_v58, %v1553_v60  ;;  %v6741_v10 = vshrl.u32 %v7781_v35, %v7918_v50  ;;  %v1306_v1 = vsel %vm1295_vm4, nan, %v1305_v14  ;;  %v3957_v59 = vpop.f32.mrb[17].mxu0 }
 0x1c8   : > { %v6744_v23 = vmul.u32.u64.low %v6704_v38, %v1558_v30  ;;  %v6745_v45 = vmul.u32.u64.high %v6704_v38, %v1558_v30, %v6744_v23  ;;  %4024 = vmatmul.mubr.f32.gmra.mrb[14].mxu1 %v1306_v1  ;;  %vm1413_vm3 = vcmp.lt.s32.totalorder %v7899_v21, 0  ;;  %v1497_v61 = vsub.s32 4, %v6683_v3 }
 0x1c9   : > { %v1479_v16 = vclz %v3674_v32  ;;  %v6751_v48 = vand.u32 8388607, %v1619_v44  ;;  %4026 = vmatprep.mubr.msk.f32.mxu1 %vm4766_vm0, %v7806_v5  ;;  %vm1403_vm15 = vcmp.eq.s32.totalorder %v6692_v49, 0  ;;  %v1570_v35 = vmul.u32 %v6704_v38, %v1554_v42  ;;  %v6794_v42 = vpop.f32.mrb[18].mxu0 }
 0x1ca   : > { %v6758_v33 = vadd.s32 %v6744_v23, %v6729_v54  ;;  %vm1572_vm13 = vc.u32 %v6729_v54, %v6744_v23  ;;  %vm1402_vm6 = vcmp.lt.s32.totalorder %v6692_v49, 2  ;;  %vm6764_vm11 = vcmp.le.f32.partialorder %v1411_v22, 0.7853982 }
 0x1cb   : > { %v3675_v17 = vadd.s32 4294967294, %v1479_v16  ;;  %v1636_v26 = vshll.u32 %v7811_v40, %v5503_v7  ;;  %v1637_v38 = vshrl.u32 %v7821_v15, %v7878_v20  ;;  %v1639_v2 = vshll.u32 %v7821_v15, %v5503_v7 }
 0x1cc   : > { %vm1399_vm14 = vweird.f32 %v7889_v63  ;;  %v1573_v62 = vadd.s32 1, %v6745_v45  ;;  %v1640_v22 = vshrl.u32 %v7823_v52, %v7878_v20  ;;  %v1642_v41 = vshll.u32 %v7823_v52, %v5503_v7 }
 0x1cd   : > { %v1643_v0 = vshrl.u32 %v7796_v4, %v7878_v20  ;;  %vm1406_vm12 = vcmp.eq.s32.totalorder %v6692_v49, 2  ;;  %vm3676_vm8 = vcmp.lt.s32.totalorder %v3675_v17, 0  ;;  %v1498_v60 = vsel %vm1413_vm3, %v1497_v61, %v6683_v3  ;;  %v3960_v61 = vpop.f32.mrb[19].mxu0  ;;  %v7921_v49 = vld [vmem:[#allocation50_spill] sm:$0xff] }
 0x1ce   : > { %v1627_v51 = vor.u32 8388608, %v6751_v48  ;;  %v1482_v36 = vsel %vm3676_vm8, 0, %v3675_v17  ;;  %v1574_v27 = vsel %vm1572_vm13, %v1573_v62, %v6745_v45  ;;  %v1638_v30 = vor.u32 %v1637_v38, %v1636_v26 }
 0x1cf   : > { %vm1651_vm1 = vcmp.lt.s32.totalorder %v6304_v13, 1  ;;  %v4562_v7 = vpop.eup %4561  ;;  %v1483_v24 = vsub.s32 32, %v1482_v36  ;;  %v1484_v18 = vshll.u32 %v6708_v29, %v1482_v36  ;;  %v1487_v14 = vsub.s32 4294967266, %v1482_v36 }
 0x1d0   : > { %v1575_v32 = vadd.s32 %v1574_v27, %v1570_v35  ;;  %v4564_v1 = vpop.eup %4563  ;;  %v1407_v3 = vxor.u32 2147483648, %v4562_v7  ;;  %v1641_v12 = vor.u32 %v1640_v22, %v1639_v2  ;;  %v1644_v16 = vor.u32 %v1643_v0, %v1642_v41 }
 0x1d1   : > { %vm1653_vm9 = vcmp.lt.s32.totalorder %v6304_v13, 3  ;;  %v1404_v54 = vxor.u32 2147483648, %v4564_v1  ;;  %v1485_v23 = vshrl.u32 %v6647_v8, %v1483_v24  ;;  %v1488_v45 = vadd.s32 127, %v1487_v14  ;;  %v6809_v8 = vpop.f32.mrb[20].mxu0 }
 0x1d2   : > { %v1576_v48 = vadd.s32 536870912, %v1575_v32  ;;  %v1408_v17 = vsel %vm1406_vm12, %v1407_v3, %v4564_v1  ;;  %v1635_v29 = vshrl.u32 %v7811_v40, %v7878_v20  ;;  %vm1652_vm5 = vcmp.lt.s32.totalorder %v6304_v13, 2  ;;  %v3963_v59 = vpop.f32.mrb[21].mxu0 }
 0x1d3   : > { %v1656_v35 = vsel %vm1654_vm7, %v1644_v16, 2102212464  ;;  %v1405_v26 = vsel %vm1403_vm15, %v4562_v7, %v1404_v54  ;;  %v1486_v38 = vor.u32 %v1485_v23, %v1484_v18  ;;  %v1489_v2 = vshll.u32 %v1488_v45, 23  ;;  %v6840_v54 = vpop.f32.mrb[22].mxu0 }
 0x1d4   : > { %v6807_v62 = vshrl.u32 %v1576_v48, 30  ;;  %v1409_v22 = vsel %vm1402_vm6, %v1405_v26, %v1408_v17  ;;  %v1659_v20 = vsel %vm1651_vm1, %v1638_v30, %v1641_v12  ;;  %v1661_v41 = vsel %vm1653_vm9, %v1644_v16, %v6524_v39  ;;  %v3966_v23 = vpop.f32.mrb[23].mxu0 }
 0x1d5   : > { %v1663_v0 = vsel %vm1651_vm1, %v1641_v12, %v1644_v16  ;;  %v1410_v36 = vsel %vm1399_vm14, nan, %v1409_v22  ;;  %v1490_v27 = vor.u32 4788187, %v1489_v2  ;;  %v1493_v7 = vcvt.s32.f32 %v1486_v38 }
 0x1d6   : > { %v1578_v24 = vshll.u32 %v6807_v62, 30  ;;  %v6824_v18 = vshrl.u32 %v7921_v49, 5  ;;  %4027 = vmatmul.mubr.f32.gmra.mrb[16].mxu1 %v1410_v36  ;;  %v1500_v14 = vsel %vm6764_vm11, 0, %v1498_v60  ;;  %v1665_v39 = vsel %vm1653_vm9, %v6307_v11, %v6633_v55 }
 0x1d7   : > { %v1667_v1 = vshll.u32 %v1627_v51, 8  ;;  %4029 = vmatprep.mubr.msk.f32.mxu1 %vm4766_vm0, %v7806_v5  ;;  %v1491_v63 = vand.u32 2147483647, %v1490_v27  ;;  %v1662_v16 = vsel %vm1652_vm5, %v1659_v20, %v1661_v41  ;;  %v1666_v61 = vsel %vm1652_vm5, %v1663_v0, %v1665_v39  ;;  %v7922_v41 = vld [vmem:[#allocation44_spill] sm:$0xff] }
 0x1d8   : > { %v6834_v3 = vsub.s32 %v1575_v32, %v1578_v24  ;;  %v1655_v60 = vsel %vm1651_vm1, %v1635_v29, %v1638_v30  ;;  %v1657_v11 = vsel %vm1653_vm9, %v1641_v12, %v1656_v35  ;;  %v6851_v32 = vor.u32 %v6741_v10, %v6680_v43  ;;  %v6861_v35 = vpop.f32.mrb[24].mxu0 }
 0x1d9   : > { %v6846_v55 = vmul.u32.u64.low %v1667_v1, %v1666_v61  ;;  %v6847_v51 = vmul.u32.u64.high %v1667_v1, %v1666_v61, %v6846_v55  ;;  %v1494_v45 = vmul.f32 %v1493_v7, %v1491_v63  ;;  %vm1758_vm7 = vcmp.lt.s32.totalorder %v6824_v18, 4  ;;  %v3969_v10 = vpop.f32.mrb[25].mxu0 }
 0x1da   : > { %v1581_v48 = vsub.s32 0, %v6834_v3  ;;  %v1504_v17 = vadd.s32 3, %v1500_v14  ;;  %v6855_v26 = vmul.u32.u64.low %v1667_v1, %v1662_v16  ;;  %v6856_v38 = vmul.u32.u64.high %v1667_v1, %v1662_v16, %v6855_v26  ;;  %v6883_v14 = vpop.f32.mrb[26].mxu0  ;;  %v7924_v55 = vld [vmem:[#allocation53_spill] sm:$0xff] }
 0x1db   : > { %v1495_v30 = vxor.u32 2147483648, %v1494_v45  ;;  %v1658_v29 = vsel %vm1652_vm5, %v1655_v60, %v1657_v11  ;;  %v1764_v2 = vsel %vm1758_vm7, %v6851_v32, 920167782  ;;  %v1723_v0 = vand.u32 2147483647, %v7922_v41  ;;  %v4047_v63 = vpop.f32.mrb[27].mxu0 }
 0x1dc   : > { %v3678_v12 = vmin.u32 %v1581_v48, %v6834_v3  ;;  %v6864_v43 = vadd.s32 %v6855_v26, %v6847_v51  ;;  %vm1676_vm2 = vc.u32 %v6847_v51, %v6855_v26  ;;  %v6876_v59 = vand.u32 3, %v1504_v17  ;;  %v6898_v11 = vpop.f32.mrb[28].mxu0 }
 0x1dd   : > { %v1496_v22 = vsel %vm1413_vm3, %v1495_v30, %v1494_v45  ;;  %v1674_v36 = vmul.u32 %v1667_v1, %v1658_v29  ;;  %v1740_v27 = vshll.u32 %v7811_v40, %v7916_v19  ;;  %v1677_v24 = vadd.s32 1, %v6856_v38  ;;  %v4050_v17 = vpop.f32.mrb[29].mxu0 }
 0x1de   : > { %v1583_v20 = vclz %v3678_v12  ;;  %v1499_v13 = vsel %vm6764_vm11, %v7899_v21, %v1496_v22  ;;  %v1741_v49 = vshrl.u32 %v7821_v15, %v7918_v50  ;;  %v1743_v58 = vshll.u32 %v7821_v15, %v7916_v19  ;;  %v7923_v15 = vld [vmem:[#allocation55_spill] sm:$0xff]  ;;  %v6906_v12 = vpop.f32.mrb[30].mxu0 }
 0x1df   : > { %4565 = vcosq.f32 %v1499_v13  ;;  %v1744_v39 = vshrl.u32 %v7823_v52, %v7918_v50  ;;  %v1746_v1 = vshll.u32 %v7823_v52, %v7916_v19  ;;  %v1678_v16 = vsel %vm1676_vm2, %v1677_v24, %v6856_v38  ;;  %v4053_v10 = vpop.f32.mrb[31].mxu0 }
 0x1e0   : > { %v3679_v7 = vadd.s32 4294967294, %v1583_v20  ;;  %4567 = vsinq.f32 %v1499_v13  ;;  %v1730_v61 = vand.u32 8388607, %v1723_v0  ;;  %v1747_v60 = vshrl.u32 %v7796_v4, %v7918_v50 }
 0x1e1   : > { %v7925_v23 = vor.u32 %v7923_v15, %v7924_v55  ;;  %v1679_v45 = vadd.s32 %v1678_v16, %v1674_v36  ;;  %v1745_v48 = vor.u32 %v1744_v39, %v1743_v58  ;;  %v1742_v29 = vor.u32 %v1741_v49, %v1740_v27 }
 0x1e2   : > { %vm3680_vm10 = vcmp.lt.s32.totalorder %v3679_v7, 0  ;;  %v1748_v30 = vor.u32 %v1747_v60, %v1746_v1  ;;  %vm1755_vm4 = vcmp.lt.s32.totalorder %v6824_v18, 1  ;;  %vm1757_vm3 = vcmp.lt.s32.totalorder %v6824_v18, 3  ;;  %v2439_v60 = vld [vmem:[%s7645_s6 + $0x18] sm:$0xff] }
 0x1e3   : > { %v1768_v52 = vsel %vm1758_vm7, %v7925_v23, 1326507024  ;;  %v1586_v19 = vsel %vm3680_vm10, 0, %v3679_v7  ;;  %v1680_v4 = vadd.s32 536870912, %v1679_v45  ;;  %vm1506_vm15 = vcmp.lt.s32.totalorder %v6876_v59, 2  ;;  %v2437_v7 = vld [vmem:[%s7645_s6 + $0x8] sm:$0xff] }
 0x1e4   : > { %v1587_v51 = vsub.s32 32, %v1586_v19  ;;  %v1588_v26 = vshll.u32 %v6834_v3, %v1586_v19  ;;  %v1591_v38 = vsub.s32 4294967266, %v1586_v19  ;;  %vm1507_vm13 = vcmp.eq.s32.totalorder %v6876_v59, 0  ;;  %v6913_v3 = vpop.f32.mrb[32].mxu0 }
 0x1e5   : > { %v1731_v13 = vor.u32 8388608, %v1730_v61  ;;  %vm1503_vm6 = vweird.f32 %v7899_v21  ;;  %vm1510_vm11 = vcmp.eq.s32.totalorder %v6876_v59, 2  ;;  %vm1517_vm14 = vcmp.lt.s32.totalorder %v7912_v6, 0  ;;  %v4056_v24 = vpop.f32.mrb[33].mxu0  ;;  %v2438_v61 = vld [vmem:[%s7645_s6 + $0x10] sm:$0xff]  ;;  %v2448_v59 = vld [vmem:[%s7645_s6 + $0x60] sm:$0xff] }
 0x1e6   : > { %v1589_v22 = vshrl.u32 %v6758_v33, %v1587_v51  ;;  %v1592_v20 = vadd.s32 127, %v1591_v38  ;;  %v6918_v36 = vshrl.u32 %v1680_v4, 30  ;;  %v1739_v27 = vshrl.u32 %v7811_v40, %v7918_v50  ;;  %v2436_v33 = vld [vmem:[%s7645_s6] sm:$0xff]  ;;  %v6949_v19 = vpop.f32.mrb[34].mxu0  ;;  %v2442_v21 = vld [vmem:[%s7645_s6 + $0x30] sm:$0xff] }
 0x1e7   : > { %vm1756_vm12 = vcmp.lt.s32.totalorder %v6824_v18, 2  ;;  %v1767_v39 = vsel %vm1755_vm4, %v1745_v48, %v1748_v30  ;;  %v1769_v40 = vsel %vm1757_vm3, %v6851_v32, %v1768_v52  ;;  %v1760_v1 = vsel %vm1758_vm7, %v1748_v30, 2102212464  ;;  %v2443_v18 = vld [vmem:[%s7645_s6 + $0x38] sm:$0xff] }
 0x1e8   : > { %v1590_v49 = vor.u32 %v1589_v22, %v1588_v26  ;;  %v1593_v58 = vshll.u32 %v1592_v20, 23  ;;  %v1682_v50 = vshll.u32 %v6918_v36, 30  ;;  %v1763_v63 = vsel %vm1755_vm4, %v1742_v29, %v1745_v48 }
 0x1e9   : > { %v1765_v16 = vsel %vm1757_vm3, %v1748_v30, %v1764_v2  ;;  %v4566_v32 = vpop.eup %4565  ;;  %v6947_v23 = vshll.u32 %v1731_v13, 8  ;;  %v4348_v52 = vpack.c.bf16 %v2437_v7, %v2436_v33  ;;  %v1759_v2 = vsel %vm1755_vm4, %v1739_v27, %v1742_v29  ;;  %v4059_v30 = vpop.f32.mrb[35].mxu0  ;;  %v2440_v13 = vld [vmem:[%s7645_s6 + $0x20] sm:$0xff] }
 0x1ea   : > { %v1594_v15 = vor.u32 4788187, %v1593_v58  ;;  %v1597_v55 = vcvt.s32.f32 %v1590_v49  ;;  %v4568_v17 = vpop.eup %4567  ;;  %v1511_v51 = vxor.u32 2147483648, %v4566_v32  ;;  %v6951_v26 = vsub.s32 %v1679_v45, %v1682_v50  ;;  %v2441_v45 = vld [vmem:[%s7645_s6 + $0x28] sm:$0xff] }
 0x1eb   : > { %v1770_v38 = vsel %vm1756_vm12, %v1767_v39, %v1769_v40  ;;  %v1508_v4 = vxor.u32 2147483648, %v4568_v17  ;;  %v1761_v22 = vsel %vm1757_vm3, %v1745_v48, %v1760_v1  ;;  %4349 = vmatpush3.bf16.msra.mxu1 %v4348_v52  ;;  %v4351_v20 = vpack.c.bf16 %v2439_v60, %v2438_v61 }
 0x1ec   : > { %v1595_v10 = vand.u32 2147483647, %v1594_v15  ;;  %v1512_v29 = vsel %vm1510_vm11, %v1511_v51, %v4568_v17  ;;  %v1601_v27 = vsub.s32 4, %v6807_v62  ;;  %v1685_v33 = vsub.s32 0, %v6951_v26 }
 0x1ed   : > { %v1766_v48 = vsel %vm1756_vm12, %v1763_v63, %v1765_v16  ;;  %v7926_v7 = vmov 0.0|0.0   ;;  %v1509_v24 = vsel %vm1507_vm13, %v4566_v32, %v1508_v4  ;;  %v1762_v1 = vsel %vm1756_vm12, %v1759_v2, %v1761_v22  ;;  %v7018_v4 = vpop.f32.mrb[36].mxu0 }
 0x1ee   : > { %4350 = vmatprep.subr.bf16.mxu1 %v7926_v7  ;;  %v1598_v49 = vmul.f32 %v1597_v55, %v1595_v10  ;;  %v6975_v58 = vmul.u32.u64.low %v6947_v23, %v1770_v38  ;;  %v6976_v39 = vmul.u32.u64.high %v6947_v23, %v1770_v38, %v6975_v58  ;;  %v1513_v40 = vsel %vm1506_vm15, %v1509_v24, %v1512_v29  ;;  %v2444_v10 = vld [vmem:[%s7645_s6 + $0x40] sm:$0xff]  ;;  %v4062_v22 = vpop.f32.mrb[37].mxu0 }
 0x1ef   : > { %v3682_v50 = vmin.u32 %v1685_v33, %v6951_v26  ;;  %v4354_v61 = vpack.c.bf16 %v2441_v45, %v2440_v13  ;;  %v1514_v63 = vsel %vm1503_vm6, nan, %v1513_v40  ;;  %4352 = vmatpush3.bf16.msra.mxu1 %v4351_v20  ;;  %vm6991_vm8 = vcmp.le.f32.partialorder %v1515_v46, 0.7853982  ;;  %v2451_v22 = vld [vmem:[%s7645_s6 + $0x78] sm:$0xff] }
 0x1f0   : > { %v1599_v16 = vxor.u32 2147483648, %v1598_v49  ;;  %v6986_v60 = vmul.u32.u64.low %v6947_v23, %v1766_v48  ;;  %v6987_v32 = vmul.u32.u64.high %v6947_v23, %v1766_v48, %v6986_v60  ;;  %4030 = vmatmul.mubr.f32.gmra.mrb[18].mxu1 %v1514_v63  ;;  %4353 = vmatprep.subr.bf16.mxu1 %v7926_v7  ;;  %v1602_v55 = vsel %vm1517_vm14, %v1601_v27, %v6807_v62 }
 0x1f1   : > { %v1687_v15 = vclz %v3682_v50  ;;  %4032 = vmatprep.mubr.msk.f32.mxu1 %vm4766_vm0, %v7806_v5  ;;  %v1778_v2 = vmul.u32 %v6947_v23, %v1762_v1  ;;  %v4357_v30 = vpack.c.bf16 %v2443_v18, %v2442_v21  ;;  %v1604_v62 = vsel %vm6991_vm8, 0, %v1602_v55  ;;  %v2445_v23 = vld [vmem:[%s7645_s6 + $0x48] sm:$0xff]  ;;  %v2446_v50 = vld [vmem:[%s7645_s6 + $0x50] sm:$0xff] }
 0x1f2   : > { %v1600_v46 = vsel %vm1517_vm14, %v1599_v16, %v1598_v49  ;;  %v7010_v52 = vadd.s32 %v6986_v60, %v6976_v39  ;;  %vm1780_vm1 = vc.u32 %v6976_v39, %v6986_v60  ;;  %v1781_v38 = vadd.s32 1, %v6987_v32  ;;  %v2447_v39 = vld [vmem:[%s7645_s6 + $0x58] sm:$0xff] }
 0x1f3   : > { %v1603_v17 = vsel %vm6991_vm8, %v7912_v6, %v1600_v46  ;;  %v3683_v51 = vadd.s32 4294967294, %v1687_v15  ;;  %4355 = vmatpush3.bf16.msra.mxu1 %v4354_v61  ;;  %v1608_v48 = vadd.s32 3, %v1604_v62  ;;  %v4360_v24 = vpack.c.bf16 %v2445_v23, %v2444_v10  ;;  %v2449_v15 = vld [vmem:[%s7645_s6 + $0x68] sm:$0xff]  ;;  %v2450_v23 = vld [vmem:[%s7645_s6 + $0x70] sm:$0xff] }
 0x1f4   : > { %4569 = vcosq.f32 %v1603_v17  ;;  %4356 = vmatprep.subr.bf16.mxu1 %v7926_v7  ;;  %v1782_v13 = vsel %vm1780_vm1, %v1781_v38, %v6987_v32  ;;  %v4363_v16 = vpack.c.bf16 %v2447_v39, %v2446_v50  ;;  %v1705_v62 = vsub.s32 4, %v6918_v36 }
 0x1f5   : > { %4571 = vsinq.f32 %v1603_v17  ;;  %vm3684_vm9 = vcmp.lt.s32.totalorder %v3683_v51, 0  ;;  %v1783_v33 = vadd.s32 %v1782_v13, %v1778_v2  ;;  %v1609_v63 = vand.u32 3, %v1608_v48 }
 0x1f6   : > { %v1690_v20 = vsel %vm3684_vm9, 0, %v3683_v51  ;;  %v4366_v2 = vpack.c.bf16 %v2449_v15, %v2448_v59  ;;  %vm1621_vm10 = vcmp.lt.s32.totalorder %v7917_v9, 0  ;;  %vm1607_vm4 = vweird.f32 %v7912_v6  ;;  %v7069_v6 = vpop.f32.mrb[38].mxu0 }
 0x1f7   : > { %v1691_v45 = vsub.s32 32, %v1690_v20  ;;  %v1692_v29 = vshll.u32 %v6951_v26, %v1690_v20  ;;  %v1695_v27 = vsub.s32 4294967266, %v1690_v20  ;;  %4358 = vmatpush3.bf16.msra.mxu1 %v4357_v30  ;;  %v1784_v40 = vadd.s32 536870912, %v1783_v33  ;;  %v4065_v50 = vpop.f32.mrb[39].mxu0 }
 0x1f8   : > { %4359 = vmatprep.subr.bf16.mxu1 %v7926_v7  ;;  %vm1611_vm5 = vcmp.eq.s32.totalorder %v1609_v63, 0  ;;  %vm1614_vm7 = vcmp.eq.s32.totalorder %v1609_v63, 2  ;;  %vm1610_vm2 = vcmp.lt.s32.totalorder %v1609_v63, 2  ;;  %vm7063_vm3 = vcmp.le.f32.partialorder %v1619_v44, 0.7853982  ;;  %v7092_v48 = vpop.f32.mrb[40].mxu0 }
 0x1f9   : > { %v1693_v49 = vshrl.u32 %v6864_v43, %v1691_v45  ;;  %v1696_v58 = vadd.s32 127, %v1695_v27  ;;  %v7041_v61 = vshrl.u32 %v1784_v40, 30  ;;  %vm1711_vm14 = vweird.f32 %v7917_v9 }
 0x1fa   : > { %vm1725_vm12 = vcmp.lt.s32.totalorder %v7922_v41, 0  ;;  %vm1724_vm8 = vcmp.le.f32.partialorder %v1723_v0, 0.7853982 }
 0x1fb   : > { %v1694_v26 = vor.u32 %v1693_v49, %v1692_v29  ;;  %v1697_v1 = vshll.u32 %v1696_v58, 23  ;;  %4361 = vmatpush3.bf16.msra.mxu1 %v4360_v24  ;;  %v1786_v32 = vshll.u32 %v7041_v61, 30  ;;  %v1706_v49 = vsel %vm1621_vm10, %v1705_v62, %v6918_v36 }
 0x1fc   : > { %4362 = vmatprep.subr.bf16.mxu1 %v7926_v7  ;;  %v1708_v39 = vsel %vm7063_vm3, 0, %v1706_v49 }
 0x1fd   : > { %v1698_v43 = vor.u32 4788187, %v1697_v1  ;;  %v1701_v60 = vcvt.s32.f32 %v1694_v26  ;;  %v1787_v17 = vsub.s32 %v1783_v33, %v1786_v32  ;;  %v4369_v33 = vpack.c.bf16 %v2451_v22, %v2450_v23 }
 0x1fe   : > { %v4570_v21 = vpop.eup %4569  ;;  %v1712_v26 = vadd.s32 3, %v1708_v39 }
 0x1ff   : > { %v4572_v18 = vpop.eup %4571  ;;  %v1615_v46 = vxor.u32 2147483648, %v4570_v21  ;;  %v1699_v55 = vand.u32 2147483647, %v1698_v43  ;;  %4364 = vmatpush3.bf16.msra.mxu1 %v4363_v16  ;;  %v1789_v10 = vsub.s32 0, %v1787_v17 }
 0x200   : > { %v1612_v51 = vxor.u32 2147483648, %v4572_v18  ;;  %4365 = vmatprep.subr.bf16.mxu1 %v7926_v7  ;;  %v1713_v32 = vand.u32 3, %v1712_v26 }
 0x201   : > { %v1616_v38 = vsel %vm1614_vm7, %v1615_v46, %v4572_v18  ;;  %v1702_v30 = vmul.f32 %v1701_v60, %v1699_v55  ;;  %v3686_v29 = vmin.u32 %v1789_v10, %v1787_v17  ;;  %v1809_v10 = vsub.s32 4, %v7041_v61 }
 0x202   : > { %v1613_v20 = vsel %vm1611_vm5, %v4570_v21, %v1612_v51  ;;  %vm1718_vm13 = vcmp.eq.s32.totalorder %v1713_v32, 2  ;;  %vm1715_vm6 = vcmp.eq.s32.totalorder %v1713_v32, 0  ;;  %vm1714_vm11 = vcmp.lt.s32.totalorder %v1713_v32, 2 }
 0x203   : > { %v1617_v13 = vsel %vm1610_vm2, %v1613_v20, %v1616_v38  ;;  %v1703_v45 = vxor.u32 2147483648, %v1702_v30  ;;  %4367 = vmatpush3.bf16.msra.mxu1 %v4366_v2  ;;  %v1791_v58 = vclz %v3686_v29  ;;  %vm1815_vm7 = vweird.f32 %v7922_v41 }
 0x204   : > { %v1618_v27 = vsel %vm1607_vm4, nan, %v1617_v13  ;;  %4368 = vmatprep.subr.bf16.mxu1 %v7926_v7  ;;  %vm2685_vm2 = vcmask 261120  }
 0x205   : > { %4033 = vmatmul.mubr.f32.gmra.mrb[20].mxu1 %v1618_v27  ;;  %v1704_v24 = vsel %vm1621_vm10, %v1703_v45, %v1702_v30  ;;  %v3687_v44 = vadd.s32 4294967294, %v1791_v58  ;;  %v7931_v58 = vld [vmem:[#allocation5_spill] sm:$0xff] }
 0x206   : > { %4035 = vmatprep.mubr.msk.f32.mxu1 %vm4766_vm0, %v7806_v5  ;;  %v1707_v40 = vsel %vm7063_vm3, %v7917_v9, %v1704_v24  ;;  %v1810_v9 = vsel %vm1725_vm12, %v1809_v10, %v7041_v61  ;;  %v4068_v24 = vpop.f32.mrb[41].mxu0 }
 0x207   : > { %4573 = vcosq.f32 %v1707_v40  ;;  %4370 = vmatpush3.bf16.msra.mxu1 %v4369_v33  ;;  %vm3688_vm15 = vcmp.lt.s32.totalorder %v3687_v44, 0  ;;  %v1812_v33 = vsel %vm1724_vm8, 0, %v1810_v9 }
 0x208   : > { %4575 = vsinq.f32 %v1707_v40  ;;  %4389 = vmatprep.subr.bf16.mxu1 %v7926_v7  ;;  %v1794_v36 = vsel %vm3688_vm15, 0, %v3687_v44  ;;  %v1999_v40 = vsub.s32 3, %v7931_v58 }
 0x209   : > { %v1795_v1 = vsub.s32 32, %v1794_v36  ;;  %v1796_v63 = vshll.u32 %v1787_v17, %v1794_v36  ;;  %v1799_v16 = vsub.s32 4294967266, %v1794_v36 }
 0x20b   : > { %v1797_v43 = vshrl.u32 %v7010_v52, %v1795_v1  ;;  %v1800_v60 = vadd.s32 127, %v1799_v16 }
 0x20d   : > { %v1798_v59 = vor.u32 %v1797_v43, %v1796_v63  ;;  %v1801_v15 = vshll.u32 %v1800_v60, 23  ;;  %v7101_v63 = vld [vmem:[%s7640_s1] sm:$0xff]  ;;  %v7105_v60 = vpop.f32.mrb[42].mxu0 }
 0x20e   : > { %v2000_v16 = vrot.slane %v7101_v63, %v1999_v40 }
 0x20f   : > { %v1802_v18 = vor.u32 4788187, %v1801_v15  ;;  %v1805_v46 = vcvt.s32.f32 %v1798_v59  ;;  %v2215_v20 = vpop.f32.mrb[0].mxu1  ;;  %v4071_v59 = vpop.f32.mrb[43].mxu0 }
 0x210   : > { %v7084_v13 = vadd.f32 %v6883_v14, %v2215_v20  ;;  %v4004_v45 = vpop.f32.mrb[1].mxu1  ;;  %v1816_v14 = vadd.s32 3, %v1812_v33  ;;  %v2068_v15 = vadd.f32 %v6579_v47, %v2000_v16 }
 0x211   : > { %v4574_v21 = vpop.eup %4573  ;;  %v1803_v38 = vand.u32 2147483647, %v1802_v18  ;;  %v2677_v45 = vld [vmem:[%s7646_s7] sm:$0xff] }
 0x212   : > { %v4576_v55 = vpop.eup %4575  ;;  %v1719_v51 = vxor.u32 2147483648, %v4574_v21  ;;  %v1817_v49 = vand.u32 3, %v1816_v14 }
 0x213   : > { %v1716_v2 = vxor.u32 2147483648, %v4576_v55  ;;  %v1806_v17 = vmul.f32 %v1805_v46, %v1803_v38 }
 0x214   : > { %v1720_v30 = vsel %vm1718_vm13, %v1719_v51, %v4576_v55  ;;  %vm1822_vm1 = vcmp.eq.s32.totalorder %v1817_v49, 2  ;;  %vm1819_vm9 = vcmp.eq.s32.totalorder %v1817_v49, 0  ;;  %vm1818_vm5 = vcmp.lt.s32.totalorder %v1817_v49, 2  ;;  %v2417_v51 = vpop.f32.mrb[44].mxu0 }
 0x215   : > { %v1717_v62 = vsel %vm1715_vm6, %v4574_v21, %v1716_v2  ;;  %v1807_v22 = vxor.u32 2147483648, %v1806_v17  ;;  %v2073_v21 = vadd.f32 %v6598_v56, %v2000_v16  ;;  %v2083_v55 = vadd.f32 %v6649_v34, %v2000_v16  ;;  %v4074_v34 = vpop.f32.mrb[45].mxu0 }
 0x216   : > { %v1721_v52 = vsel %vm1714_vm11, %v1717_v62, %v1720_v30  ;;  %v2088_v56 = vadd.f32 %v6666_v28, %v2000_v16  ;;  %v2103_v28 = vadd.f32 %v6737_v53, %v2000_v16  ;;  %v2108_v30 = vadd.f32 %v6774_v25, %v2000_v16  ;;  %v2422_v62 = vpop.f32.mrb[46].mxu0 }
 0x217   : > { %v1722_v23 = vsel %vm1711_vm14, nan, %v1721_v52  ;;  %v1808_v29 = vsel %vm1725_vm12, %v1807_v22, %v1806_v17  ;;  %v2118_v53 = vadd.f32 %v6809_v8, %v2000_v16  ;;  %v4077_v25 = vpop.f32.mrb[47].mxu0 }
 0x218   : > { %4036 = vmatmul.mubr.f32.gmra.mrb[22].mxu1 %v1722_v23  ;;  %v1811_v27 = vsel %vm1724_vm8, %v7922_v41, %v1808_v29  ;;  %v2078_v41 = vadd.f32 %v6623_v31, %v2000_v16  ;;  %v2093_v31 = vadd.f32 %v6685_v37, %v2000_v16  ;;  %v2679_v29 = vld [vmem:[%s7646_s7 + $0x10] sm:$0xff] }
 0x219   : > { %4038 = vmatprep.mubr.msk.f32.mxu1 %vm4766_vm0, %v7806_v5  ;;  %4577 = vcosq.f32 %v1811_v27 }
 0x21a   : > { %4579 = vsinq.f32 %v1811_v27 }
 0x21d   : > { %v2220_v50 = vpop.f32.mrb[2].mxu1 }
 0x21e   : > { %v7096_v39 = vadd.f32 %v6898_v11, %v2220_v50  ;;  %v4007_v0 = vpop.f32.mrb[3].mxu1 }
 0x223   : > { %v4578_v44 = vpop.eup %4577 }
 0x224   : > { %v4580_v36 = vpop.eup %4579  ;;  %v1823_v61 = vxor.u32 2147483648, %v4578_v44 }
 0x225   : > { %v1820_v26 = vxor.u32 2147483648, %v4580_v36 }
 0x226   : > { %v1824_v1 = vsel %vm1822_vm1, %v1823_v61, %v4580_v36 }
 0x227   : > { %v1821_v43 = vsel %vm1819_vm9, %v4578_v44, %v1820_v26 }
 0x228   : > { %v1825_v11 = vsel %vm1818_vm5, %v1821_v43, %v1824_v1 }
 0x229   : > { %v1826_v32 = vsel %vm1815_vm7, nan, %v1825_v11 }
 0x22a   : > { %4039 = vmatmul.mubr.f32.gmra.mrb[24].mxu1 %v1826_v32 }
 0x22b   : > { %4116 = vmatprep.mubr.msk.f32.mxu1 %vm4766_vm0, %v7806_v5 }
 0x22e   : > { %4117 = vmatmul.mubr.f32.vlgmr.msra.gmra.mrb[26].mxu1 %v2068_v15 }
 0x22f   : > { %4119 = vmatprep.mubr.msk.f32.mxu1 %vm4766_vm0, %v7806_v5 }
 0x230   : > { %v2225_v18 = vpop.f32.mrb[4].mxu1 }
 0x231   : > { %v7117_v46 = vadd.f32 %v6906_v12, %v2225_v18  ;;  %v4010_v47 = vpop.f32.mrb[5].mxu1  ;;  %v2098_v12 = vadd.f32 %v6712_v57, %v2000_v16  ;;  %v2113_v57 = vadd.f32 %v6794_v42, %v2000_v16  ;;  %v2128_v42 = vadd.f32 %v6861_v35, %v2000_v16 }
 0x232   : > { %4120 = vmatmul.mubr.f32.gmra.mrb[28].mxu1 %v2073_v21 }
 0x233   : > { %4122 = vmatprep.mubr.msk.f32.mxu1 %vm4766_vm0, %v7806_v5 }
 0x236   : > { %4123 = vmatmul.mubr.f32.gmra.mrb[30].mxu1 %v2078_v41 }
 0x237   : > { %4125 = vmatprep.mubr.msk.f32.mxu1 %vm4766_vm0, %v7806_v5 }
 0x23a   : > { %4126 = vmatmul.mubr.f32.gmra.mrb[32].mxu1 %v2083_v55 }
 0x23b   : > { %4128 = vmatprep.mubr.msk.f32.mxu1 %vm4766_vm0, %v7806_v5 }
 0x23e   : > { %4129 = vmatmul.mubr.f32.gmra.mrb[34].mxu1 %v2088_v56 }
 0x23f   : > { %4131 = vmatprep.mubr.msk.f32.mxu1 %vm4766_vm0, %v7806_v5 }
 0x242   : > { %4132 = vmatmul.mubr.f32.gmra.mrb[36].mxu1 %v2093_v31 }
 0x243   : > { %4134 = vmatprep.mubr.msk.f32.mxu1 %vm4766_vm0, %v7806_v5 }
 0x244   : > { %v2230_v2 = vpop.f32.mrb[6].mxu1 }
 0x245   : > { %v7135_v37 = vadd.f32 %v6913_v3, %v2230_v2  ;;  %v4013_v38 = vpop.f32.mrb[7].mxu1  ;;  %v2123_v3 = vadd.f32 %v6840_v54, %v2000_v16  ;;  %v2427_v54 = vpop.f32.mrb[48].mxu0 }
 0x246   : > { %4135 = vmatmul.mubr.f32.gmra.mrb[38].mxu1 %v2098_v12  ;;  %v4080_v52 = vpop.f32.mrb[49].mxu0 }
 0x247   : > { %4137 = vmatprep.mubr.msk.f32.mxu1 %vm4766_vm0, %v7806_v5  ;;  %v2432_v35 = vpop.f32.mrb[50].mxu0 }
 0x248   : > { %v4083_v9 = vpop.f32.mrb[51].mxu0 }
 0x24a   : > { %4138 = vmatmul.mubr.f32.gmra.mrb[40].mxu1 %v2103_v28 }
 0x24b   : > { %4140 = vmatprep.mubr.msk.f32.mxu1 %vm4766_vm0, %v7806_v5 }
 0x24e   : > { %4141 = vmatmul.mubr.f32.gmra.mrb[42].mxu1 %v2108_v30 }
 0x24f   : > { %4143 = vmatprep.mubr.msk.f32.mxu1 %vm4766_vm0, %v7806_v5 }
 0x252   : > { %4144 = vmatmul.mubr.f32.gmra.mrb[44].mxu1 %v2113_v57 }
 0x253   : > { %4146 = vmatprep.mubr.msk.f32.mxu1 %vm4766_vm0, %v7806_v5 }
 0x256   : > { %4147 = vmatmul.mubr.f32.gmra.mrb[46].mxu1 %v2118_v53 }
 0x257   : > { %4149 = vmatprep.mubr.msk.f32.mxu1 %vm4766_vm0, %v7806_v5 }
 0x25a   : > { %4150 = vmatmul.mubr.f32.gmra.mrb[48].mxu1 %v2123_v3 }
 0x25b   : > { %4152 = vmatprep.mubr.msk.f32.mxu1 %vm4766_vm0, %v7806_v5 }
 0x25c   : > { %v2235_v17 = vpop.f32.mrb[8].mxu1 }
 0x25d   : > { %v7153_v8 = vadd.f32 %v6949_v19, %v2235_v17  ;;  %v4016_v10 = vpop.f32.mrb[9].mxu1  ;;  %v2678_v19 = vld [vmem:[%s7646_s7 + $0x8] sm:$0xff] }
 0x25e   : > { %4153 = vmatmul.mubr.f32.gmra.mrb[50].mxu1 %v2128_v42  ;;  %v4372_v27 = vpack.c.bf16 %v2678_v19, %v2677_v45 }
 0x25f   : > { %4184 = vmatprep.mubr.msk.f32.mxu1 %vm4766_vm0, %v7806_v5 }
 0x260   : > { %4373 = vmatpush3.bf16.msra.mxu0 %v4372_v27  ;;  %4391 = vmatpush3.bf16.msra.mxu1 %v4372_v27 }
 0x261   : > { %4374 = vmatprep.subr.bf16.mxu0 %v7926_v7  ;;  %4390 = vmatprep.subr.bf16.mxu1 %v7926_v7 }
 0x271   : > { %v2240_v23 = vpop.f32.mrb[10].mxu1 }
 0x272   : > { %v7158_v22 = vadd.f32 %v7018_v4, %v2240_v23  ;;  %v4019_v20 = vpop.f32.mrb[11].mxu1  ;;  %v2680_v4 = vld [vmem:[%s7646_s7 + $0x18] sm:$0xff] }
 0x273   : > { %v4375_v33 = vpack.c.bf16 %v2680_v4, %v2679_v29 }
 0x275   : > { %4376 = vmatpush3.bf16.msra.mxu0 %v4375_v33  ;;  %4392 = vmatpush3.bf16.msra.mxu1 %v4375_v33 }
 0x276   : > { %4377 = vmatprep.subr.bf16.mxu1 %v7926_v7  ;;  %4383 = vmatprep.subr.bf16.mxu0 %v7926_v7 }
 0x283   : > { %v2245_v24 = vpop.f32.mrb[12].mxu1 }
 0x284   : > { %v7175_v14 = vadd.f32 %v7069_v6, %v2245_v24  ;;  %v4022_v49 = vpop.f32.mrb[13].mxu1 }
 0x29b   : > { %v2250_v40 = vpop.f32.mrb[14].mxu1 }
 0x29c   : > { %v7180_v50 = vadd.f32 %v7092_v48, %v2250_v40  ;;  %v4025_v44 = vpop.f32.mrb[15].mxu1  ;;  %v2597_v48 = vsub.s32 4, %v7931_v58 }
 0x29e   : > { %v7195_v18 = vrot.slane %v7101_v63, %v2597_v48 }
 0x2a9   : > { %v2255_v0 = vpop.f32.mrb[16].mxu1 }
 0x2aa   : > { %v7183_v36 = vadd.f32 %v7105_v60, %v2255_v0  ;;  %v4028_v61 = vpop.f32.mrb[17].mxu1 }
 0x2c3   : > { %v2260_v26 = vpop.f32.mrb[18].mxu1 }
 0x2c4   : > { %v7185_v6 = vadd.f32 %v2417_v51, %v2260_v26  ;;  %v4031_v1 = vpop.f32.mrb[19].mxu1 }
 0x2d8   : > { %v2265_v16 = vpop.f32.mrb[20].mxu1 }
 0x2d9   : > { %v7187_v43 = vadd.f32 %v2422_v62, %v2265_v16  ;;  %v4034_v11 = vpop.f32.mrb[21].mxu1 }
 0x2eb   : > { %v2270_v32 = vpop.f32.mrb[22].mxu1 }
 0x2ec   : > { %v7189_v59 = vadd.f32 %v2427_v54, %v2270_v32  ;;  %v4037_v15 = vpop.f32.mrb[23].mxu1 }
 0x2fd   : > { %v2275_v21 = vpop.f32.mrb[24].mxu1 }
 0x2fe   : > { %v7192_v41 = vadd.f32 %v2432_v35, %v2275_v21  ;;  %v4040_v60 = vpop.f32.mrb[25].mxu1 }
 0x301   : > { %v2518_v47 = vpop.f32.mrb[26].mxu1 }
 0x302   : > { %v2582_v55 = vadd.f32 %v2518_v47, %v7084_v13  ;;  %v4118_v56 = vpop.f32.mrb[27].mxu1 }
 0x304   : > { %v2599_v31 = vadd.f32 %v7195_v18, %v2582_v55 }
 0x305   : > { %v2523_v12 = vpop.f32.mrb[28].mxu1 }
 0x306   : > { %v2625_v51 = vmul.f32 0.70710677, %v2599_v31  ;;  %v2583_v34 = vadd.f32 %v2523_v12, %v7096_v39  ;;  %v4121_v28 = vpop.f32.mrb[29].mxu1  ;;  %v2612_v20 = vmul.f32 0.5, %v2599_v31 }
 0x308   : > { %4581 = verf.f32 %v2625_v51  ;;  %v2600_v2 = vadd.f32 %v7195_v18, %v2583_v34 }
 0x309   : > { %v2528_v38 = vpop.f32.mrb[30].mxu1 }
 0x30a   : > { %v2626_v30 = vmul.f32 0.70710677, %v2600_v2  ;;  %v2584_v57 = vadd.f32 %v2528_v38, %v7117_v46  ;;  %v4124_v53 = vpop.f32.mrb[31].mxu1  ;;  %v2613_v4 = vmul.f32 0.5, %v2600_v2 }
 0x30c   : > { %4583 = verf.f32 %v2626_v30  ;;  %v2601_v3 = vadd.f32 %v7195_v18, %v2584_v57 }
 0x30d   : > { %v2533_v13 = vpop.f32.mrb[32].mxu1 }
 0x30e   : > { %v2627_v62 = vmul.f32 0.70710677, %v2601_v3  ;;  %v2585_v25 = vadd.f32 %v2533_v13, %v7135_v37  ;;  %v4127_v42 = vpop.f32.mrb[33].mxu1  ;;  %v2614_v26 = vmul.f32 0.5, %v2601_v3 }
 0x310   : > { %4585 = verf.f32 %v2627_v62  ;;  %v2602_v39 = vadd.f32 %v7195_v18, %v2585_v25 }
 0x311   : > { %v2538_v17 = vpop.f32.mrb[34].mxu1 }
 0x312   : > { %v4582_v10 = vpop.eup %4581  ;;  %v2628_v54 = vmul.f32 0.70710677, %v2602_v39  ;;  %v2586_v52 = vadd.f32 %v2538_v17, %v7153_v8  ;;  %v4130_v23 = vpop.f32.mrb[35].mxu1  ;;  %v2615_v60 = vmul.f32 0.5, %v2602_v39 }
 0x313   : > { %v2651_v46 = vadd.f32 1.0, %v4582_v10 }
 0x314   : > { %4587 = verf.f32 %v2628_v54  ;;  %v2603_v35 = vadd.f32 %v7195_v18, %v2586_v52 }
 0x315   : > { %v2664_v45 = vmul.f32 %v2651_v46, %v2612_v20  ;;  %v2543_v19 = vpop.f32.mrb[36].mxu1 }
 0x316   : > { %v4584_v29 = vpop.eup %4583  ;;  %v2629_v37 = vmul.f32 0.70710677, %v2603_v35  ;;  %v2587_v9 = vadd.f32 %v2543_v19, %v7158_v22  ;;  %v4133_v27 = vpop.f32.mrb[37].mxu1  ;;  %v2616_v28 = vmul.f32 0.5, %v2603_v35 }
 0x317   : > { %v2652_v33 = vadd.f32 1.0, %v4584_v29  ;;  %4164 = vmatmul.mubr.msk.f32.vlgmr.msra.gmra.mrb[52].mxu0 %vm2685_vm2, %v2664_v45  ;;  %v2920_v45 = vld [vmem:[%s7647_s8] sm:$0xff] }
 0x318   : > { %4589 = verf.f32 %v2629_v37  ;;  %v2604_v8 = vadd.f32 %v7195_v18, %v2587_v9  ;;  %4166 = vmatprep.mubr.msk.f32.mxu0 %vm4766_vm0, %v7806_v5 }
 0x319   : > { %v2665_v24 = vmul.f32 %v2652_v33, %v2613_v4  ;;  %v2548_v49 = vpop.f32.mrb[38].mxu1 }
 0x31a   : > { %v4586_v40 = vpop.eup %4585  ;;  %v2630_v44 = vmul.f32 0.70710677, %v2604_v8  ;;  %v2588_v0 = vadd.f32 %v2548_v49, %v7175_v14  ;;  %v4136_v61 = vpop.f32.mrb[39].mxu1  ;;  %v2617_v62 = vmul.f32 0.5, %v2604_v8 }
 0x31b   : > { %v2653_v22 = vadd.f32 1.0, %v4586_v40  ;;  %4167 = vmatmul.mubr.msk.f32.gmra.mrb[54].mxu0 %vm2685_vm2, %v2665_v24 }
 0x31c   : > { %4591 = verf.f32 %v2630_v44  ;;  %v2605_v1 = vadd.f32 %v7195_v18, %v2588_v0  ;;  %4169 = vmatprep.mubr.msk.f32.mxu0 %vm4766_vm0, %v7806_v5 }
 0x31d   : > { %v2666_v16 = vmul.f32 %v2653_v22, %v2614_v26  ;;  %v2553_v11 = vpop.f32.mrb[40].mxu1 }
 0x31e   : > { %v4588_v32 = vpop.eup %4587  ;;  %v2631_v15 = vmul.f32 0.70710677, %v2605_v1  ;;  %v2589_v48 = vadd.f32 %v2553_v11, %v7180_v50  ;;  %v4139_v21 = vpop.f32.mrb[41].mxu1  ;;  %v2618_v23 = vmul.f32 0.5, %v2605_v1 }
 0x31f   : > { %v2654_v14 = vadd.f32 1.0, %v4588_v32  ;;  %4170 = vmatmul.mubr.msk.f32.gmra.mrb[56].mxu0 %vm2685_vm2, %v2666_v16 }
 0x320   : > { %4593 = verf.f32 %v2631_v15  ;;  %v2606_v47 = vadd.f32 %v7195_v18, %v2589_v48  ;;  %4172 = vmatprep.mubr.msk.f32.mxu0 %vm4766_vm0, %v7806_v5 }
 0x321   : > { %v2667_v55 = vmul.f32 %v2654_v14, %v2615_v60  ;;  %v2558_v56 = vpop.f32.mrb[42].mxu1 }
 0x322   : > { %v4590_v31 = vpop.eup %4589  ;;  %v2632_v12 = vmul.f32 0.70710677, %v2606_v47  ;;  %v2590_v51 = vadd.f32 %v2558_v56, %v7183_v36  ;;  %v4142_v34 = vpop.f32.mrb[43].mxu1  ;;  %v2619_v27 = vmul.f32 0.5, %v2606_v47 }
 0x323   : > { %v2655_v50 = vadd.f32 1.0, %v4590_v31  ;;  %4173 = vmatmul.mubr.msk.f32.gmra.mrb[58].mxu0 %vm2685_vm2, %v2667_v55 }
 0x324   : > { %4595 = verf.f32 %v2632_v12  ;;  %v2607_v2 = vadd.f32 %v7195_v18, %v2590_v51  ;;  %4175 = vmatprep.mubr.msk.f32.mxu0 %vm4766_vm0, %v7806_v5 }
 0x325   : > { %v2668_v38 = vmul.f32 %v2655_v50, %v2616_v28  ;;  %v2563_v30 = vpop.f32.mrb[44].mxu1  ;;  %v2922_v28 = vld [vmem:[%s7647_s8 + $0x10] sm:$0xff]  ;;  %v2923_v50 = vld [vmem:[%s7647_s8 + $0x18] sm:$0xff] }
 0x326   : > { %v4592_v57 = vpop.eup %4591  ;;  %v2633_v53 = vmul.f32 0.70710677, %v2607_v2  ;;  %v2591_v3 = vadd.f32 %v2563_v30, %v7185_v6  ;;  %v4145_v13 = vpop.f32.mrb[45].mxu1 }
 0x327   : > { %v2656_v36 = vadd.f32 1.0, %v4592_v57  ;;  %4176 = vmatmul.mubr.msk.f32.gmra.mrb[60].mxu0 %vm2685_vm2, %v2668_v38  ;;  %v2683_v38 = vsub.s32 5, %v7931_v58 }
 0x328   : > { %4597 = verf.f32 %v2633_v53  ;;  %v2608_v25 = vadd.f32 %v7195_v18, %v2591_v3  ;;  %4178 = vmatprep.mubr.msk.f32.mxu0 %vm4766_vm0, %v7806_v5 }
 0x329   : > { %v2669_v42 = vmul.f32 %v2656_v36, %v2617_v62  ;;  %v2568_v39 = vpop.f32.mrb[46].mxu1  ;;  %v7277_v30 = vrot.slane %v7101_v63, %v2683_v38 }
 0x32a   : > { %v4594_v17 = vpop.eup %4593  ;;  %v2634_v10 = vmul.f32 0.70710677, %v2608_v25  ;;  %v2592_v54 = vadd.f32 %v2568_v39, %v7187_v43  ;;  %v4148_v52 = vpop.f32.mrb[47].mxu1  ;;  %v2921_v43 = vld [vmem:[%s7647_s8 + $0x8] sm:$0xff]  ;;  %v2621_v32 = vmul.f32 0.5, %v2608_v25 }
 0x32b   : > { %v2657_v6 = vadd.f32 1.0, %v4594_v17  ;;  %4179 = vmatmul.mubr.msk.f32.gmra.mrb[62].mxu0 %vm2685_vm2, %v2669_v42  ;;  %v4378_v8 = vpack.c.bf16 %v2921_v43, %v2920_v45 }
 0x32c   : > { %4599 = verf.f32 %v2634_v10  ;;  %v2609_v20 = vadd.f32 %v7195_v18, %v2592_v54  ;;  %4181 = vmatprep.mubr.msk.f32.mxu0 %vm4766_vm0, %v7806_v5 }
 0x32d   : > { %v2670_v46 = vmul.f32 %v2657_v6, %v2618_v23  ;;  %v2573_v35 = vpop.f32.mrb[48].mxu1 }
 0x32e   : > { %v4596_v19 = vpop.eup %4595  ;;  %v2635_v29 = vmul.f32 0.70710677, %v2609_v20  ;;  %v2593_v37 = vadd.f32 %v2573_v35, %v7189_v59  ;;  %v4151_v9 = vpop.f32.mrb[49].mxu1  ;;  %v2620_v59 = vmul.f32 0.5, %v2607_v2  ;;  %v4381_v2 = vpack.c.bf16 %v2923_v50, %v2922_v28 }
 0x32f   : > { %v2658_v4 = vadd.f32 1.0, %v4596_v19  ;;  %4182 = vmatmul.mubr.msk.f32.gmra.mrb[64].mxu0 %vm2685_vm2, %v2670_v46 }
 0x330   : > { %4601 = verf.f32 %v2635_v29  ;;  %v2610_v33 = vadd.f32 %v7195_v18, %v2593_v37  ;;  %4257 = vmatprep.mubr.msk.f32.mxu0 %vm4766_vm0, %v7806_v5 }
 0x331   : > { %v2671_v24 = vmul.f32 %v2658_v4, %v2619_v27  ;;  %v2578_v49 = vpop.f32.mrb[50].mxu1 }
 0x332   : > { %v4598_v40 = vpop.eup %4597  ;;  %v2636_v44 = vmul.f32 0.70710677, %v2610_v33  ;;  %v2594_v0 = vadd.f32 %v2578_v49, %v7192_v41  ;;  %v4154_v61 = vpop.f32.mrb[51].mxu1  ;;  %v2623_v47 = vmul.f32 0.5, %v2610_v33 }
 0x333   : > { %v2659_v26 = vadd.f32 1.0, %v4598_v40  ;;  %4185 = vmatmul.mubr.msk.f32.vlgmr.msra.gmra.mrb[52].mxu1 %vm2685_vm2, %v2671_v24 }
 0x334   : > { %4603 = verf.f32 %v2636_v44  ;;  %v2611_v22 = vadd.f32 %v7195_v18, %v2594_v0  ;;  %4187 = vmatprep.mubr.msk.f32.mxu1 %vm4766_vm0, %v7806_v5  ;;  %4379 = vmatpush3.bf16.msra.mxu1 %v4378_v8  ;;  %v2622_v18 = vmul.f32 0.5, %v2609_v20 }
 0x335   : > { %v2672_v1 = vmul.f32 %v2659_v26, %v2620_v59  ;;  %4380 = vmatprep.subr.bf16.mxu1 %v7926_v7 }
 0x336   : > { %v4600_v16 = vpop.eup %4599  ;;  %v2637_v11 = vmul.f32 0.70710677, %v2611_v22  ;;  %v2624_v12 = vmul.f32 0.5, %v2611_v22 }
 0x337   : > { %v2660_v15 = vadd.f32 1.0, %v4600_v16  ;;  %4188 = vmatmul.mubr.msk.f32.gmra.mrb[54].mxu1 %vm2685_vm2, %v2672_v1 }
 0x338   : > { %4605 = verf.f32 %v2637_v11  ;;  %4190 = vmatprep.mubr.msk.f32.mxu1 %vm4766_vm0, %v7806_v5  ;;  %4382 = vmatpush3.bf16.msra.mxu1 %v4381_v2 }
 0x339   : > { %v2673_v41 = vmul.f32 %v2660_v15, %v2621_v32 }
 0x33a   : > { %v4602_v48 = vpop.eup %4601 }
 0x33b   : > { %v2661_v21 = vadd.f32 1.0, %v4602_v48  ;;  %4191 = vmatmul.mubr.msk.f32.gmra.mrb[56].mxu1 %vm2685_vm2, %v2673_v41 }
 0x33c   : > { %4193 = vmatprep.mubr.msk.f32.mxu1 %vm4766_vm0, %v7806_v5 }
 0x33d   : > { %v2674_v60 = vmul.f32 %v2661_v21, %v2622_v18 }
 0x33e   : > { %v4604_v14 = vpop.eup %4603 }
 0x33f   : > { %v2662_v55 = vadd.f32 1.0, %v4604_v14  ;;  %4194 = vmatmul.mubr.msk.f32.gmra.mrb[58].mxu1 %vm2685_vm2, %v2674_v60 }
 0x340   : > { %4196 = vmatprep.mubr.msk.f32.mxu1 %vm4766_vm0, %v7806_v5 }
 0x341   : > { %v2675_v56 = vmul.f32 %v2662_v55, %v2623_v47 }
 0x342   : > { %v4606_v31 = vpop.eup %4605 }
 0x343   : > { %v2663_v51 = vadd.f32 1.0, %v4606_v31  ;;  %4197 = vmatmul.mubr.msk.f32.gmra.mrb[60].mxu1 %vm2685_vm2, %v2675_v56 }
 0x344   : > { %4199 = vmatprep.mubr.msk.f32.mxu1 %vm4766_vm0, %v7806_v5 }
 0x345   : > { %v2676_v34 = vmul.f32 %v2663_v51, %v2624_v12 }
 0x347   : > { %4200 = vmatmul.mubr.msk.f32.gmra.mrb[62].mxu1 %vm2685_vm2, %v2676_v34 }
 0x348   : > { %4210 = vmatprep.mubr.msk.f32.mxu1 %vm4766_vm0, %v7806_v5 }
 0x3ea   : > { %v2791_v57 = vpop.f32.mrb[52].mxu0 }
 0x3eb   : > { %v2792_v53 = vadd.f32 %v2791_v57, %v7277_v30  ;;  %v4165_v3 = vpop.f32.mrb[53].mxu0 }
 0x3ed   : > { %v2868_v13 = vmul.f32 0.70710677, %v2792_v53  ;;  %v2855_v35 = vmul.f32 0.5, %v2792_v53 }
 0x3ee   : > { %v2796_v62 = vpop.f32.mrb[54].mxu0 }
 0x3ef   : > { %4607 = verf.f32 %v2868_v13  ;;  %v2797_v36 = vadd.f32 %v2796_v62, %v7277_v30  ;;  %v4168_v25 = vpop.f32.mrb[55].mxu0 }
 0x3f1   : > { %v2869_v42 = vmul.f32 0.70710677, %v2797_v36  ;;  %v2856_v4 = vmul.f32 0.5, %v2797_v36 }
 0x3f2   : > { %v2801_v39 = vpop.f32.mrb[56].mxu0 }
 0x3f3   : > { %4609 = verf.f32 %v2869_v42  ;;  %v2802_v17 = vadd.f32 %v2801_v39, %v7277_v30  ;;  %v4171_v10 = vpop.f32.mrb[57].mxu0 }
 0x3f5   : > { %v2870_v54 = vmul.f32 0.70710677, %v2802_v17  ;;  %v2857_v61 = vmul.f32 0.5, %v2802_v17 }
 0x3f6   : > { %v2806_v52 = vpop.f32.mrb[58].mxu0 }
 0x3f7   : > { %4611 = verf.f32 %v2870_v54  ;;  %v2807_v23 = vadd.f32 %v2806_v52, %v7277_v30  ;;  %v4174_v6 = vpop.f32.mrb[59].mxu0 }
 0x3f9   : > { %v4608_v20 = vpop.eup %4607  ;;  %v2871_v46 = vmul.f32 0.70710677, %v2807_v23  ;;  %v2858_v15 = vmul.f32 0.5, %v2807_v23 }
 0x3fa   : > { %v2894_v45 = vadd.f32 1.0, %v4608_v20  ;;  %v2811_v43 = vpop.f32.mrb[60].mxu0 }
 0x3fb   : > { %4613 = verf.f32 %v2871_v46  ;;  %v2812_v19 = vadd.f32 %v2811_v43, %v7277_v30  ;;  %v4177_v29 = vpop.f32.mrb[61].mxu0 }
 0x3fc   : > { %v2907_v37 = vmul.f32 %v2894_v45, %v2855_v35 }
 0x3fd   : > { %v4610_v9 = vpop.eup %4609  ;;  %v2872_v27 = vmul.f32 0.70710677, %v2812_v19  ;;  %v2859_v55 = vmul.f32 0.5, %v2812_v19 }
 0x3fe   : > { %v2895_v33 = vadd.f32 1.0, %v4610_v9  ;;  %v2816_v8 = vpop.f32.mrb[62].mxu0  ;;  %4211 = vmatmul.mubr.msk.f32.vlgmr.msra.gmra.mrb[64].mxu1 %vm2685_vm2, %v2907_v37 }
 0x3ff   : > { %4615 = verf.f32 %v2872_v27  ;;  %v2817_v24 = vadd.f32 %v2816_v8, %v7277_v30  ;;  %v4180_v49 = vpop.f32.mrb[63].mxu0  ;;  %4213 = vmatprep.mubr.msk.f32.mxu1 %vm4766_vm0, %v7806_v5 }
 0x400   : > { %v2908_v40 = vmul.f32 %v2895_v33, %v2856_v4 }
 0x401   : > { %v4612_v44 = vpop.eup %4611  ;;  %v2873_v0 = vmul.f32 0.70710677, %v2817_v24  ;;  %v2860_v2 = vmul.f32 0.5, %v2817_v24 }
 0x402   : > { %v2896_v59 = vadd.f32 1.0, %v4612_v44  ;;  %v2821_v26 = vpop.f32.mrb[64].mxu0  ;;  %4214 = vmatmul.mubr.msk.f32.gmra.mrb[66].mxu1 %vm2685_vm2, %v2908_v40 }
 0x403   : > { %4617 = verf.f32 %v2873_v0  ;;  %v2822_v22 = vadd.f32 %v2821_v26, %v7277_v30  ;;  %v4183_v1 = vpop.f32.mrb[65].mxu0  ;;  %4216 = vmatprep.mubr.msk.f32.mxu1 %vm4766_vm0, %v7806_v5 }
 0x404   : > { %v2909_v16 = vmul.f32 %v2896_v59, %v2857_v61 }
 0x405   : > { %v4614_v11 = vpop.eup %4613  ;;  %v2874_v32 = vmul.f32 0.70710677, %v2822_v22  ;;  %v2861_v25 = vmul.f32 0.5, %v2822_v22 }
 0x406   : > { %v2897_v41 = vadd.f32 1.0, %v4614_v11  ;;  %v2826_v48 = vpop.f32.mrb[52].mxu1  ;;  %4217 = vmatmul.mubr.msk.f32.gmra.mrb[68].mxu1 %vm2685_vm2, %v2909_v16 }
 0x407   : > { %4619 = verf.f32 %v2874_v32  ;;  %v2827_v18 = vadd.f32 %v2826_v48, %v7277_v30  ;;  %v4186_v21 = vpop.f32.mrb[53].mxu1  ;;  %4219 = vmatprep.mubr.msk.f32.mxu1 %vm4766_vm0, %v7806_v5 }
 0x408   : > { %v2910_v60 = vmul.f32 %v2897_v41, %v2858_v15 }
 0x409   : > { %v4616_v14 = vpop.eup %4615  ;;  %v2875_v47 = vmul.f32 0.70710677, %v2827_v18  ;;  %v2862_v6 = vmul.f32 0.5, %v2827_v18  ;;  %v2926_v18 = vsub.s32 6, %v7931_v58 }
 0x40a   : > { %v2898_v56 = vadd.f32 1.0, %v4616_v14  ;;  %v2831_v31 = vpop.f32.mrb[54].mxu1  ;;  %4220 = vmatmul.mubr.msk.f32.gmra.mrb[70].mxu1 %vm2685_vm2, %v2910_v60 }
 0x40b   : > { %4621 = verf.f32 %v2875_v47  ;;  %v2832_v12 = vadd.f32 %v2831_v31, %v7277_v30  ;;  %v4189_v51 = vpop.f32.mrb[55].mxu1  ;;  %4222 = vmatprep.mubr.msk.f32.mxu1 %vm4766_vm0, %v7806_v5  ;;  %v2927_v21 = vrot.slane %v7101_v63, %v2926_v18 }
 0x40c   : > { %v2911_v34 = vmul.f32 %v2898_v56, %v2859_v55 }
 0x40d   : > { %v4618_v28 = vpop.eup %4617  ;;  %v2876_v50 = vmul.f32 0.70710677, %v2832_v12  ;;  %v2863_v37 = vmul.f32 0.5, %v2832_v12 }
 0x40e   : > { %v2899_v38 = vadd.f32 1.0, %v4618_v28  ;;  %v2836_v57 = vpop.f32.mrb[56].mxu1  ;;  %4223 = vmatmul.mubr.msk.f32.gmra.mrb[72].mxu1 %vm2685_vm2, %v2911_v34 }
 0x40f   : > { %4623 = verf.f32 %v2876_v50  ;;  %v2837_v53 = vadd.f32 %v2836_v57, %v7277_v30  ;;  %v4192_v3 = vpop.f32.mrb[57].mxu1  ;;  %4225 = vmatprep.mubr.msk.f32.mxu1 %vm4766_vm0, %v7806_v5 }
 0x410   : > { %v2912_v13 = vmul.f32 %v2899_v38, %v2860_v2 }
 0x411   : > { %v4620_v62 = vpop.eup %4619  ;;  %v2877_v36 = vmul.f32 0.70710677, %v2837_v53  ;;  %v2864_v40 = vmul.f32 0.5, %v2837_v53 }
 0x412   : > { %v2900_v42 = vadd.f32 1.0, %v4620_v62  ;;  %v2841_v39 = vpop.f32.mrb[58].mxu1  ;;  %4226 = vmatmul.mubr.msk.f32.gmra.mrb[74].mxu1 %vm2685_vm2, %v2912_v13 }
 0x413   : > { %4625 = verf.f32 %v2877_v36  ;;  %v2842_v17 = vadd.f32 %v2841_v39, %v7277_v30  ;;  %v4195_v10 = vpop.f32.mrb[59].mxu1  ;;  %4228 = vmatprep.mubr.msk.f32.mxu1 %vm4766_vm0, %v7806_v5 }
 0x414   : > { %v2913_v54 = vmul.f32 %v2900_v42, %v2861_v25 }
 0x415   : > { %v4622_v52 = vpop.eup %4621  ;;  %v2878_v23 = vmul.f32 0.70710677, %v2842_v17  ;;  %v2865_v59 = vmul.f32 0.5, %v2842_v17 }
 0x416   : > { %v2901_v20 = vadd.f32 1.0, %v4622_v52  ;;  %v2846_v46 = vpop.f32.mrb[60].mxu1  ;;  %4229 = vmatmul.mubr.msk.f32.gmra.mrb[76].mxu1 %vm2685_vm2, %v2913_v54 }
 0x417   : > { %4627 = verf.f32 %v2878_v23  ;;  %v2847_v35 = vadd.f32 %v2846_v46, %v7277_v30  ;;  %v4198_v45 = vpop.f32.mrb[61].mxu1  ;;  %4231 = vmatprep.mubr.msk.f32.mxu1 %vm4766_vm0, %v7806_v5 }
 0x418   : > { %v2914_v43 = vmul.f32 %v2901_v20, %v2862_v6 }
 0x419   : > { %v4624_v19 = vpop.eup %4623  ;;  %v2879_v29 = vmul.f32 0.70710677, %v2847_v35  ;;  %v2866_v1 = vmul.f32 0.5, %v2847_v35 }
 0x41a   : > { %v2902_v9 = vadd.f32 1.0, %v4624_v19  ;;  %v2851_v27 = vpop.f32.mrb[62].mxu1  ;;  %4232 = vmatmul.mubr.msk.f32.gmra.mrb[78].mxu1 %vm2685_vm2, %v2914_v43 }
 0x41b   : > { %4629 = verf.f32 %v2879_v29  ;;  %v2852_v4 = vadd.f32 %v2851_v27, %v7277_v30  ;;  %v4201_v33 = vpop.f32.mrb[63].mxu1  ;;  %4234 = vmatprep.mubr.msk.f32.mxu1 %vm4766_vm0, %v7806_v5 }
 0x41c   : > { %v2915_v8 = vmul.f32 %v2902_v9, %v2863_v37 }
 0x41d   : > { %v4626_v24 = vpop.eup %4625  ;;  %v2880_v49 = vmul.f32 0.70710677, %v2852_v4  ;;  %v2867_v15 = vmul.f32 0.5, %v2852_v4 }
 0x41e   : > { %v2903_v44 = vadd.f32 1.0, %v4626_v24  ;;  %4235 = vmatmul.mubr.msk.f32.gmra.mrb[80].mxu1 %vm2685_vm2, %v2915_v8 }
 0x41f   : > { %4631 = verf.f32 %v2880_v49  ;;  %4237 = vmatprep.mubr.msk.f32.mxu1 %vm4766_vm0, %v7806_v5 }
 0x420   : > { %v2916_v0 = vmul.f32 %v2903_v44, %v2864_v40 }
 0x421   : > { %v4628_v61 = vpop.eup %4627 }
 0x422   : > { %v2904_v26 = vadd.f32 1.0, %v4628_v61  ;;  %4238 = vmatmul.mubr.msk.f32.gmra.mrb[82].mxu1 %vm2685_vm2, %v2916_v0 }
 0x423   : > { %4240 = vmatprep.mubr.msk.f32.mxu1 %vm4766_vm0, %v7806_v5 }
 0x424   : > { %v2917_v30 = vmul.f32 %v2904_v26, %v2865_v59 }
 0x425   : > { %v4630_v22 = vpop.eup %4629 }
 0x426   : > { %v2905_v16 = vadd.f32 1.0, %v4630_v22  ;;  %4241 = vmatmul.mubr.msk.f32.gmra.mrb[84].mxu1 %vm2685_vm2, %v2917_v30 }
 0x427   : > { %4243 = vmatprep.mubr.msk.f32.mxu1 %vm4766_vm0, %v7806_v5 }
 0x428   : > { %v2918_v11 = vmul.f32 %v2905_v16, %v2866_v1 }
 0x429   : > { %v4632_v32 = vpop.eup %4631 }
 0x42a   : > { %v2906_v41 = vadd.f32 1.0, %v4632_v32  ;;  %4244 = vmatmul.mubr.msk.f32.gmra.mrb[86].mxu1 %vm2685_vm2, %v2918_v11 }
 0x42b   : > { %4246 = vmatprep.mubr.msk.f32.mxu1 %vm4766_vm0, %v7806_v5 }
 0x42c   : > { %v2919_v48 = vmul.f32 %v2906_v41, %v2867_v15 }
 0x42e   : > { %4247 = vmatmul.mubr.msk.f32.gmra.mrb[88].mxu1 %vm2685_vm2, %v2919_v48 }
 0x4d1   : > { %v3033_v60 = vpop.f32.mrb[64].mxu1 }
 0x4d2   : > { %v7331_v14 = vadd.f32 %v3033_v60, %v2927_v21  ;;  %v4212_v47 = vpop.f32.mrb[65].mxu1 }
 0x4d4   : > { %v3097_v55 = vsel %vm2685_vm2, %v7331_v14, 0.0 }
 0x4d5   : > { %3098 = vadd.xlane.f32.xlu1 %v3097_v55  ;;  %v3038_v56 = vpop.f32.mrb[66].mxu1 }
 0x4d6   : > { %v7335_v31 = vadd.f32 %v3038_v56, %v2927_v21  ;;  %v4215_v12 = vpop.f32.mrb[67].mxu1 }
 0x4d8   : > { %v3100_v51 = vsel %vm2685_vm2, %v7335_v31, 0.0 }
 0x4d9   : > { %3101 = vadd.xlane.f32.xlu0 %v3100_v51  ;;  %v3043_v34 = vpop.f32.mrb[68].mxu1 }
 0x4da   : > { %v7339_v28 = vadd.f32 %v3043_v34, %v2927_v21  ;;  %v4218_v63 = vpop.f32.mrb[69].mxu1 }
 0x4dc   : > { %v3103_v50 = vsel %vm2685_vm2, %v7339_v28, 0.0 }
 0x4dd   : > { %3104 = vadd.xlane.f32.xlu0 %v3103_v50  ;;  %v3048_v2 = vpop.f32.mrb[70].mxu1 }
 0x4de   : > { %v7343_v38 = vadd.f32 %v3048_v2, %v2927_v21  ;;  %v4221_v57 = vpop.f32.mrb[71].mxu1 }
 0x4e0   : > { %v3106_v53 = vsel %vm2685_vm2, %v7343_v38, 0.0 }
 0x4e1   : > { %3107 = vadd.xlane.f32.xlu1 %v3106_v53  ;;  %v3053_v3 = vpop.f32.mrb[72].mxu1 }
 0x4e2   : > { %v7347_v13 = vadd.f32 %v3053_v3, %v2927_v21  ;;  %v4224_v62 = vpop.f32.mrb[73].mxu1 }
 0x4e4   : > { %v3109_v36 = vsel %vm2685_vm2, %v7347_v13, 0.0 }
 0x4e5   : > { %3110 = vadd.xlane.f32.xlu0 %v3109_v36  ;;  %v3058_v25 = vpop.f32.mrb[74].mxu1 }
 0x4e6   : > { %v7351_v42 = vadd.f32 %v3058_v25, %v2927_v21  ;;  %v4227_v39 = vpop.f32.mrb[75].mxu1 }
 0x4e8   : > { %v3112_v17 = vsel %vm2685_vm2, %v7351_v42, 0.0 }
 0x4e9   : > { %3113 = vadd.xlane.f32.xlu1 %v3112_v17  ;;  %v3063_v10 = vpop.f32.mrb[76].mxu1 }
 0x4ea   : > { %v7355_v54 = vadd.f32 %v3063_v10, %v2927_v21  ;;  %v4230_v52 = vpop.f32.mrb[77].mxu1 }
 0x4ec   : > { %v3115_v23 = vsel %vm2685_vm2, %v7355_v54, 0.0 }
 0x4ed   : > { %3116 = vadd.xlane.f32.xlu0 %v3115_v23  ;;  %v3068_v6 = vpop.f32.mrb[78].mxu1 }
 0x4ee   : > { %v7359_v20 = vadd.f32 %v3068_v6, %v2927_v21  ;;  %v4233_v46 = vpop.f32.mrb[79].mxu1 }
 0x4f0   : > { %v3118_v35 = vsel %vm2685_vm2, %v7359_v20, 0.0 }
 0x4f1   : > { %3119 = vadd.xlane.f32.xlu1 %v3118_v35  ;;  %v3073_v45 = vpop.f32.mrb[80].mxu1 }
 0x4f2   : > { %v7363_v43 = vadd.f32 %v3073_v45, %v2927_v21  ;;  %v4236_v19 = vpop.f32.mrb[81].mxu1 }
 0x4f4   : > { %v3121_v29 = vsel %vm2685_vm2, %v7363_v43, 0.0 }
 0x4f5   : > { %3122 = vadd.xlane.f32.xlu0 %v3121_v29  ;;  %v3078_v37 = vpop.f32.mrb[82].mxu1 }
 0x4f6   : > { %v7367_v9 = vadd.f32 %v3078_v37, %v2927_v21  ;;  %v4239_v27 = vpop.f32.mrb[83].mxu1 }
 0x4f8   : > { %v3124_v4 = vsel %vm2685_vm2, %v7367_v9, 0.0 }
 0x4f9   : > { %3125 = vadd.xlane.f32.xlu1 %v3124_v4  ;;  %v3083_v33 = vpop.f32.mrb[84].mxu1 }
 0x4fa   : > { %v7371_v8 = vadd.f32 %v3083_v33, %v2927_v21  ;;  %v4242_v24 = vpop.f32.mrb[85].mxu1 }
 0x4fc   : > { %v3127_v49 = vsel %vm2685_vm2, %v7371_v8, 0.0 }
 0x4fd   : > { %3128 = vadd.xlane.f32.xlu0 %v3127_v49  ;;  %v3088_v40 = vpop.f32.mrb[86].mxu1 }
 0x4fe   : > { %v7375_v44 = vadd.f32 %v3088_v40, %v2927_v21  ;;  %v4245_v0 = vpop.f32.mrb[87].mxu1 }
 0x500   : > { %v3130_v61 = vsel %vm2685_vm2, %v7375_v44, 0.0 }
 0x501   : > { %3131 = vadd.xlane.f32.xlu1 %v3130_v61  ;;  %v3093_v59 = vpop.f32.mrb[88].mxu1 }
 0x502   : > { %v7379_v26 = vadd.f32 %v3093_v59, %v2927_v21  ;;  %v4248_v30 = vpop.f32.mrb[89].mxu1 }
 0x503   : > { %v3366_v30 = vld [vmem:[%s7648_s9] sm:$0xff] }
 0x504   : > { %v3133_v22 = vsel %vm2685_vm2, %v7379_v26, 0.0 }
 0x505   : > { %3134 = vadd.xlane.f32.xlu0 %v3133_v22  ;;  %v3367_v22 = vld [vmem:[%s7648_s9 + $0x8] sm:$0xff] }
 0x562   : > { %v3099_v1 = vpop.xlane.xlu1 %3098 }
 0x563   : > { %v3137_v16 = vmul.f32 0.03125, %v3099_v1  ;;  %v4384_v1 = vpack.c.bf16 %v3367_v22, %v3366_v30 }
 0x565   : > { %v7384_v11 = vsub.f32 %v7331_v14, %v3137_v16  ;;  %4385 = vmatpush3.bf16.msra.mxu0 %v4384_v1 }
 0x566   : > { %v3102_v32 = vpop.xlane.xlu0 %3101  ;;  %4386 = vmatprep.subr.bf16.mxu0 %v7926_v7  ;;  %v3369_v7 = vld [vmem:[%s7648_s9 + $0x18] sm:$0xff] }
 0x567   : > { %v3138_v15 = vmul.f32 0.03125, %v3102_v32  ;;  %v3163_v41 = vmul.f32 %v7384_v11, %v7384_v11 }
 0x569   : > { %v7389_v48 = vsub.f32 %v7335_v31, %v3138_v15  ;;  %v3176_v18 = vsel %vm2685_vm2, %v3163_v41, 0.0 }
 0x56a   : > { %v3105_v21 = vpop.xlane.xlu0 %3104  ;;  %3177 = vadd.xlane.f32.xlu1 %v3176_v18 }
 0x56b   : > { %v3139_v60 = vmul.f32 0.03125, %v3105_v21  ;;  %v3164_v47 = vmul.f32 %v7389_v48, %v7389_v48 }
 0x56d   : > { %v7395_v55 = vsub.f32 %v7339_v28, %v3139_v60  ;;  %v3179_v14 = vsel %vm2685_vm2, %v3164_v47, 0.0  ;;  %v3368_v47 = vld [vmem:[%s7648_s9 + $0x10] sm:$0xff] }
 0x56e   : > { %v3108_v56 = vpop.xlane.xlu1 %3107  ;;  %3180 = vadd.xlane.f32.xlu0 %v3179_v14  ;;  %v4387_v14 = vpack.c.bf16 %v3369_v7, %v3368_v47 }
 0x56f   : > { %v3140_v12 = vmul.f32 0.03125, %v3108_v56  ;;  %v3165_v31 = vmul.f32 %v7395_v55, %v7395_v55 }
 0x570   : > { %4388 = vmatpush3.bf16.msra.mxu0 %v4387_v14 }
 0x571   : > { %v7401_v51 = vsub.f32 %v7343_v38, %v3140_v12  ;;  %v3182_v34 = vsel %vm2685_vm2, %v3165_v31, 0.0 }
 0x572   : > { %v3111_v63 = vpop.xlane.xlu0 %3110  ;;  %3183 = vadd.xlane.f32.xlu1 %v3182_v34 }
 0x573   : > { %v3141_v50 = vmul.f32 0.03125, %v3111_v63  ;;  %v3166_v28 = vmul.f32 %v7401_v51, %v7401_v51 }
 0x575   : > { %v7407_v2 = vsub.f32 %v7347_v13, %v3141_v50  ;;  %v3185_v57 = vsel %vm2685_vm2, %v3166_v28, 0.0 }
 0x576   : > { %v3114_v53 = vpop.xlane.xlu1 %3113  ;;  %3186 = vadd.xlane.f32.xlu0 %v3185_v57  ;;  %v3269_v57 = vsub.s32 7, %v7931_v58 }
 0x577   : > { %v3142_v3 = vmul.f32 0.03125, %v3114_v53  ;;  %v3167_v38 = vmul.f32 %v7407_v2, %v7407_v2 }
 0x579   : > { %v7413_v62 = vsub.f32 %v7351_v42, %v3142_v3  ;;  %v3188_v36 = vsel %vm2685_vm2, %v3167_v38, 0.0  ;;  %v7478_v38 = vld [vmem:[%s7640_s1 + $0x8] sm:$0xff] }
 0x57a   : > { %v3117_v25 = vpop.xlane.xlu0 %3116  ;;  %3189 = vadd.xlane.f32.xlu1 %v3188_v36 }
 0x57b   : > { %v3143_v39 = vmul.f32 0.03125, %v3117_v25  ;;  %v3168_v13 = vmul.f32 %v7413_v62, %v7413_v62  ;;  %v4699_v25 = vld [vmem:[%s7640_s1] sm:$0xff] }
 0x57d   : > { %v7419_v17 = vsub.f32 %v7355_v54, %v3143_v39  ;;  %v3191_v10 = vsel %vm2685_vm2, %v3168_v13, 0.0  ;;  %v7483_v39 = vrot.slane %v4699_v25, %v3269_v57 }
 0x57e   : > { %v3120_v52 = vpop.xlane.xlu1 %3119  ;;  %3192 = vadd.xlane.f32.xlu0 %v3191_v10 }
 0x57f   : > { %v3144_v23 = vmul.f32 0.03125, %v3120_v52  ;;  %v3169_v42 = vmul.f32 %v7419_v17, %v7419_v17  ;;  %v7932_v52 = vsub.s32 0, %v7931_v58 }
 0x581   : > { %v7425_v6 = vsub.f32 %v7359_v20, %v3144_v23  ;;  %v3194_v46 = vsel %vm2685_vm2, %v3169_v42, 0.0  ;;  %v7488_v23 = vrot.slane %v7478_v38, %v7932_v52 }
 0x582   : > { %v3123_v35 = vpop.xlane.xlu0 %3122  ;;  %3195 = vadd.xlane.f32.xlu1 %v3194_v46 }
 0x583   : > { %v3145_v45 = vmul.f32 0.03125, %v3123_v35  ;;  %v3170_v54 = vmul.f32 %v7425_v6, %v7425_v6 }
 0x585   : > { %v7431_v19 = vsub.f32 %v7363_v43, %v3145_v45  ;;  %v3197_v29 = vsel %vm2685_vm2, %v3170_v54, 0.0 }
 0x586   : > { %v3126_v37 = vpop.xlane.xlu1 %3125  ;;  %3198 = vadd.xlane.f32.xlu0 %v3197_v29 }
 0x587   : > { %v3146_v27 = vmul.f32 0.03125, %v3126_v37  ;;  %v3171_v20 = vmul.f32 %v7431_v19, %v7431_v19 }
 0x589   : > { %v7437_v4 = vsub.f32 %v7367_v9, %v3146_v27  ;;  %v3200_v33 = vsel %vm2685_vm2, %v3171_v20, 0.0 }
 0x58a   : > { %v3129_v24 = vpop.xlane.xlu0 %3128  ;;  %3201 = vadd.xlane.f32.xlu1 %v3200_v33 }
 0x58b   : > { %v3147_v49 = vmul.f32 0.03125, %v3129_v24  ;;  %v3172_v43 = vmul.f32 %v7437_v4, %v7437_v4 }
 0x58d   : > { %v7443_v40 = vsub.f32 %v7371_v8, %v3147_v49  ;;  %v3203_v0 = vsel %vm2685_vm2, %v3172_v43, 0.0 }
 0x58e   : > { %v3132_v61 = vpop.xlane.xlu1 %3131  ;;  %3204 = vadd.xlane.f32.xlu0 %v3203_v0 }
 0x58f   : > { %v3148_v59 = vmul.f32 0.03125, %v3132_v61  ;;  %v3173_v9 = vmul.f32 %v7443_v40, %v7443_v40 }
 0x591   : > { %v7455_v8 = vsub.f32 %v7375_v44, %v3148_v59  ;;  %v3206_v16 = vsel %vm2685_vm2, %v3173_v9, 0.0 }
 0x592   : > { %3207 = vadd.xlane.f32.xlu1 %v3206_v16  ;;  %v3135_v32 = vpop.xlane.xlu0 %3134 }
 0x593   : > { %v3149_v15 = vmul.f32 0.03125, %v3135_v32  ;;  %v3174_v41 = vmul.f32 %v7455_v8, %v7455_v8 }
 0x595   : > { %v7462_v18 = vsub.f32 %v7379_v26, %v3149_v15  ;;  %v3209_v21 = vsel %vm2685_vm2, %v3174_v41, 0.0 }
 0x596   : > { %3210 = vadd.xlane.f32.xlu0 %v3209_v21 }
 0x597   : > { %v3175_v44 = vmul.f32 %v7462_v18, %v7462_v18 }
 0x599   : > { %v3212_v60 = vsel %vm2685_vm2, %v3175_v44, 0.0 }
 0x59a   : > { %3213 = vadd.xlane.f32.xlu1 %v3212_v60 }
 0x5f7   : > { %v3178_v26 = vpop.xlane.xlu1 %3177 }
 0x5f8   : > { %v3215_v56 = vmul.f32 0.03125, %v3178_v26 }
 0x5fa   : > { %v3228_v12 = vadd.f32 1e-05, %v3215_v56 }
 0x5fb   : > { %v3181_v31 = vpop.xlane.xlu0 %3180 }
 0x5fc   : > { %4633 = vrsqrt.f32 %v3228_v12  ;;  %v3216_v34 = vmul.f32 0.03125, %v3181_v31 }
 0x5fe   : > { %v3229_v63 = vadd.f32 1e-05, %v3216_v34 }
 0x5ff   : > { %v3184_v50 = vpop.xlane.xlu1 %3183 }
 0x600   : > { %4635 = vrsqrt.f32 %v3229_v63  ;;  %v3217_v28 = vmul.f32 0.03125, %v3184_v50 }
 0x602   : > { %v3230_v53 = vadd.f32 1e-05, %v3217_v28 }
 0x603   : > { %v3187_v3 = vpop.xlane.xlu0 %3186 }
 0x604   : > { %4637 = vrsqrt.f32 %v3230_v53  ;;  %v3218_v36 = vmul.f32 0.03125, %v3187_v3 }
 0x606   : > { %v4634_v13 = vpop.eup %4633  ;;  %v3231_v10 = vadd.f32 1e-05, %v3218_v36 }
 0x607   : > { %v3254_v42 = vmul.f32 %v4634_v13, %v7384_v11  ;;  %v3190_v46 = vpop.xlane.xlu1 %3189 }
 0x608   : > { %4639 = vrsqrt.f32 %v3231_v10  ;;  %v3219_v35 = vmul.f32 0.03125, %v3190_v46 }
 0x609   : > { %v3271_v45 = vmul.f32 %v7483_v39, %v3254_v42 }
 0x60a   : > { %v4636_v54 = vpop.eup %4635  ;;  %v3232_v29 = vadd.f32 1e-05, %v3219_v35 }
 0x60b   : > { %v3288_v37 = vadd.f32 %v7488_v23, %v3271_v45  ;;  %v3255_v27 = vmul.f32 %v4636_v54, %v7389_v48  ;;  %v3193_v20 = vpop.xlane.xlu0 %3192 }
 0x60c   : > { %4641 = vrsqrt.f32 %v3232_v29  ;;  %v3220_v33 = vmul.f32 0.03125, %v3193_v20 }
 0x60d   : > { %v3314_v24 = vmul.f32 0.70710677, %v3288_v37  ;;  %v3272_v49 = vmul.f32 %v7483_v39, %v3255_v27  ;;  %v3301_v34 = vmul.f32 0.5, %v3288_v37 }
 0x60e   : > { %v4638_v43 = vpop.eup %4637  ;;  %v3233_v0 = vadd.f32 1e-05, %v3220_v33 }
 0x60f   : > { %4643 = verf.f32 %v3314_v24  ;;  %v3256_v11 = vmul.f32 %v4638_v43, %v7395_v55  ;;  %v3196_v61 = vpop.xlane.xlu1 %3195  ;;  %v3289_v59 = vadd.f32 %v7488_v23, %v3272_v49 }
 0x610   : > { %4645 = vrsqrt.f32 %v3233_v0  ;;  %v3221_v9 = vmul.f32 0.03125, %v3196_v61 }
 0x611   : > { %v3315_v30 = vmul.f32 0.70710677, %v3289_v59  ;;  %v3273_v22 = vmul.f32 %v7483_v39, %v3256_v11  ;;  %v3302_v42 = vmul.f32 0.5, %v3289_v59 }
 0x612   : > { %v4640_v48 = vpop.eup %4639  ;;  %v3234_v1 = vadd.f32 1e-05, %v3221_v9 }
 0x613   : > { %v3257_v16 = vmul.f32 %v4640_v48, %v7401_v51  ;;  %v3199_v32 = vpop.xlane.xlu0 %3198  ;;  %4647 = verf.f32 %v3315_v30  ;;  %v3290_v15 = vadd.f32 %v7488_v23, %v3273_v22 }
 0x614   : > { %4649 = vrsqrt.f32 %v3234_v1  ;;  %v3222_v41 = vmul.f32 0.03125, %v3199_v32 }
 0x615   : > { %v3316_v21 = vmul.f32 0.70710677, %v3290_v15  ;;  %v3274_v55 = vmul.f32 %v7483_v39, %v3257_v16  ;;  %v3303_v49 = vmul.f32 0.5, %v3290_v15 }
 0x616   : > { %v4642_v44 = vpop.eup %4641  ;;  %v3235_v60 = vadd.f32 1e-05, %v3222_v41 }
 0x617   : > { %v3258_v47 = vmul.f32 %v4642_v44, %v7407_v2  ;;  %v3202_v7 = vpop.xlane.xlu1 %3201  ;;  %4651 = verf.f32 %v3316_v21  ;;  %v3291_v14 = vadd.f32 %v7488_v23, %v3274_v55 }
 0x618   : > { %4653 = vrsqrt.f32 %v3235_v60  ;;  %v3223_v26 = vmul.f32 0.03125, %v3202_v7 }
 0x619   : > { %v4644_v51 = vpop.eup %4643  ;;  %v3317_v56 = vmul.f32 0.70710677, %v3291_v14  ;;  %v3275_v12 = vmul.f32 %v7483_v39, %v3258_v47  ;;  %v3304_v16 = vmul.f32 0.5, %v3291_v14 }
 0x61a   : > { %v4646_v31 = vpop.eup %4645  ;;  %v3236_v63 = vadd.f32 1e-05, %v3223_v26  ;;  %v3340_v50 = vadd.f32 1.0, %v4644_v51 }
 0x61b   : > { %v3259_v28 = vmul.f32 %v4646_v31, %v7413_v62  ;;  %v3205_v57 = vpop.xlane.xlu0 %3204  ;;  %4655 = verf.f32 %v3317_v56  ;;  %v3292_v2 = vadd.f32 %v7488_v23, %v3275_v12 }
 0x61c   : > { %4657 = vrsqrt.f32 %v3236_v63  ;;  %v3224_v53 = vmul.f32 0.03125, %v3205_v57  ;;  %v3353_v3 = vmul.f32 %v3340_v50, %v3301_v34 }
 0x61d   : > { %v4648_v36 = vpop.eup %4647  ;;  %v3318_v25 = vmul.f32 0.70710677, %v3292_v2  ;;  %v3276_v13 = vmul.f32 %v7483_v39, %v3259_v28  ;;  %v3305_v14 = vmul.f32 0.5, %v3292_v2 }
 0x61e   : > { %v4650_v10 = vpop.eup %4649  ;;  %v3237_v52 = vadd.f32 1e-05, %v3224_v53  ;;  %4258 = vmatmul.mubr.msk.f32.vlgmr.msra.gmra.mrb[66].mxu0 %vm2685_vm2, %v3353_v3  ;;  %v3341_v46 = vadd.f32 1.0, %v4648_v36 }
 0x61f   : > { %v3260_v35 = vmul.f32 %v4650_v10, %v7419_v17  ;;  %v3208_v62 = vpop.xlane.xlu1 %3207  ;;  %4260 = vmatprep.mubr.msk.f32.mxu0 %vm4766_vm0, %v7806_v5  ;;  %4659 = verf.f32 %v3318_v25  ;;  %v3293_v45 = vadd.f32 %v7488_v23, %v3276_v13 }
 0x620   : > { %4661 = vrsqrt.f32 %v3237_v52  ;;  %v3225_v54 = vmul.f32 0.03125, %v3208_v62  ;;  %v3354_v29 = vmul.f32 %v3341_v46, %v3302_v42 }
 0x621   : > { %v4652_v37 = vpop.eup %4651  ;;  %v3319_v27 = vmul.f32 0.70710677, %v3293_v45  ;;  %v3277_v20 = vmul.f32 %v7483_v39, %v3260_v35  ;;  %v3306_v28 = vmul.f32 0.5, %v3293_v45 }
 0x622   : > { %v4654_v33 = vpop.eup %4653  ;;  %v3238_v24 = vadd.f32 1e-05, %v3225_v54  ;;  %4261 = vmatmul.mubr.msk.f32.gmra.mrb[68].mxu0 %vm2685_vm2, %v3354_v29  ;;  %v3342_v17 = vadd.f32 1.0, %v4652_v37 }
 0x623   : > { %v3261_v43 = vmul.f32 %v4654_v33, %v7425_v6  ;;  %v3211_v0 = vpop.xlane.xlu0 %3210  ;;  %4263 = vmatprep.mubr.msk.f32.mxu0 %vm4766_vm0, %v7806_v5  ;;  %4663 = verf.f32 %v3319_v27  ;;  %v3294_v11 = vadd.f32 %v7488_v23, %v3277_v20 }
 0x624   : > { %4665 = vrsqrt.f32 %v3238_v24  ;;  %v3226_v61 = vmul.f32 0.03125, %v3211_v0  ;;  %v3355_v59 = vmul.f32 %v3342_v17, %v3303_v49 }
 0x625   : > { %v4656_v9 = vpop.eup %4655  ;;  %v3320_v30 = vmul.f32 0.70710677, %v3294_v11  ;;  %v3278_v22 = vmul.f32 %v7483_v39, %v3261_v43  ;;  %v3307_v10 = vmul.f32 0.5, %v3294_v11 }
 0x626   : > { %v4658_v48 = vpop.eup %4657  ;;  %v3239_v1 = vadd.f32 1e-05, %v3226_v61  ;;  %4264 = vmatmul.mubr.msk.f32.gmra.mrb[70].mxu0 %vm2685_vm2, %v3355_v59  ;;  %v3343_v6 = vadd.f32 1.0, %v4656_v9 }
 0x627   : > { %v3262_v32 = vmul.f32 %v4658_v48, %v7431_v19  ;;  %v3214_v15 = vpop.xlane.xlu1 %3213  ;;  %4266 = vmatprep.mubr.msk.f32.mxu0 %vm4766_vm0, %v7806_v5  ;;  %4667 = verf.f32 %v3320_v30  ;;  %v3295_v41 = vadd.f32 %v7488_v23, %v3278_v22 }
 0x628   : > { %4669 = vrsqrt.f32 %v3239_v1  ;;  %v3227_v21 = vmul.f32 0.03125, %v3214_v15  ;;  %v3356_v55 = vmul.f32 %v3343_v6, %v3304_v16 }
 0x629   : > { %v4660_v44 = vpop.eup %4659  ;;  %v3321_v60 = vmul.f32 0.70710677, %v3295_v41  ;;  %v3279_v47 = vmul.f32 %v7483_v39, %v3262_v32  ;;  %v3308_v29 = vmul.f32 0.5, %v3295_v41 }
 0x62a   : > { %v4662_v7 = vpop.eup %4661  ;;  %v3240_v26 = vadd.f32 1e-05, %v3227_v21  ;;  %4267 = vmatmul.mubr.msk.f32.gmra.mrb[72].mxu0 %vm2685_vm2, %v3356_v55  ;;  %v3344_v19 = vadd.f32 1.0, %v4660_v44  ;;  %v7933_v44 = vsub.s32 1, %v7931_v58 }
 0x62b   : > { %v3263_v51 = vmul.f32 %v4662_v7, %v7437_v4  ;;  %4269 = vmatprep.mubr.msk.f32.mxu0 %vm4766_vm0, %v7806_v5  ;;  %4671 = verf.f32 %v3321_v60  ;;  %v3296_v56 = vadd.f32 %v7488_v23, %v3279_v47 }
 0x62c   : > { %4673 = vrsqrt.f32 %v3240_v26  ;;  %v3357_v12 = vmul.f32 %v3344_v19, %v3305_v14  ;;  %v3373_v60 = vrot.slane %v7478_v38, %v7933_v44 }
 0x62d   : > { %v4664_v31 = vpop.eup %4663  ;;  %v3322_v34 = vmul.f32 0.70710677, %v3296_v56  ;;  %v3280_v63 = vmul.f32 %v7483_v39, %v3263_v51  ;;  %v3309_v17 = vmul.f32 0.5, %v3296_v56 }
 0x62e   : > { %v4666_v50 = vpop.eup %4665  ;;  %4270 = vmatmul.mubr.msk.f32.gmra.mrb[74].mxu0 %vm2685_vm2, %v3357_v12  ;;  %v3345_v57 = vadd.f32 1.0, %v4664_v31 }
 0x62f   : > { %v3264_v2 = vmul.f32 %v4666_v50, %v7443_v40  ;;  %4272 = vmatprep.mubr.msk.f32.mxu0 %vm4766_vm0, %v7806_v5  ;;  %4675 = verf.f32 %v3322_v34  ;;  %v3297_v4 = vadd.f32 %v7488_v23, %v3280_v63 }
 0x630   : > { %v3358_v53 = vmul.f32 %v3345_v57, %v3306_v28 }
 0x631   : > { %v4668_v3 = vpop.eup %4667  ;;  %v3323_v36 = vmul.f32 0.70710677, %v3297_v4  ;;  %v3281_v25 = vmul.f32 %v7483_v39, %v3264_v2  ;;  %v3310_v59 = vmul.f32 0.5, %v3297_v4 }
 0x632   : > { %v4670_v13 = vpop.eup %4669  ;;  %4273 = vmatmul.mubr.msk.f32.gmra.mrb[76].mxu0 %vm2685_vm2, %v3358_v53  ;;  %v3346_v52 = vadd.f32 1.0, %v4668_v3 }
 0x633   : > { %v3265_v42 = vmul.f32 %v4670_v13, %v7455_v8  ;;  %4275 = vmatprep.mubr.msk.f32.mxu0 %vm4766_vm0, %v7806_v5  ;;  %4677 = verf.f32 %v3323_v36  ;;  %v3298_v40 = vadd.f32 %v7488_v23, %v3281_v25 }
 0x634   : > { %v3359_v46 = vmul.f32 %v3346_v52, %v3307_v10 }
 0x635   : > { %v4672_v35 = vpop.eup %4671  ;;  %v3324_v62 = vmul.f32 0.70710677, %v3298_v40  ;;  %v3282_v45 = vmul.f32 %v7483_v39, %v3265_v42  ;;  %v3311_v22 = vmul.f32 0.5, %v3298_v40 }
 0x636   : > { %v4674_v54 = vpop.eup %4673  ;;  %4276 = vmatmul.mubr.msk.f32.gmra.mrb[78].mxu0 %vm2685_vm2, %v3359_v46  ;;  %v3347_v37 = vadd.f32 1.0, %v4672_v35 }
 0x637   : > { %v3266_v27 = vmul.f32 %v4674_v54, %v7462_v18  ;;  %4278 = vmatprep.mubr.msk.f32.mxu0 %vm4766_vm0, %v7806_v5  ;;  %4679 = verf.f32 %v3324_v62  ;;  %v3299_v8 = vadd.f32 %v7488_v23, %v3282_v45 }
 0x638   : > { %v3360_v20 = vmul.f32 %v3347_v37, %v3308_v29 }
 0x639   : > { %v4676_v33 = vpop.eup %4675  ;;  %v3325_v24 = vmul.f32 0.70710677, %v3299_v8  ;;  %v3283_v49 = vmul.f32 %v7483_v39, %v3266_v27  ;;  %v3312_v16 = vmul.f32 0.5, %v3299_v8 }
 0x63a   : > { %4279 = vmatmul.mubr.msk.f32.gmra.mrb[80].mxu0 %vm2685_vm2, %v3360_v20  ;;  %v3348_v43 = vadd.f32 1.0, %v4676_v33 }
 0x63b   : > { %4281 = vmatprep.mubr.msk.f32.mxu0 %vm4766_vm0, %v7806_v5  ;;  %4681 = verf.f32 %v3325_v24  ;;  %v3300_v18 = vadd.f32 %v7488_v23, %v3283_v49 }
 0x63c   : > { %v3361_v0 = vmul.f32 %v3348_v43, %v3309_v17 }
 0x63d   : > { %v4678_v11 = vpop.eup %4677  ;;  %v3326_v61 = vmul.f32 0.70710677, %v3300_v18  ;;  %v3313_v41 = vmul.f32 0.5, %v3300_v18 }
 0x63e   : > { %4282 = vmatmul.mubr.msk.f32.gmra.mrb[82].mxu0 %vm2685_vm2, %v3361_v0  ;;  %v3349_v9 = vadd.f32 1.0, %v4678_v11 }
 0x63f   : > { %4284 = vmatprep.mubr.msk.f32.mxu0 %vm4766_vm0, %v7806_v5  ;;  %4683 = verf.f32 %v3326_v61 }
 0x640   : > { %v3362_v39 = vmul.f32 %v3349_v9, %v3310_v59 }
 0x641   : > { %v4680_v30 = vpop.eup %4679 }
 0x642   : > { %4285 = vmatmul.mubr.msk.f32.gmra.mrb[84].mxu0 %vm2685_vm2, %v3362_v39  ;;  %v3350_v48 = vadd.f32 1.0, %v4680_v30 }
 0x643   : > { %4287 = vmatprep.mubr.msk.f32.mxu0 %vm4766_vm0, %v7806_v5 }
 0x644   : > { %v3363_v23 = vmul.f32 %v3350_v48, %v3311_v22 }
 0x645   : > { %v4682_v1 = vpop.eup %4681 }
 0x646   : > { %4288 = vmatmul.mubr.msk.f32.gmra.mrb[86].mxu0 %vm2685_vm2, %v3363_v23  ;;  %v3351_v6 = vadd.f32 1.0, %v4682_v1 }
 0x647   : > { %4290 = vmatprep.mubr.msk.f32.mxu0 %vm4766_vm0, %v7806_v5 }
 0x648   : > { %v3364_v32 = vmul.f32 %v3351_v6, %v3312_v16 }
 0x649   : > { %v4684_v15 = vpop.eup %4683 }
 0x64a   : > { %4291 = vmatmul.mubr.msk.f32.gmra.mrb[88].mxu0 %vm2685_vm2, %v3364_v32  ;;  %v3352_v21 = vadd.f32 1.0, %v4684_v15 }
 0x64b   : > { %4293 = vmatprep.mubr.msk.f32.mxu0 %vm4766_vm0, %v7806_v5 }
 0x64c   : > { %v3365_v55 = vmul.f32 %v3352_v21, %v3313_v41 }
 0x64e   : > { %4294 = vmatmul.mubr.msk.f32.gmra.mrb[90].mxu0 %vm2685_vm2, %v3365_v55 }
 0x6f1   : > { %v3479_v47 = vpop.f32.mrb[66].mxu0 }
 0x6f2   : > { %v3480_v7 = vadd.f32 %v3479_v47, %v3373_v60  ;;  %v4259_v26 = vpop.f32.mrb[67].mxu0 }
 0x6f4   : > { %3543 = vst [vmem:[%s7572_s29] sm:$0xff] %v3480_v7 }
 0x6f5   : > { %v3484_v5 = vpop.f32.mrb[68].mxu0 }
 0x6f6   : > { %v3485_v14 = vadd.f32 %v3484_v5, %v3373_v60  ;;  %v4262_v19 = vpop.f32.mrb[69].mxu0 }
 0x6f8   : > { %3544 = vst [vmem:[%s7572_s29 + $0x8] sm:$0xff] %v3485_v14 }
 0x6f9   : > { %v3489_v51 = vpop.f32.mrb[70].mxu0 }
 0x6fa   : > { %v3490_v58 = vadd.f32 %v3489_v51, %v3373_v60  ;;  %v4265_v56 = vpop.f32.mrb[71].mxu0 }
 0x6fc   : > { %3545 = vst [vmem:[%s7572_s29 + $0x10] sm:$0xff] %v3490_v58 }
 0x6fd   : > { %v3494_v38 = vpop.f32.mrb[72].mxu0 }
 0x6fe   : > { %v3495_v12 = vadd.f32 %v3494_v38, %v3373_v60  ;;  %v4268_v31 = vpop.f32.mrb[73].mxu0 }
 0x700   : > { %3546 = vst [vmem:[%s7572_s29 + $0x18] sm:$0xff] %v3495_v12 }
 0x701   : > { %v3499_v34 = vpop.f32.mrb[74].mxu0 }
 0x702   : > { %v3500_v63 = vadd.f32 %v3499_v34, %v3373_v60  ;;  %v4271_v50 = vpop.f32.mrb[75].mxu0 }
 0x704   : > { %3547 = vst [vmem:[%s7572_s29 + $0x20] sm:$0xff] %v3500_v63 }
 0x705   : > { %v3504_v28 = vpop.f32.mrb[76].mxu0 }
 0x706   : > { %v3505_v57 = vadd.f32 %v3504_v28, %v3373_v60  ;;  %v4274_v2 = vpop.f32.mrb[77].mxu0 }
 0x708   : > { %3548 = vst [vmem:[%s7572_s29 + $0x28] sm:$0xff] %v3505_v57 }
 0x709   : > { %v3509_v4 = vpop.f32.mrb[78].mxu0 }
 0x70a   : > { %v3510_v53 = vadd.f32 %v3509_v4, %v3373_v60  ;;  %v4277_v3 = vpop.f32.mrb[79].mxu0 }
 0x70c   : > { %3549 = vst [vmem:[%s7572_s29 + $0x30] sm:$0xff] %v3510_v53 }
 0x70d   : > { %v3514_v36 = vpop.f32.mrb[80].mxu0 }
 0x70e   : > { %v3515_v25 = vadd.f32 %v3514_v36, %v3373_v60  ;;  %v4280_v13 = vpop.f32.mrb[81].mxu0 }
 0x710   : > { %3550 = vst [vmem:[%s7572_s29 + $0x38] sm:$0xff] %v3515_v25 }
 0x711   : > { %v3519_v10 = vpop.f32.mrb[82].mxu0 }
 0x712   : > { %v3520_v52 = vadd.f32 %v3519_v10, %v3373_v60  ;;  %v4283_v42 = vpop.f32.mrb[83].mxu0 }
 0x714   : > { %3551 = vst [vmem:[%s7572_s29 + $0x40] sm:$0xff] %v3520_v52 }
 0x715   : > { %v3524_v40 = vpop.f32.mrb[84].mxu0 }
 0x716   : > { %v3525_v46 = vadd.f32 %v3524_v40, %v3373_v60  ;;  %v4286_v35 = vpop.f32.mrb[85].mxu0 }
 0x718   : > { %3552 = vst [vmem:[%s7572_s29 + $0x48] sm:$0xff] %v3525_v46 }
 0x719   : > { %v3529_v62 = vpop.f32.mrb[86].mxu0 }
 0x71a   : > { %v3530_v45 = vadd.f32 %v3529_v62, %v3373_v60  ;;  %v4289_v54 = vpop.f32.mrb[87].mxu0 }
 0x71c   : > { %3553 = vst [vmem:[%s7572_s29 + $0x50] sm:$0xff] %v3530_v45 }
 0x71d   : > { %v3534_v29 = vpop.f32.mrb[88].mxu0 }
 0x71e   : > { %v3535_v37 = vadd.f32 %v3534_v29, %v3373_v60  ;;  %v4292_v27 = vpop.f32.mrb[89].mxu0 }
 0x720   : > { %3554 = vst [vmem:[%s7572_s29 + $0x58] sm:$0xff] %v3535_v37 }
 0x721   : > { %v3539_v8 = vpop.f32.mrb[90].mxu0 }
 0x722   : > { %v3540_v20 = vadd.f32 %v3539_v8, %v3373_v60  ;;  %v4295_v33 = vpop.f32.mrb[91].mxu0 }
 0x724   : > { %3555 = vst [vmem:[%s7572_s29 + $0x60] sm:$0xff] %v3540_v20 }
 0x725   : > { %4713 = shalt.err (!%p4710_p3)
}
 0x726   : > { %s4714_s27 = scalar_lea.hbm %s7593_s18, 1664  ;;  %s4718_s25 = scalar_lea.hbm %s7649_s10, 3328 }
 0x727   : > { %p4715_p4 = scmp.ne.s32.totalorder %s7593_s18, %s4714_s27  ;;  %p4719_p9 = scmp.lt.u32.totalorder %s7593_s18, %s7649_s10 }
 0x728   : > { %p4720_p10 = scmp.lt.u32.totalorder %s4718_s25, %s4714_s27  ;;  %p4722_p12 = scmp.lt.u32.totalorder %s4714_s27, %s7593_s18 }
 0x729   : > { %p4716_p7 = pnand %p4715_p4, %p4871_p5 }
 0x72a   : > { %p4721_p11 = por %p4720_p10, %p4719_p9 }
 0x72b   : > { %p4717_p8 = pneg %p4716_p7 }
 0x72c   : > { %p4723_p13 = por %p4722_p12, %p4721_p11 }
 0x72e   : > { %p4724_p0 = pnand %p4723_p13, %p4717_p8 }
 0x730   : > { %4727 = shalt.err (!%p4724_p0)
}
 0x731   : > { %s4776_s17 = smov 128   ;;  %s4777_s26 = smov 8  }
 0x732   : > { %4446 = dma.vmem_to_hbm [thread:$0]  (%p4871_p5), %s7588_s11, 1664, %s7593_s18, %s7598_s20, %s4776_s17, %s4776_s17, %s4777_s26  }
 0x733 PF: > { %p4452_p1 = scmp.ge.s32.totalorder %s4762_s16, 2  ;;  %s3585_s28 = sand.u32 1, %s4750_s13  }
 0x734   : > { %s3586_s27 = scalar_lea.sflag [#allocation3], %s3585_s28 }
 0x735   : > { %p4449_p2 = pnand %p4452_p1, %p4875_p6 }
 0x737   : > { %4745 = dma.done.wait (!%p4449_p2), %s3586_s27, 1664  }
 0x738   : > { %4747 = vsyncadd (!%p4449_p2), %s3586_s27, 4294965632  ;;  %p20_p3 = scmp.ge.s32.totalorder %s4858_s19, 4   ;;  %s7934_s13 = smov %s4754_s14 }
 0x739   : > { %s7935_s14 = smov %s4758_s15  ;;  %s7936_s15 = smov %s4869_s22 }
 0x73a   : > { %s7937_s16 = smov %s4858_s19  ;;  %22 = sbr.rel (!%p20_p3) target bundleno = 3 (0x3), region = 95 }
 0x741   :  { %3591 = vsyncpa [#allocation3], 1 }
 0x742   :  { %3593 = vsyncpa [#allocation3 + $0x1], 1 }

</bundles_post_ra>
